<compile_context>
chip_gen: v5e
topology: v5e:2x2
jax: 0.10.0
libtpu: 0.0.40
codegen_flags: <defaults>
</compile_context>

<pallas_src>
import functools

import jax
import jax.numpy as jnp
from jax.experimental import pallas as pl
from jax.experimental.pallas import tpu as pltpu

LANES = 128  # all matmul N dims padded to this for lane-dense stores


def _pad_last(a, n):
    pad = n - a.shape[-1]
    if pad <= 0:
        return a
    cfg = [(0, 0)] * (a.ndim - 1) + [(0, pad)]
    return jnp.pad(a, cfg)


# ---------------------------------------------------------------------------
# Pallas kernels
# ---------------------------------------------------------------------------
def _matmul_bias_relu_kernel(x_ref, w_ref, b_ref, o_ref, *, apply_relu):
    acc = jnp.dot(x_ref[...], w_ref[...], preferred_element_type=jnp.float32)
    acc = acc + b_ref[...]
    if apply_relu:
        acc = jnp.maximum(acc, 0.0)
    o_ref[...] = acc


def matmul_bias_relu(x, w, b, *, apply_relu):
    """y = relu?(x @ w + b). Single full-block grid step (N pre-padded to 128)."""
    M, K = x.shape
    Kw, N = w.shape
    assert K == Kw and N % LANES == 0
    return pl.pallas_call(
        functools.partial(_matmul_bias_relu_kernel, apply_relu=apply_relu),
        out_shape=jax.ShapeDtypeStruct((M, N), jnp.float32),
        grid=(1,),
        in_specs=[
            pl.BlockSpec((M, K), lambda i: (0, 0)),
            pl.BlockSpec((K, N), lambda i: (0, 0)),
            pl.BlockSpec((1, N), lambda i: (0, 0)),
        ],
        out_specs=pl.BlockSpec((M, N), lambda i: (0, 0)),
        compiler_params=pltpu.CompilerParams(
            dimension_semantics=("arbitrary",)),
        cost_estimate=pl.CostEstimate(
            flops=2 * M * K * N,
            transcendentals=0,
            bytes_accessed=x.size * x.dtype.itemsize
            + w.size * w.dtype.itemsize + 4 * M * N),
    )(x, w, b)


def _conv2_pool_kernel(p_ref, w_ref, b_ref, o_ref):
    # One pooling quadrant per grid step; output block is VMEM-resident across
    # the (arbitrary) quadrant axis and max-accumulates the 2x2 pool.
    q = pl.program_id(0)
    z = jnp.dot(p_ref[0], w_ref[...], preferred_element_type=jnp.float32)
    z = jnp.maximum(z + b_ref[...], 0.0)

    @pl.when(q == 0)
    def _():
        o_ref[...] = z

    @pl.when(q > 0)
    def _():
        o_ref[...] = jnp.maximum(o_ref[...], z)


def conv2_relu_maxpool(patches_q, w, b):
    """patches_q: [4, Mp, K] quadrant-major im2col of conv1 output.
    Returns max over quadrants of relu(patches_q[q] @ w + b): [Mp, 128]."""
    Q, Mp, K = patches_q.shape
    _, N = w.shape
    # NOTE: for larger batches, add a leading "parallel" M-tiling grid axis so
    # v7x's two TensorCores both get work; at B=2 a single M block is best.
    return pl.pallas_call(
        _conv2_pool_kernel,
        out_shape=jax.ShapeDtypeStruct((Mp, N), jnp.float32),
        grid=(Q,),
        in_specs=[
            pl.BlockSpec((1, Mp, K), lambda q: (q, 0, 0)),
            pl.BlockSpec((K, N), lambda q: (0, 0)),
            pl.BlockSpec((1, N), lambda q: (0, 0)),
        ],
        out_specs=pl.BlockSpec((Mp, N), lambda q: (0, 0)),
        compiler_params=pltpu.CompilerParams(
            dimension_semantics=("arbitrary",)),
        cost_estimate=pl.CostEstimate(
            flops=2 * Q * Mp * K * N,
            transcendentals=0,
            bytes_accessed=patches_q.size * patches_q.dtype.itemsize
            + w.size * w.dtype.itemsize + 4 * Mp * N),
    )(patches_q, w, b)


def _fc_fused_kernel(x_ref, w1_ref, b1_ref, w2_ref, b2_ref, o_ref):
    h = jnp.dot(x_ref[...], w1_ref[...], preferred_element_type=jnp.float32)
    h = jnp.maximum(h + b1_ref[...], 0.0)
    o = jnp.dot(h, w2_ref[...], preferred_element_type=jnp.float32)
    o_ref[...] = o + b2_ref[...]


def fc_fused(x, w1, b1, w2, b2):
    """logits_padded = (relu(x @ w1 + b1)) @ w2 + b2 in a single kernel."""
    M, K = x.shape
    _, H = w1.shape
    _, N = w2.shape
    return pl.pallas_call(
        _fc_fused_kernel,
        out_shape=jax.ShapeDtypeStruct((M, N), jnp.float32),
        grid=(1,),
        in_specs=[
            pl.BlockSpec((M, K), lambda i: (0, 0)),
            pl.BlockSpec((K, H), lambda i: (0, 0)),
            pl.BlockSpec((1, H), lambda i: (0, 0)),
            pl.BlockSpec((H, N), lambda i: (0, 0)),
            pl.BlockSpec((1, N), lambda i: (0, 0)),
        ],
        out_specs=pl.BlockSpec((M, N), lambda i: (0, 0)),
        compiler_params=pltpu.CompilerParams(
            dimension_semantics=("arbitrary",)),
        cost_estimate=pl.CostEstimate(
            flops=2 * M * K * H + 2 * M * H * N,
            transcendentals=0,
            bytes_accessed=x.size * x.dtype.itemsize
            + w1.size * w1.dtype.itemsize + w2.size * w2.dtype.itemsize
            + 4 * M * N),
    )(x, w1, b1, w2, b2)


# ---------------------------------------------------------------------------
# JAX glue: im2col in NHWC, (kh, kw, Cin) flatten order (no transposes)
# ---------------------------------------------------------------------------
def _im2col_conv1(x):
    """x: [B, 1, 28, 28] -> [B*25*25, 16]; K flatten order is (kh, kw)."""
    B = x.shape[0]
    x2 = x.reshape(B, 28, 28)  # Cin == 1, so NCHW -> NHWC is a free reshape
    taps_i = []
    for i in range(4):
        taps_j = [x2[:, i:i + 25, j:j + 25] for j in range(4)]
        taps_i.append(jnp.stack(taps_j, axis=3))        # [B,25,25,4(j)]
    p = jnp.stack(taps_i, axis=3)                       # [B,25,25,4(i),4(j)]
    return p.reshape(B * 25 * 25, 16)


def _im2col_conv2_pool_quadrants(a1):
    """a1: [B, 25, 25, 32] (NHWC conv1 output) -> [4, B*11*11, 512].

    Axis 0 is the 2x2 max-pool quadrant q = 2*dh + dw; within a quadrant rows
    are (b, ph, pw) and the K axis is flattened as (kh, kw, cin) to match the
    conv2 weight reshape."""
    B, _, _, C = a1.shape
    quads = []
    for dh in range(2):
        for dw in range(2):
            taps_i = []
            for i in range(4):
                taps_j = [
                    a1[:, dh + i:dh + i + 22:2, dw + j:dw + j + 22:2, :]
                    for j in range(4)
                ]
                taps_i.append(jnp.stack(taps_j, axis=3))   # [B,11,11,4(j),C]
            p = jnp.stack(taps_i, axis=3)                  # [B,11,11,4(i),4(j),C]
            quads.append(p.reshape(B * 11 * 11, 16 * C))
    return jnp.stack(quads, axis=0)                        # [4, B*121, 16*C]


def cnn_forward(x, params):
    B = x.shape[0]
    compute_dtype = jnp.bfloat16  # MXU inputs; accumulation / epilogue stay f32

    # ---- weight prep (tiny; N dims padded to 128 once) --------------------
    # Conv weights [Cout,Cin,kh,kw] -> [kh*kw*Cin, Cout_padded]
    w1m = _pad_last(params["conv1_w"].transpose(2, 3, 1, 0).reshape(16, 32),
                    LANES).astype(compute_dtype)
    b1p = _pad_last(params["conv1_b"], LANES).reshape(1, LANES)
    w2m = _pad_last(params["conv2_w"].transpose(2, 3, 1, 0).reshape(512, 32),
                    LANES).astype(compute_dtype)
    b2p = _pad_last(params["conv2_b"], LANES).reshape(1, LANES)
    # Linear weights are [out, in] in PyTorch
    wf1 = params["fc1_w"].T.astype(compute_dtype)            # [3872, 128]
    bf1 = params["fc1_b"].reshape(1, 128)
    wf2 = _pad_last(params["fc2_w"].T, LANES)                 # [128, 128] f32
    bf2 = _pad_last(params["fc2_b"], LANES).reshape(1, LANES)

    # ---- conv1 + ReLU ------------------------------------------------------
    p1 = _im2col_conv1(x).astype(compute_dtype)               # [B*625, 16]
    c1 = matmul_bias_relu(p1, w1m, b1p, apply_relu=True)      # [B*625, 128]
    a1 = c1[:, :32].reshape(B, 25, 25, 32)                    # NHWC

    # ---- conv2 + ReLU + 2x2 MaxPool (one fused kernel) ---------------------
    p2 = _im2col_conv2_pool_quadrants(a1).astype(compute_dtype)  # [4, B*121, 512]
    pooled = conv2_relu_maxpool(p2, w2m, b2p)                 # [B*121, 128]
    # TODO(synk): Dropout(0.25)/Dropout(0.5) are identity in eval/inference mode.

    # ---- flatten in PyTorch (C, H, W) order, fused fc1+fc2 -----------------
    flat = (pooled[:, :32].reshape(B, 11, 11, 32)
            .transpose(0, 3, 1, 2).reshape(B, 11 * 11 * 32))  # matches view(-1, 3872)
    logits = fc_fused(flat.astype(compute_dtype), wf1, bf1, wf2, bf2)
    return logits[:, :10]


def init_params(key):
    ks = jax.random.split(key, 8)
    return {
        # PyTorch shapes: Conv2d(weight=[Cout,Cin,kh,kw]), Linear(weight=[out,in])
        "conv1_w": 0.1 * jax.random.normal(ks[0], (32, 1, 4, 4), jnp.float32),
        "conv1_b": 0.1 * jax.random.normal(ks[1], (32,), jnp.float32),
        "conv2_w": 0.05 * jax.random.normal(ks[2], (32, 32, 4, 4), jnp.float32),
        "conv2_b": 0.1 * jax.random.normal(ks[3], (32,), jnp.float32),
        "fc1_w": 0.02 * jax.random.normal(ks[4], (128, 11 * 11 * 32), jnp.float32),
        "fc1_b": 0.1 * jax.random.normal(ks[5], (128,), jnp.float32),
        "fc2_w": 0.05 * jax.random.normal(ks[6], (10, 128), jnp.float32),
        "fc2_b": 0.1 * jax.random.normal(ks[7], (10,), jnp.float32),
    }


if __name__ == "__main__":
    # The module's hard-coded view(-1, 11*11*32) implies 28x28 spatial input.
    key = jax.random.PRNGKey(0)
    k_x, k_p = jax.random.split(key)
    x = jax.random.normal(k_x, (2, 1, 28, 28), jnp.float32)
    params = init_params(k_p)

    fwd = jax.jit(cnn_forward)
    out = fwd(x, params)
    jax.block_until_ready(out)
    assert out.shape == (2, 10), out.shape
    print("KERNEL_OK")
</pallas_src>

<mosaic_0001>
module attributes {stable_mosaic.version = 11 : i64} {
  func.func @_matmul_bias_relu_kernel(%arg0: i32, %arg1: memref<1250x16xbf16, #tpu.memory_space<vmem>>, %arg2: memref<16x128xbf16, #tpu.memory_space<vmem>>, %arg3: memref<1x128xf32, #tpu.memory_space<vmem>>, %arg4: memref<1250x128xf32, #tpu.memory_space<vmem>>) attributes {dimension_semantics = [#tpu.dimension_semantics<arbitrary>], iteration_bounds = array<i64: 1>, scalar_prefetch = 0 : i64, scratch_operands = 0 : i64, tpu.core_type = #tpu.core_type<tc>, window_params = [{pipeline_mode = #tpu.pipeline_mode<synchronous>, transform_indices = @transform_0, window_bounds = array<i64: 1250, 16>}, {pipeline_mode = #tpu.pipeline_mode<synchronous>, transform_indices = @transform_1, window_bounds = array<i64: 16, 128>}, {pipeline_mode = #tpu.pipeline_mode<synchronous>, transform_indices = @transform_2, window_bounds = array<i64: 1, 128>}, {pipeline_mode = #tpu.pipeline_mode<synchronous>, transform_indices = @transform_3, window_bounds = array<i64: 1250, 128>}]} {
    %c0 = arith.constant 0 : index
    %c0_0 = arith.constant 0 : index
    %0 = vector.load %arg1[%c0, %c0_0] : memref<1250x16xbf16, #tpu.memory_space<vmem>>, vector<1250x16xbf16>
    %c0_1 = arith.constant 0 : index
    %c0_2 = arith.constant 0 : index
    %1 = vector.load %arg2[%c0_1, %c0_2] : memref<16x128xbf16, #tpu.memory_space<vmem>>, vector<16x128xbf16>
    %cst = arith.constant dense<0.000000e+00> : vector<1250x128xf32>
    %2 = tpu.matmul %0, %1, %cst {dimension_numbers = #tpu.dot_dimension_numbers<[1], [0], [0], [1], [0, 0, 1, 1], [], []>} : vector<1250x16xbf16>, vector<16x128xbf16>, vector<1250x128xf32> -> vector<1250x128xf32>
    %c0_3 = arith.constant 0 : index
    %c0_4 = arith.constant 0 : index
    %3 = vector.load %arg3[%c0_3, %c0_4] : memref<1x128xf32, #tpu.memory_space<vmem>>, vector<1x128xf32>
    %4 = vector.broadcast %3 : vector<1x128xf32> to vector<1250x128xf32>
    %5 = arith.addf %2, %4 : vector<1250x128xf32>
    %cst_5 = arith.constant 0.000000e+00 : f32
    %6 = vector.broadcast %cst_5 : f32 to vector<1250x128xf32>
    %7 = arith.maximumf %5, %6 : vector<1250x128xf32>
    %c0_6 = arith.constant 0 : index
    %c0_7 = arith.constant 0 : index
    %8 = vector.load %arg4[%c0_6, %c0_7] : memref<1250x128xf32, #tpu.memory_space<vmem>>, vector<1250x128xf32>
    tpu.vector_store %arg4[%c0_6, %c0_7], %7 {strides = array<i32>} : memref<1250x128xf32, #tpu.memory_space<vmem>>, vector<1250x128xf32>,
    return
  }
  func.func @transform_0(%arg0: i32) -> (i32, i32) {
    %c0_i32 = arith.constant 0 : i32
    %c0_i32_0 = arith.constant 0 : i32
    %c0_i32_1 = arith.constant 0 : i32
    return %c0_i32, %c0_i32_0 : i32, i32
  }
  func.func @transform_1(%arg0: i32) -> (i32, i32) {
    %c0_i32 = arith.constant 0 : i32
    %c0_i32_0 = arith.constant 0 : i32
    %c0_i32_1 = arith.constant 0 : i32
    return %c0_i32, %c0_i32_0 : i32, i32
  }
  func.func @transform_2(%arg0: i32) -> (i32, i32) {
    %c0_i32 = arith.constant 0 : i32
    %c0_i32_0 = arith.constant 0 : i32
    %c0_i32_1 = arith.constant 0 : i32
    return %c0_i32, %c0_i32_0 : i32, i32
  }
  func.func @transform_3(%arg0: i32) -> (i32, i32) {
    %c0_i32 = arith.constant 0 : i32
    %c0_i32_0 = arith.constant 0 : i32
    %c0_i32_1 = arith.constant 0 : i32
    return %c0_i32, %c0_i32_0 : i32, i32
  }
}

module attributes {stable_mosaic.version = 11 : i64} {
  func.func @_conv2_pool_kernel(%arg0: i32, %arg1: memref<1x242x512xbf16, #tpu.memory_space<vmem>>, %arg2: memref<512x128xbf16, #tpu.memory_space<vmem>>, %arg3: memref<1x128xf32, #tpu.memory_space<vmem>>, %arg4: memref<242x128xf32, #tpu.memory_space<vmem>>) attributes {dimension_semantics = [#tpu.dimension_semantics<arbitrary>], iteration_bounds = array<i64: 4>, scalar_prefetch = 0 : i64, scratch_operands = 0 : i64, tpu.core_type = #tpu.core_type<tc>, window_params = [{transform_indices = @transform_0, window_bounds = array<i64: 1, 242, 512>}, {pipeline_mode = #tpu.pipeline_mode<synchronous>, transform_indices = @transform_1, window_bounds = array<i64: 512, 128>}, {pipeline_mode = #tpu.pipeline_mode<synchronous>, transform_indices = @transform_2, window_bounds = array<i64: 1, 128>}, {pipeline_mode = #tpu.pipeline_mode<synchronous>, transform_indices = @transform_3, window_bounds = array<i64: 242, 128>}]} {
    %c0 = arith.constant 0 : index
    %c0_0 = arith.constant 0 : index
    %c0_1 = arith.constant 0 : index
    %0 = vector.load %arg1[%c0, %c0_0, %c0_1] : memref<1x242x512xbf16, #tpu.memory_space<vmem>>, vector<1x242x512xbf16>
    %1 = vector.shape_cast %0 : vector<1x242x512xbf16> to vector<242x512xbf16>
    %c0_2 = arith.constant 0 : index
    %c0_3 = arith.constant 0 : index
    %2 = vector.load %arg2[%c0_2, %c0_3] : memref<512x128xbf16, #tpu.memory_space<vmem>>, vector<512x128xbf16>
    %cst = arith.constant dense<0.000000e+00> : vector<242x128xf32>
    %3 = tpu.matmul %1, %2, %cst {dimension_numbers = #tpu.dot_dimension_numbers<[1], [0], [0], [1], [0, 0, 1, 1], [], []>} : vector<242x512xbf16>, vector<512x128xbf16>, vector<242x128xf32> -> vector<242x128xf32>
    %c0_4 = arith.constant 0 : index
    %c0_5 = arith.constant 0 : index
    %4 = vector.load %arg3[%c0_4, %c0_5] : memref<1x128xf32, #tpu.memory_space<vmem>>, vector<1x128xf32>
    %5 = vector.broadcast %4 : vector<1x128xf32> to vector<242x128xf32>
    %6 = arith.addf %3, %5 : vector<242x128xf32>
    %cst_6 = arith.constant 0.000000e+00 : f32
    %7 = vector.broadcast %cst_6 : f32 to vector<242x128xf32>
    %8 = arith.maximumf %6, %7 : vector<242x128xf32>
    %c0_i32 = arith.constant 0 : i32
    %9 = arith.cmpi eq, %arg0, %c0_i32 : i32
    %10 = arith.extui %9 : i1 to i32
    %c0_i32_7 = arith.constant 0 : i32
    %11 = arith.cmpi ne, %10, %c0_i32_7 : i32
    scf.if %11 {
      %c0_10 = arith.constant 0 : index
      %c0_11 = arith.constant 0 : index
      %15 = vector.load %arg4[%c0_10, %c0_11] : memref<242x128xf32, #tpu.memory_space<vmem>>, vector<242x128xf32>
      tpu.vector_store %arg4[%c0_10, %c0_11], %8 {strides = array<i32>} : memref<242x128xf32, #tpu.memory_space<vmem>>, vector<242x128xf32>,
    } else {
    }
    %c0_i32_8 = arith.constant 0 : i32
    %12 = arith.cmpi sgt, %arg0, %c0_i32_8 : i32
    %13 = arith.extui %12 : i1 to i32
    %c0_i32_9 = arith.constant 0 : i32
    %14 = arith.cmpi ne, %13, %c0_i32_9 : i32
    scf.if %14 {
      %c0_10 = arith.constant 0 : index
      %c0_11 = arith.constant 0 : index
      %15 = vector.load %arg4[%c0_10, %c0_11] : memref<242x128xf32, #tpu.memory_space<vmem>>, vector<242x128xf32>
      %16 = arith.maximumf %15, %8 : vector<242x128xf32>
      %c0_12 = arith.constant 0 : index
      %c0_13 = arith.constant 0 : index
      %17 = vector.load %arg4[%c0_12, %c0_13] : memref<242x128xf32, #tpu.memory_space<vmem>>, vector<242x128xf32>
      tpu.vector_store %arg4[%c0_12, %c0_13], %16 {strides = array<i32>} : memref<242x128xf32, #tpu.memory_space<vmem>>, vector<242x128xf32>,
    } else {
    }
    return
  }
  func.func @transform_0(%arg0: i32) -> (i32, i32, i32) {
    %c0_i32 = arith.constant 0 : i32
    %c0_i32_0 = arith.constant 0 : i32
    %c0_i32_1 = arith.constant 0 : i32
    return %arg0, %c0_i32, %c0_i32_0 : i32, i32, i32
  }
  func.func @transform_1(%arg0: i32) -> (i32, i32) {
    %c0_i32 = arith.constant 0 : i32
    %c0_i32_0 = arith.constant 0 : i32
    %c0_i32_1 = arith.constant 0 : i32
    return %c0_i32, %c0_i32_0 : i32, i32
  }
  func.func @transform_2(%arg0: i32) -> (i32, i32) {
    %c0_i32 = arith.constant 0 : i32
    %c0_i32_0 = arith.constant 0 : i32
    %c0_i32_1 = arith.constant 0 : i32
    return %c0_i32, %c0_i32_0 : i32, i32
  }
  func.func @transform_3(%arg0: i32) -> (i32, i32) {
    %c0_i32 = arith.constant 0 : i32
    %c0_i32_0 = arith.constant 0 : i32
    %c0_i32_1 = arith.constant 0 : i32
    return %c0_i32, %c0_i32_0 : i32, i32
  }
}

module attributes {stable_mosaic.version = 11 : i64} {
  func.func @_fc_fused_kernel(%arg0: i32, %arg1: memref<2x3872xbf16, #tpu.memory_space<vmem>>, %arg2: memref<3872x128xbf16, #tpu.memory_space<vmem>>, %arg3: memref<1x128xf32, #tpu.memory_space<vmem>>, %arg4: memref<128x128xf32, #tpu.memory_space<vmem>>, %arg5: memref<1x128xf32, #tpu.memory_space<vmem>>, %arg6: memref<2x128xf32, #tpu.memory_space<vmem>>) attributes {dimension_semantics = [#tpu.dimension_semantics<arbitrary>], iteration_bounds = array<i64: 1>, scalar_prefetch = 0 : i64, scratch_operands = 0 : i64, tpu.core_type = #tpu.core_type<tc>, window_params = [{pipeline_mode = #tpu.pipeline_mode<synchronous>, transform_indices = @transform_0, window_bounds = array<i64: 2, 3872>}, {pipeline_mode = #tpu.pipeline_mode<synchronous>, transform_indices = @transform_1, window_bounds = array<i64: 3872, 128>}, {pipeline_mode = #tpu.pipeline_mode<synchronous>, transform_indices = @transform_2, window_bounds = array<i64: 1, 128>}, {pipeline_mode = #tpu.pipeline_mode<synchronous>, transform_indices = @transform_3, window_bounds = array<i64: 128, 128>}, {pipeline_mode = #tpu.pipeline_mode<synchronous>, transform_indices = @transform_4, window_bounds = array<i64: 1, 128>}, {pipeline_mode = #tpu.pipeline_mode<synchronous>, transform_indices = @transform_5, window_bounds = array<i64: 2, 128>}]} {
    %c0 = arith.constant 0 : index
    %c0_0 = arith.constant 0 : index
    %0 = vector.load %arg1[%c0, %c0_0] : memref<2x3872xbf16, #tpu.memory_space<vmem>>, vector<2x3872xbf16>
    %c0_1 = arith.constant 0 : index
    %c0_2 = arith.constant 0 : index
    %1 = vector.load %arg2[%c0_1, %c0_2] : memref<3872x128xbf16, #tpu.memory_space<vmem>>, vector<3872x128xbf16>
    %cst = arith.constant dense<0.000000e+00> : vector<2x128xf32>
    %2 = tpu.matmul %0, %1, %cst {dimension_numbers = #tpu.dot_dimension_numbers<[1], [0], [0], [1], [0, 0, 1, 1], [], []>} : vector<2x3872xbf16>, vector<3872x128xbf16>, vector<2x128xf32> -> vector<2x128xf32>
    %c0_3 = arith.constant 0 : index
    %c0_4 = arith.constant 0 : index
    %3 = vector.load %arg3[%c0_3, %c0_4] : memref<1x128xf32, #tpu.memory_space<vmem>>, vector<1x128xf32>
    %4 = vector.broadcast %3 : vector<1x128xf32> to vector<2x128xf32>
    %5 = arith.addf %2, %4 : vector<2x128xf32>
    %cst_5 = arith.constant 0.000000e+00 : f32
    %6 = vector.broadcast %cst_5 : f32 to vector<2x128xf32>
    %7 = arith.maximumf %5, %6 : vector<2x128xf32>
    %c0_6 = arith.constant 0 : index
    %c0_7 = arith.constant 0 : index
    %8 = vector.load %arg4[%c0_6, %c0_7] : memref<128x128xf32, #tpu.memory_space<vmem>>, vector<128x128xf32>
    %cst_8 = arith.constant dense<0.000000e+00> : vector<2x128xf32>
    %9 = tpu.matmul %7, %8, %cst_8 {dimension_numbers = #tpu.dot_dimension_numbers<[1], [0], [0], [1], [0, 0, 1, 1], [], []>} : vector<2x128xf32>, vector<128x128xf32>, vector<2x128xf32> -> vector<2x128xf32>
    %c0_9 = arith.constant 0 : index
    %c0_10 = arith.constant 0 : index
    %10 = vector.load %arg5[%c0_9, %c0_10] : memref<1x128xf32, #tpu.memory_space<vmem>>, vector<1x128xf32>
    %11 = vector.broadcast %10 : vector<1x128xf32> to vector<2x128xf32>
    %12 = arith.addf %9, %11 : vector<2x128xf32>
    %c0_11 = arith.constant 0 : index
    %c0_12 = arith.constant 0 : index
    %13 = vector.load %arg6[%c0_11, %c0_12] : memref<2x128xf32, #tpu.memory_space<vmem>>, vector<2x128xf32>
    tpu.vector_store %arg6[%c0_11, %c0_12], %12 {strides = array<i32>} : memref<2x128xf32, #tpu.memory_space<vmem>>, vector<2x128xf32>,
    return
  }
  func.func @transform_0(%arg0: i32) -> (i32, i32) {
    %c0_i32 = arith.constant 0 : i32
    %c0_i32_0 = arith.constant 0 : i32
    %c0_i32_1 = arith.constant 0 : i32
    return %c0_i32, %c0_i32_0 : i32, i32
  }
  func.func @transform_1(%arg0: i32) -> (i32, i32) {
    %c0_i32 = arith.constant 0 : i32
    %c0_i32_0 = arith.constant 0 : i32
    %c0_i32_1 = arith.constant 0 : i32
    return %c0_i32, %c0_i32_0 : i32, i32
  }
  func.func @transform_2(%arg0: i32) -> (i32, i32) {
    %c0_i32 = arith.constant 0 : i32
    %c0_i32_0 = arith.constant 0 : i32
    %c0_i32_1 = arith.constant 0 : i32
    return %c0_i32, %c0_i32_0 : i32, i32
  }
  func.func @transform_3(%arg0: i32) -> (i32, i32) {
    %c0_i32 = arith.constant 0 : i32
    %c0_i32_0 = arith.constant 0 : i32
    %c0_i32_1 = arith.constant 0 : i32
    return %c0_i32, %c0_i32_0 : i32, i32
  }
  func.func @transform_4(%arg0: i32) -> (i32, i32) {
    %c0_i32 = arith.constant 0 : i32
    %c0_i32_0 = arith.constant 0 : i32
    %c0_i32_1 = arith.constant 0 : i32
    return %c0_i32, %c0_i32_0 : i32, i32
  }
  func.func @transform_5(%arg0: i32) -> (i32, i32) {
    %c0_i32 = arith.constant 0 : i32
    %c0_i32_0 = arith.constant 0 : i32
    %c0_i32_1 = arith.constant 0 : i32
    return %c0_i32, %c0_i32_0 : i32, i32
  }
}

</mosaic_0001>

<bundles_post_ra>
// kernel: cnn_forward.3
= control target key start
LH: loop header
LB: loop body
LE: loop exit
PB: predicated region body
PF: predicated region fallthrough
CT: control target
= control target key end

     0   :  { %vm577_vm0 = vcmask 130048   ;;  %s2992_s1 = inlined_call_operand.vmem [shape: bf16[16,128], index: 1, kind: input, shape index: {}]   ;;  %s2993_s0 = inlined_call_operand.vmem [shape: bf16[1250,16], index: 0, kind: input, shape index: {}]   ;;  %s2994_s2 = inlined_call_operand.vmem [shape: f32[1,128], index: 2, kind: input, shape index: {}]   ;;  %s2995_s3 = inlined_call_operand.vmem [shape: f32[1250,128], index: 3, kind: output, shape index: {}]  }
   0x1   :  { %v2009_v0 = vld [vmem:[%s2992_s1] sm:$0xff]  ;;  %v1932_v5 = vld [vmem:[%s2993_s0 + $0x8] sm:$0xff]  ;;  %v1933_v9 = vld [vmem:[%s2993_s0 + $0x10] sm:$0xff] }
   0x2   :  { %v1931_v1 = vld [vmem:[%s2993_s0] sm:$0xff]  ;;  %822 = vmatpush.bf16.msra.mxu0 %v2009_v0  ;;  %2010 = vmatpush.bf16.msra.mxu1 %v2009_v0  ;;  %v1952_v6 = vld [vmem:[%s2993_s0 + $0xa8] sm:$0xff]  ;;  %v1953_v10 = vld [vmem:[%s2993_s0 + $0xb0] sm:$0xff] }
   0x3   :  { %v1951_v2 = vld [vmem:[%s2993_s0 + $0xa0] sm:$0xff]  ;;  %2011 = vmatpush.bf16.msra.mxu2 %v2009_v0  ;;  %2012 = vmatpush.bf16.msra.mxu3 %v2009_v0  ;;  %v1972_v7 = vld [vmem:[%s2993_s0 + $0x148] sm:$0xff]  ;;  %v1973_v11 = vld [vmem:[%s2993_s0 + $0x150] sm:$0xff] }
   0x4   :  { %v1971_v3 = vld [vmem:[%s2993_s0 + $0x140] sm:$0xff]  ;;  %v1992_v8 = vld [vmem:[%s2993_s0 + $0x1e8] sm:$0xff]  ;;  %v1993_v12 = vld [vmem:[%s2993_s0 + $0x1f0] sm:$0xff] }
   0x5   :  { %v1991_v4 = vld [vmem:[%s2993_s0 + $0x1e0] sm:$0xff]  ;;  %1852 = vmatmul.msk.bf16.vlgmr.msra.gmra.mxu0 %vm577_vm0, %v1931_v1  ;;  %1872 = vmatmul.msk.bf16.vlgmr.msra.gmra.mxu1 %vm577_vm0, %v1951_v2  ;;  %v1934_v13 = vld [vmem:[%s2993_s0 + $0x18] sm:$0xff]  ;;  %v1936_v21 = vld [vmem:[%s2993_s0 + $0x28] sm:$0xff] }
   0x6   :  { %1892 = vmatmul.msk.bf16.vlgmr.msra.gmra.mxu2 %vm577_vm0, %v1971_v3  ;;  %1912 = vmatmul.msk.bf16.vlgmr.msra.gmra.mxu3 %vm577_vm0, %v1991_v4  ;;  %v1954_v14 = vld [vmem:[%s2993_s0 + $0xb8] sm:$0xff]  ;;  %v1935_v17 = vld [vmem:[%s2993_s0 + $0x20] sm:$0xff]  ;;  %v1956_v22 = vld [vmem:[%s2993_s0 + $0xc8] sm:$0xff] }
   0x7   :  { %v1974_v15 = vld [vmem:[%s2993_s0 + $0x158] sm:$0xff]  ;;  %v1955_v18 = vld [vmem:[%s2993_s0 + $0xc0] sm:$0xff]  ;;  %v1976_v23 = vld [vmem:[%s2993_s0 + $0x168] sm:$0xff] }
   0x8   :  { %v1994_v16 = vld [vmem:[%s2993_s0 + $0x1f8] sm:$0xff]  ;;  %v1975_v19 = vld [vmem:[%s2993_s0 + $0x160] sm:$0xff]  ;;  %v1996_v24 = vld [vmem:[%s2993_s0 + $0x208] sm:$0xff] }
   0x9   :  { %v1995_v20 = vld [vmem:[%s2993_s0 + $0x200] sm:$0xff]  ;;  %v1937_v25 = vld [vmem:[%s2993_s0 + $0x30] sm:$0xff]  ;;  %v1938_v29 = vld [vmem:[%s2993_s0 + $0x38] sm:$0xff] }
   0xa   :  { %v1957_v26 = vld [vmem:[%s2993_s0 + $0xd0] sm:$0xff]  ;;  %v1958_v30 = vld [vmem:[%s2993_s0 + $0xd8] sm:$0xff]  ;;  %v2169_v33 = vld [vmem:[%s2994_s2] ss:$0 sm:$0xff] }
   0xb   :  { %v1977_v27 = vld [vmem:[%s2993_s0 + $0x170] sm:$0xff]  ;;  %v1978_v31 = vld [vmem:[%s2993_s0 + $0x178] sm:$0xff]  ;;  %v1939_v34 = vld [vmem:[%s2993_s0 + $0x40] sm:$0xff] }
   0xc   :  { %v1997_v28 = vld [vmem:[%s2993_s0 + $0x210] sm:$0xff]  ;;  %v1998_v32 = vld [vmem:[%s2993_s0 + $0x218] sm:$0xff]  ;;  %v1959_v35 = vld [vmem:[%s2993_s0 + $0xe0] sm:$0xff] }
   0xd   :  { %v1979_v38 = vld [vmem:[%s2993_s0 + $0x180] sm:$0xff]  ;;  %v1940_v57 = vld [vmem:[%s2993_s0 + $0x48] sm:$0xff] }
   0xe   :  { %v1999_v39 = vld [vmem:[%s2993_s0 + $0x220] sm:$0xff]  ;;  %v1960_v58 = vld [vmem:[%s2993_s0 + $0xe8] sm:$0xff] }
   0xf   :  { %v1980_v63 = vld [vmem:[%s2993_s0 + $0x188] sm:$0xff] }
  0x10   :  { %v2000_v1 = vld [vmem:[%s2993_s0 + $0x228] sm:$0xff] }
  0x15   :  { %1853 = vmatmul.msk.bf16.gmra.mxu0 %vm577_vm0, %v1932_v5  ;;  %1873 = vmatmul.msk.bf16.gmra.mxu1 %vm577_vm0, %v1952_v6 }
  0x16   :  { %1893 = vmatmul.msk.bf16.gmra.mxu2 %vm577_vm0, %v1972_v7  ;;  %1913 = vmatmul.msk.bf16.gmra.mxu3 %vm577_vm0, %v1992_v8 }
  0x25   :  { %1854 = vmatmul.msk.bf16.gmra.mxu0 %vm577_vm0, %v1933_v9  ;;  %1874 = vmatmul.msk.bf16.gmra.mxu1 %vm577_vm0, %v1953_v10 }
  0x26   :  { %1894 = vmatmul.msk.bf16.gmra.mxu2 %vm577_vm0, %v1973_v11  ;;  %1914 = vmatmul.msk.bf16.gmra.mxu3 %vm577_vm0, %v1993_v12 }
  0x35   :  { %1855 = vmatmul.msk.bf16.gmra.mxu0 %vm577_vm0, %v1934_v13  ;;  %1875 = vmatmul.msk.bf16.gmra.mxu1 %vm577_vm0, %v1954_v14 }
  0x36   :  { %1895 = vmatmul.msk.bf16.gmra.mxu2 %vm577_vm0, %v1974_v15  ;;  %1915 = vmatmul.msk.bf16.gmra.mxu3 %vm577_vm0, %v1994_v16 }
  0x45   :  { %1856 = vmatmul.msk.bf16.gmra.mxu0 %vm577_vm0, %v1935_v17  ;;  %1876 = vmatmul.msk.bf16.gmra.mxu1 %vm577_vm0, %v1955_v18 }
  0x46   :  { %1896 = vmatmul.msk.bf16.gmra.mxu2 %vm577_vm0, %v1975_v19  ;;  %1916 = vmatmul.msk.bf16.gmra.mxu3 %vm577_vm0, %v1995_v20 }
  0x55   :  { %1857 = vmatmul.msk.bf16.gmra.mxu0 %vm577_vm0, %v1936_v21  ;;  %1877 = vmatmul.msk.bf16.gmra.mxu1 %vm577_vm0, %v1956_v22  ;;  %v1941_v21 = vld [vmem:[%s2993_s0 + $0x50] sm:$0xff] }
  0x56   :  { %1897 = vmatmul.msk.bf16.gmra.mxu2 %vm577_vm0, %v1976_v23  ;;  %1917 = vmatmul.msk.bf16.gmra.mxu3 %vm577_vm0, %v1996_v24  ;;  %v1961_v22 = vld [vmem:[%s2993_s0 + $0xf0] sm:$0xff] }
  0x65   :  { %1858 = vmatmul.msk.bf16.gmra.mxu0 %vm577_vm0, %v1937_v25  ;;  %1878 = vmatmul.msk.bf16.gmra.mxu1 %vm577_vm0, %v1957_v26 }
  0x66   :  { %1898 = vmatmul.msk.bf16.gmra.mxu2 %vm577_vm0, %v1977_v27  ;;  %1918 = vmatmul.msk.bf16.gmra.mxu3 %vm577_vm0, %v1997_v28  ;;  %v1981_v27 = vld [vmem:[%s2993_s0 + $0x190] sm:$0xff] }
  0x75   :  { %1859 = vmatmul.msk.bf16.gmra.mxu0 %vm577_vm0, %v1938_v29  ;;  %1879 = vmatmul.msk.bf16.gmra.mxu1 %vm577_vm0, %v1958_v30  ;;  %v2001_v29 = vld [vmem:[%s2993_s0 + $0x230] sm:$0xff] }
  0x76   :  { %1899 = vmatmul.msk.bf16.gmra.mxu2 %vm577_vm0, %v1978_v31  ;;  %1919 = vmatmul.msk.bf16.gmra.mxu3 %vm577_vm0, %v1998_v32 }
  0x82   :  { %v824_v36 = vpop.f32.mrf.mxu0  ;;  %v924_v37 = vpop.f32.mrf.mxu1 }
  0x83   :  { %v825_v40 = vadd.f32 %v2169_v33, %v824_v36  ;;  %v925_v41 = vadd.f32 %v2169_v33, %v924_v37 }
  0x85   :  { %v1218_v42 = vmax.f32 %v825_v40, 0.0  ;;  %v1258_v43 = vmax.f32 %v925_v41, 0.0  ;;  %1860 = vmatmul.msk.bf16.gmra.mxu0 %vm577_vm0, %v1939_v34  ;;  %1880 = vmatmul.msk.bf16.gmra.mxu1 %vm577_vm0, %v1959_v35 }
  0x86   :  { %1900 = vmatmul.msk.bf16.gmra.mxu2 %vm577_vm0, %v1979_v38  ;;  %1920 = vmatmul.msk.bf16.gmra.mxu3 %vm577_vm0, %v1999_v39 }
  0x87   :  { %1375 = vst [vmem:[%s2995_s3] sm:$0xff] %v1218_v42 }
  0x88   :  { %1415 = vst [vmem:[%s2995_s3 + $0x140] sm:$0xff] %v1258_v43 }
  0x89   :  { %v1024_v44 = vpop.f32.mrf.mxu2  ;;  %v1124_v45 = vpop.f32.mrf.mxu3 }
  0x8a   :  { %v1025_v46 = vadd.f32 %v2169_v33, %v1024_v44  ;;  %v826_v47 = vpop.f32.mrf.mxu0  ;;  %v926_v48 = vpop.f32.mrf.mxu1  ;;  %v1125_v49 = vadd.f32 %v2169_v33, %v1124_v45 }
  0x8b   :  { %v827_v50 = vadd.f32 %v2169_v33, %v826_v47  ;;  %v927_v51 = vadd.f32 %v2169_v33, %v926_v48 }
  0x8c   :  { %v1298_v52 = vmax.f32 %v1025_v46, 0.0  ;;  %v1338_v55 = vmax.f32 %v1125_v49, 0.0 }
  0x8d   :  { %v1219_v53 = vmax.f32 %v827_v50, 0.0  ;;  %v1259_v54 = vmax.f32 %v927_v51, 0.0  ;;  %v1942_v50 = vld [vmem:[%s2993_s0 + $0x58] sm:$0xff] }
  0x8e   :  { %1455 = vst [vmem:[%s2995_s3 + $0x280] sm:$0xff] %v1298_v52  ;;  %v1962_v51 = vld [vmem:[%s2993_s0 + $0xf8] sm:$0xff] }
  0x8f   :  { %1376 = vst [vmem:[%s2995_s3 + $0x8] sm:$0xff] %v1219_v53 }
  0x90   :  { %1416 = vst [vmem:[%s2995_s3 + $0x148] sm:$0xff] %v1259_v54 }
  0x91   :  { %v1026_v56 = vpop.f32.mrf.mxu2  ;;  %1495 = vst [vmem:[%s2995_s3 + $0x3c0] sm:$0xff] %v1338_v55  ;;  %v1126_v59 = vpop.f32.mrf.mxu3 }
  0x92   :  { %v1027_v60 = vadd.f32 %v2169_v33, %v1026_v56  ;;  %v829_v61 = vpop.f32.mrf.mxu0  ;;  %v929_v62 = vpop.f32.mrf.mxu1  ;;  %v1127_v0 = vadd.f32 %v2169_v33, %v1126_v59  ;;  %v1982_v56 = vld [vmem:[%s2993_s0 + $0x198] sm:$0xff] }
  0x93   :  { %v830_v2 = vadd.f32 %v2169_v33, %v829_v61  ;;  %v930_v3 = vadd.f32 %v2169_v33, %v929_v62 }
  0x94   :  { %v1299_v4 = vmax.f32 %v1027_v60, 0.0  ;;  %v1339_v7 = vmax.f32 %v1127_v0, 0.0 }
  0x95   :  { %v1220_v5 = vmax.f32 %v830_v2, 0.0  ;;  %v1260_v6 = vmax.f32 %v930_v3, 0.0  ;;  %1861 = vmatmul.msk.bf16.gmra.mxu0 %vm577_vm0, %v1940_v57  ;;  %1881 = vmatmul.msk.bf16.gmra.mxu1 %vm577_vm0, %v1960_v58  ;;  %v2002_v58 = vld [vmem:[%s2993_s0 + $0x238] sm:$0xff] }
  0x96   :  { %1456 = vst [vmem:[%s2995_s3 + $0x288] sm:$0xff] %v1299_v4  ;;  %1901 = vmatmul.msk.bf16.gmra.mxu2 %vm577_vm0, %v1980_v63  ;;  %1921 = vmatmul.msk.bf16.gmra.mxu3 %vm577_vm0, %v2000_v1 }
  0x97   :  { %1377 = vst [vmem:[%s2995_s3 + $0x10] sm:$0xff] %v1220_v5 }
  0x98   :  { %1417 = vst [vmem:[%s2995_s3 + $0x150] sm:$0xff] %v1260_v6 }
  0x99   :  { %v1029_v8 = vpop.f32.mrf.mxu2  ;;  %1496 = vst [vmem:[%s2995_s3 + $0x3c8] sm:$0xff] %v1339_v7  ;;  %v1129_v9 = vpop.f32.mrf.mxu3 }
  0x9a   :  { %v1030_v10 = vadd.f32 %v2169_v33, %v1029_v8  ;;  %v831_v11 = vpop.f32.mrf.mxu0  ;;  %v931_v12 = vpop.f32.mrf.mxu1  ;;  %v1130_v13 = vadd.f32 %v2169_v33, %v1129_v9 }
  0x9b   :  { %v832_v14 = vadd.f32 %v2169_v33, %v831_v11  ;;  %v932_v15 = vadd.f32 %v2169_v33, %v931_v12 }
  0x9c   :  { %v1300_v16 = vmax.f32 %v1030_v10, 0.0  ;;  %v1340_v19 = vmax.f32 %v1130_v13, 0.0 }
  0x9d   :  { %v1221_v17 = vmax.f32 %v832_v14, 0.0  ;;  %v1261_v18 = vmax.f32 %v932_v15, 0.0  ;;  %v1943_v14 = vld [vmem:[%s2993_s0 + $0x60] sm:$0xff] }
  0x9e   :  { %1457 = vst [vmem:[%s2995_s3 + $0x290] sm:$0xff] %v1300_v16  ;;  %v1963_v15 = vld [vmem:[%s2993_s0 + $0x100] sm:$0xff] }
  0x9f   :  { %1378 = vst [vmem:[%s2995_s3 + $0x18] sm:$0xff] %v1221_v17 }
  0xa0   :  { %1418 = vst [vmem:[%s2995_s3 + $0x158] sm:$0xff] %v1261_v18 }
  0xa1   :  { %v1031_v20 = vpop.f32.mrf.mxu2  ;;  %1497 = vst [vmem:[%s2995_s3 + $0x3d0] sm:$0xff] %v1340_v19  ;;  %v1131_v23 = vpop.f32.mrf.mxu3 }
  0xa2   :  { %v1032_v24 = vadd.f32 %v2169_v33, %v1031_v20  ;;  %v834_v25 = vpop.f32.mrf.mxu0  ;;  %v934_v26 = vpop.f32.mrf.mxu1  ;;  %v1132_v28 = vadd.f32 %v2169_v33, %v1131_v23  ;;  %v1983_v20 = vld [vmem:[%s2993_s0 + $0x1a0] sm:$0xff] }
  0xa3   :  { %v835_v30 = vadd.f32 %v2169_v33, %v834_v25  ;;  %v935_v31 = vadd.f32 %v2169_v33, %v934_v26 }
  0xa4   :  { %v1301_v32 = vmax.f32 %v1032_v24, 0.0  ;;  %v1341_v36 = vmax.f32 %v1132_v28, 0.0 }
  0xa5   :  { %v1222_v34 = vmax.f32 %v835_v30, 0.0  ;;  %v1262_v35 = vmax.f32 %v935_v31, 0.0  ;;  %1862 = vmatmul.msk.bf16.gmra.mxu0 %vm577_vm0, %v1941_v21  ;;  %1882 = vmatmul.msk.bf16.gmra.mxu1 %vm577_vm0, %v1961_v22  ;;  %v2003_v22 = vld [vmem:[%s2993_s0 + $0x240] sm:$0xff] }
  0xa6   :  { %1458 = vst [vmem:[%s2995_s3 + $0x298] sm:$0xff] %v1301_v32  ;;  %1902 = vmatmul.msk.bf16.gmra.mxu2 %vm577_vm0, %v1981_v27  ;;  %1922 = vmatmul.msk.bf16.gmra.mxu3 %vm577_vm0, %v2001_v29 }
  0xa7   :  { %1379 = vst [vmem:[%s2995_s3 + $0x20] sm:$0xff] %v1222_v34 }
  0xa8   :  { %1419 = vst [vmem:[%s2995_s3 + $0x160] sm:$0xff] %v1262_v35 }
  0xa9   :  { %v1034_v37 = vpop.f32.mrf.mxu2  ;;  %1498 = vst [vmem:[%s2995_s3 + $0x3d8] sm:$0xff] %v1341_v36  ;;  %v1134_v38 = vpop.f32.mrf.mxu3 }
  0xaa   :  { %v1035_v39 = vadd.f32 %v2169_v33, %v1034_v37  ;;  %v836_v40 = vpop.f32.mrf.mxu0  ;;  %v936_v41 = vpop.f32.mrf.mxu1  ;;  %v1135_v42 = vadd.f32 %v2169_v33, %v1134_v38 }
  0xab   :  { %v837_v43 = vadd.f32 %v2169_v33, %v836_v40  ;;  %v937_v44 = vadd.f32 %v2169_v33, %v936_v41 }
  0xac   :  { %v1302_v45 = vmax.f32 %v1035_v39, 0.0  ;;  %v1342_v48 = vmax.f32 %v1135_v42, 0.0 }
  0xad   :  { %v1223_v46 = vmax.f32 %v837_v43, 0.0  ;;  %v1263_v47 = vmax.f32 %v937_v44, 0.0  ;;  %v1944_v43 = vld [vmem:[%s2993_s0 + $0x68] sm:$0xff] }
  0xae   :  { %1459 = vst [vmem:[%s2995_s3 + $0x2a0] sm:$0xff] %v1302_v45  ;;  %v1964_v44 = vld [vmem:[%s2993_s0 + $0x108] sm:$0xff] }
  0xaf   :  { %1380 = vst [vmem:[%s2995_s3 + $0x28] sm:$0xff] %v1223_v46 }
  0xb0   :  { %1420 = vst [vmem:[%s2995_s3 + $0x168] sm:$0xff] %v1263_v47 }
  0xb1   :  { %v1036_v49 = vpop.f32.mrf.mxu2  ;;  %1499 = vst [vmem:[%s2995_s3 + $0x3e0] sm:$0xff] %v1342_v48  ;;  %v1136_v52 = vpop.f32.mrf.mxu3 }
  0xb2   :  { %v1037_v53 = vadd.f32 %v2169_v33, %v1036_v49  ;;  %v839_v54 = vpop.f32.mrf.mxu0  ;;  %v939_v55 = vpop.f32.mrf.mxu1  ;;  %v1137_v57 = vadd.f32 %v2169_v33, %v1136_v52  ;;  %v1984_v49 = vld [vmem:[%s2993_s0 + $0x1a8] sm:$0xff] }
  0xb3   :  { %v840_v59 = vadd.f32 %v2169_v33, %v839_v54  ;;  %v940_v60 = vadd.f32 %v2169_v33, %v939_v55 }
  0xb4   :  { %v1303_v61 = vmax.f32 %v1037_v53, 0.0  ;;  %v1343_v0 = vmax.f32 %v1137_v57, 0.0 }
  0xb5   :  { %v1224_v62 = vmax.f32 %v840_v59, 0.0  ;;  %v1264_v63 = vmax.f32 %v940_v60, 0.0  ;;  %1863 = vmatmul.msk.bf16.gmra.mxu0 %vm577_vm0, %v1942_v50  ;;  %1883 = vmatmul.msk.bf16.gmra.mxu1 %vm577_vm0, %v1962_v51  ;;  %v2004_v51 = vld [vmem:[%s2993_s0 + $0x248] sm:$0xff] }
  0xb6   :  { %1460 = vst [vmem:[%s2995_s3 + $0x2a8] sm:$0xff] %v1303_v61  ;;  %1903 = vmatmul.msk.bf16.gmra.mxu2 %vm577_vm0, %v1982_v56  ;;  %1923 = vmatmul.msk.bf16.gmra.mxu3 %vm577_vm0, %v2002_v58 }
  0xb7   :  { %1381 = vst [vmem:[%s2995_s3 + $0x30] sm:$0xff] %v1224_v62 }
  0xb8   :  { %1421 = vst [vmem:[%s2995_s3 + $0x170] sm:$0xff] %v1264_v63 }
  0xb9   :  { %v1039_v1 = vpop.f32.mrf.mxu2  ;;  %1500 = vst [vmem:[%s2995_s3 + $0x3e8] sm:$0xff] %v1343_v0  ;;  %v1139_v2 = vpop.f32.mrf.mxu3 }
  0xba   :  { %v1040_v3 = vadd.f32 %v2169_v33, %v1039_v1  ;;  %v841_v4 = vpop.f32.mrf.mxu0  ;;  %v941_v5 = vpop.f32.mrf.mxu1  ;;  %v1140_v6 = vadd.f32 %v2169_v33, %v1139_v2 }
  0xbb   :  { %v842_v7 = vadd.f32 %v2169_v33, %v841_v4  ;;  %v942_v8 = vadd.f32 %v2169_v33, %v941_v5 }
  0xbc   :  { %v1304_v9 = vmax.f32 %v1040_v3, 0.0  ;;  %v1344_v12 = vmax.f32 %v1140_v6, 0.0 }
  0xbd   :  { %v1225_v10 = vmax.f32 %v842_v7, 0.0  ;;  %v1265_v11 = vmax.f32 %v942_v8, 0.0  ;;  %v1945_v7 = vld [vmem:[%s2993_s0 + $0x70] sm:$0xff] }
  0xbe   :  { %1461 = vst [vmem:[%s2995_s3 + $0x2b0] sm:$0xff] %v1304_v9  ;;  %v1965_v8 = vld [vmem:[%s2993_s0 + $0x110] sm:$0xff] }
  0xbf   :  { %1382 = vst [vmem:[%s2995_s3 + $0x38] sm:$0xff] %v1225_v10 }
  0xc0   :  { %1422 = vst [vmem:[%s2995_s3 + $0x178] sm:$0xff] %v1265_v11 }
  0xc1   :  { %v1041_v13 = vpop.f32.mrf.mxu2  ;;  %1501 = vst [vmem:[%s2995_s3 + $0x3f0] sm:$0xff] %v1344_v12  ;;  %v1141_v16 = vpop.f32.mrf.mxu3 }
  0xc2   :  { %v1042_v17 = vadd.f32 %v2169_v33, %v1041_v13  ;;  %v844_v18 = vpop.f32.mrf.mxu0  ;;  %v944_v19 = vpop.f32.mrf.mxu1  ;;  %v1142_v21 = vadd.f32 %v2169_v33, %v1141_v16  ;;  %v1985_v13 = vld [vmem:[%s2993_s0 + $0x1b0] sm:$0xff] }
  0xc3   :  { %v845_v23 = vadd.f32 %v2169_v33, %v844_v18  ;;  %v945_v24 = vadd.f32 %v2169_v33, %v944_v19 }
  0xc4   :  { %v1305_v25 = vmax.f32 %v1042_v17, 0.0  ;;  %v1345_v28 = vmax.f32 %v1142_v21, 0.0 }
  0xc5   :  { %v1226_v26 = vmax.f32 %v845_v23, 0.0  ;;  %v1266_v27 = vmax.f32 %v945_v24, 0.0  ;;  %1864 = vmatmul.msk.bf16.gmra.mxu0 %vm577_vm0, %v1943_v14  ;;  %1884 = vmatmul.msk.bf16.gmra.mxu1 %vm577_vm0, %v1963_v15  ;;  %v2005_v15 = vld [vmem:[%s2993_s0 + $0x250] sm:$0xff] }
  0xc6   :  { %1462 = vst [vmem:[%s2995_s3 + $0x2b8] sm:$0xff] %v1305_v25  ;;  %1904 = vmatmul.msk.bf16.gmra.mxu2 %vm577_vm0, %v1983_v20  ;;  %1924 = vmatmul.msk.bf16.gmra.mxu3 %vm577_vm0, %v2003_v22 }
  0xc7   :  { %1383 = vst [vmem:[%s2995_s3 + $0x40] sm:$0xff] %v1226_v26 }
  0xc8   :  { %1423 = vst [vmem:[%s2995_s3 + $0x180] sm:$0xff] %v1266_v27 }
  0xc9   :  { %v1044_v29 = vpop.f32.mrf.mxu2  ;;  %1502 = vst [vmem:[%s2995_s3 + $0x3f8] sm:$0xff] %v1345_v28  ;;  %v1144_v30 = vpop.f32.mrf.mxu3 }
  0xca   :  { %v1045_v31 = vadd.f32 %v2169_v33, %v1044_v29  ;;  %v846_v32 = vpop.f32.mrf.mxu0  ;;  %v946_v34 = vpop.f32.mrf.mxu1  ;;  %v1145_v35 = vadd.f32 %v2169_v33, %v1144_v30 }
  0xcb   :  { %v847_v36 = vadd.f32 %v2169_v33, %v846_v32  ;;  %v947_v37 = vadd.f32 %v2169_v33, %v946_v34 }
  0xcc   :  { %v1306_v38 = vmax.f32 %v1045_v31, 0.0  ;;  %v1346_v41 = vmax.f32 %v1145_v35, 0.0 }
  0xcd   :  { %v1227_v39 = vmax.f32 %v847_v36, 0.0  ;;  %v1267_v40 = vmax.f32 %v947_v37, 0.0  ;;  %v1946_v36 = vld [vmem:[%s2993_s0 + $0x78] sm:$0xff] }
  0xce   :  { %1463 = vst [vmem:[%s2995_s3 + $0x2c0] sm:$0xff] %v1306_v38  ;;  %v1966_v37 = vld [vmem:[%s2993_s0 + $0x118] sm:$0xff] }
  0xcf   :  { %1384 = vst [vmem:[%s2995_s3 + $0x48] sm:$0xff] %v1227_v39 }
  0xd0   :  { %1424 = vst [vmem:[%s2995_s3 + $0x188] sm:$0xff] %v1267_v40 }
  0xd1   :  { %v1046_v42 = vpop.f32.mrf.mxu2  ;;  %1503 = vst [vmem:[%s2995_s3 + $0x400] sm:$0xff] %v1346_v41  ;;  %v1146_v45 = vpop.f32.mrf.mxu3 }
  0xd2   :  { %v1047_v46 = vadd.f32 %v2169_v33, %v1046_v42  ;;  %v849_v47 = vpop.f32.mrf.mxu0  ;;  %v949_v48 = vpop.f32.mrf.mxu1  ;;  %v1147_v50 = vadd.f32 %v2169_v33, %v1146_v45  ;;  %v1986_v42 = vld [vmem:[%s2993_s0 + $0x1b8] sm:$0xff] }
  0xd3   :  { %v850_v52 = vadd.f32 %v2169_v33, %v849_v47  ;;  %v950_v53 = vadd.f32 %v2169_v33, %v949_v48 }
  0xd4   :  { %v1307_v54 = vmax.f32 %v1047_v46, 0.0  ;;  %v1347_v57 = vmax.f32 %v1147_v50, 0.0 }
  0xd5   :  { %v1228_v55 = vmax.f32 %v850_v52, 0.0  ;;  %v1268_v56 = vmax.f32 %v950_v53, 0.0  ;;  %1865 = vmatmul.msk.bf16.gmra.mxu0 %vm577_vm0, %v1944_v43  ;;  %1885 = vmatmul.msk.bf16.gmra.mxu1 %vm577_vm0, %v1964_v44  ;;  %v2006_v44 = vld [vmem:[%s2993_s0 + $0x258] sm:$0xff] }
  0xd6   :  { %1464 = vst [vmem:[%s2995_s3 + $0x2c8] sm:$0xff] %v1307_v54  ;;  %1905 = vmatmul.msk.bf16.gmra.mxu2 %vm577_vm0, %v1984_v49  ;;  %1925 = vmatmul.msk.bf16.gmra.mxu3 %vm577_vm0, %v2004_v51 }
  0xd7   :  { %1385 = vst [vmem:[%s2995_s3 + $0x50] sm:$0xff] %v1228_v55 }
  0xd8   :  { %1425 = vst [vmem:[%s2995_s3 + $0x190] sm:$0xff] %v1268_v56 }
  0xd9   :  { %v1049_v58 = vpop.f32.mrf.mxu2  ;;  %1504 = vst [vmem:[%s2995_s3 + $0x408] sm:$0xff] %v1347_v57  ;;  %v1149_v59 = vpop.f32.mrf.mxu3 }
  0xda   :  { %v1050_v60 = vadd.f32 %v2169_v33, %v1049_v58  ;;  %v851_v61 = vpop.f32.mrf.mxu0  ;;  %v951_v62 = vpop.f32.mrf.mxu1  ;;  %v1150_v63 = vadd.f32 %v2169_v33, %v1149_v59 }
  0xdb   :  { %v852_v0 = vadd.f32 %v2169_v33, %v851_v61  ;;  %v952_v1 = vadd.f32 %v2169_v33, %v951_v62 }
  0xdc   :  { %v1308_v2 = vmax.f32 %v1050_v60, 0.0  ;;  %v1348_v5 = vmax.f32 %v1150_v63, 0.0 }
  0xdd   :  { %v1229_v3 = vmax.f32 %v852_v0, 0.0  ;;  %v1269_v4 = vmax.f32 %v952_v1, 0.0  ;;  %v1947_v0 = vld [vmem:[%s2993_s0 + $0x80] sm:$0xff] }
  0xde   :  { %1465 = vst [vmem:[%s2995_s3 + $0x2d0] sm:$0xff] %v1308_v2  ;;  %v1967_v1 = vld [vmem:[%s2993_s0 + $0x120] sm:$0xff] }
  0xdf   :  { %1386 = vst [vmem:[%s2995_s3 + $0x58] sm:$0xff] %v1229_v3 }
  0xe0   :  { %1426 = vst [vmem:[%s2995_s3 + $0x198] sm:$0xff] %v1269_v4 }
  0xe1   :  { %v1051_v6 = vpop.f32.mrf.mxu2  ;;  %1505 = vst [vmem:[%s2995_s3 + $0x410] sm:$0xff] %v1348_v5  ;;  %v1151_v9 = vpop.f32.mrf.mxu3 }
  0xe2   :  { %v1052_v10 = vadd.f32 %v2169_v33, %v1051_v6  ;;  %v854_v11 = vpop.f32.mrf.mxu0  ;;  %v954_v12 = vpop.f32.mrf.mxu1  ;;  %v1152_v14 = vadd.f32 %v2169_v33, %v1151_v9  ;;  %v1987_v6 = vld [vmem:[%s2993_s0 + $0x1c0] sm:$0xff] }
  0xe3   :  { %v855_v16 = vadd.f32 %v2169_v33, %v854_v11  ;;  %v955_v17 = vadd.f32 %v2169_v33, %v954_v12 }
  0xe4   :  { %v1309_v18 = vmax.f32 %v1052_v10, 0.0  ;;  %v1349_v21 = vmax.f32 %v1152_v14, 0.0 }
  0xe5   :  { %v1230_v19 = vmax.f32 %v855_v16, 0.0  ;;  %v1270_v20 = vmax.f32 %v955_v17, 0.0  ;;  %1866 = vmatmul.msk.bf16.gmra.mxu0 %vm577_vm0, %v1945_v7  ;;  %1886 = vmatmul.msk.bf16.gmra.mxu1 %vm577_vm0, %v1965_v8  ;;  %v2007_v8 = vld [vmem:[%s2993_s0 + $0x260] sm:$0xff] }
  0xe6   :  { %1466 = vst [vmem:[%s2995_s3 + $0x2d8] sm:$0xff] %v1309_v18  ;;  %1906 = vmatmul.msk.bf16.gmra.mxu2 %vm577_vm0, %v1985_v13  ;;  %1926 = vmatmul.msk.bf16.gmra.mxu3 %vm577_vm0, %v2005_v15 }
  0xe7   :  { %1387 = vst [vmem:[%s2995_s3 + $0x60] sm:$0xff] %v1230_v19 }
  0xe8   :  { %1427 = vst [vmem:[%s2995_s3 + $0x1a0] sm:$0xff] %v1270_v20 }
  0xe9   :  { %v1054_v22 = vpop.f32.mrf.mxu2  ;;  %1506 = vst [vmem:[%s2995_s3 + $0x418] sm:$0xff] %v1349_v21  ;;  %v1154_v23 = vpop.f32.mrf.mxu3 }
  0xea   :  { %v1055_v24 = vadd.f32 %v2169_v33, %v1054_v22  ;;  %v856_v25 = vpop.f32.mrf.mxu0  ;;  %v956_v26 = vpop.f32.mrf.mxu1  ;;  %v1155_v27 = vadd.f32 %v2169_v33, %v1154_v23 }
  0xeb   :  { %v857_v28 = vadd.f32 %v2169_v33, %v856_v25  ;;  %v957_v29 = vadd.f32 %v2169_v33, %v956_v26 }
  0xec   :  { %v1310_v30 = vmax.f32 %v1055_v24, 0.0  ;;  %v1350_v34 = vmax.f32 %v1155_v27, 0.0 }
  0xed   :  { %v1231_v31 = vmax.f32 %v857_v28, 0.0  ;;  %v1271_v32 = vmax.f32 %v957_v29, 0.0  ;;  %v1948_v28 = vld [vmem:[%s2993_s0 + $0x88] sm:$0xff] }
  0xee   :  { %1467 = vst [vmem:[%s2995_s3 + $0x2e0] sm:$0xff] %v1310_v30  ;;  %v1968_v29 = vld [vmem:[%s2993_s0 + $0x128] sm:$0xff] }
  0xef   :  { %1388 = vst [vmem:[%s2995_s3 + $0x68] sm:$0xff] %v1231_v31 }
  0xf0   :  { %1428 = vst [vmem:[%s2995_s3 + $0x1a8] sm:$0xff] %v1271_v32 }
  0xf1   :  { %v1056_v35 = vpop.f32.mrf.mxu2  ;;  %1507 = vst [vmem:[%s2995_s3 + $0x420] sm:$0xff] %v1350_v34  ;;  %v1156_v38 = vpop.f32.mrf.mxu3 }
  0xf2   :  { %v1057_v39 = vadd.f32 %v2169_v33, %v1056_v35  ;;  %v859_v40 = vpop.f32.mrf.mxu0  ;;  %v959_v41 = vpop.f32.mrf.mxu1  ;;  %v1157_v43 = vadd.f32 %v2169_v33, %v1156_v38  ;;  %v1988_v35 = vld [vmem:[%s2993_s0 + $0x1c8] sm:$0xff] }
  0xf3   :  { %v860_v45 = vadd.f32 %v2169_v33, %v859_v40  ;;  %v960_v46 = vadd.f32 %v2169_v33, %v959_v41 }
  0xf4   :  { %v1311_v47 = vmax.f32 %v1057_v39, 0.0  ;;  %v1351_v50 = vmax.f32 %v1157_v43, 0.0 }
  0xf5   :  { %v1232_v48 = vmax.f32 %v860_v45, 0.0  ;;  %v1272_v49 = vmax.f32 %v960_v46, 0.0  ;;  %1867 = vmatmul.msk.bf16.gmra.mxu0 %vm577_vm0, %v1946_v36  ;;  %1887 = vmatmul.msk.bf16.gmra.mxu1 %vm577_vm0, %v1966_v37  ;;  %v2008_v37 = vld [vmem:[%s2993_s0 + $0x268] sm:$0xff] }
  0xf6   :  { %1468 = vst [vmem:[%s2995_s3 + $0x2e8] sm:$0xff] %v1311_v47  ;;  %1907 = vmatmul.msk.bf16.gmra.mxu2 %vm577_vm0, %v1986_v42  ;;  %1927 = vmatmul.msk.bf16.gmra.mxu3 %vm577_vm0, %v2006_v44 }
  0xf7   :  { %1389 = vst [vmem:[%s2995_s3 + $0x70] sm:$0xff] %v1232_v48 }
  0xf8   :  { %1429 = vst [vmem:[%s2995_s3 + $0x1b0] sm:$0xff] %v1272_v49 }
  0xf9   :  { %v1059_v51 = vpop.f32.mrf.mxu2  ;;  %1508 = vst [vmem:[%s2995_s3 + $0x428] sm:$0xff] %v1351_v50  ;;  %v1159_v52 = vpop.f32.mrf.mxu3 }
  0xfa   :  { %v1060_v53 = vadd.f32 %v2169_v33, %v1059_v51  ;;  %v861_v54 = vpop.f32.mrf.mxu0  ;;  %v961_v55 = vpop.f32.mrf.mxu1  ;;  %v1160_v56 = vadd.f32 %v2169_v33, %v1159_v52  ;;  %v171_v52 = vld [vmem:[%s2993_s0 + $0x270] sm:$0x1] }
  0xfb   :  { %v862_v57 = vadd.f32 %v2169_v33, %v861_v54  ;;  %v962_v58 = vadd.f32 %v2169_v33, %v961_v55 }
  0xfc   :  { %v1312_v59 = vmax.f32 %v1060_v53, 0.0  ;;  %v1352_v62 = vmax.f32 %v1160_v56, 0.0 }
  0xfd   :  { %v1233_v60 = vmax.f32 %v862_v57, 0.0  ;;  %v1273_v61 = vmax.f32 %v962_v58, 0.0  ;;  %v491_v57 = vunpack.c.l.b16 %v171_v52 }
  0xfe   :  { %1469 = vst [vmem:[%s2995_s3 + $0x2f0] sm:$0xff] %v1312_v59  ;;  %v1949_v59 = vld [vmem:[%s2993_s0 + $0x90] sm:$0xff] }
  0xff   :  { %1390 = vst [vmem:[%s2995_s3 + $0x78] sm:$0xff] %v1233_v60  ;;  %v1969_v60 = vld [vmem:[%s2993_s0 + $0x130] sm:$0xff] }
 0x100   :  { %1430 = vst [vmem:[%s2995_s3 + $0x1b8] sm:$0xff] %v1273_v61 }
 0x101   :  { %v1061_v63 = vpop.f32.mrf.mxu2  ;;  %1509 = vst [vmem:[%s2995_s3 + $0x430] sm:$0xff] %v1352_v62  ;;  %v1161_v2 = vpop.f32.mrf.mxu3 }
 0x102   :  { %v1062_v3 = vadd.f32 %v2169_v33, %v1061_v63  ;;  %v864_v4 = vpop.f32.mrf.mxu0  ;;  %v964_v5 = vpop.f32.mrf.mxu1  ;;  %v1162_v7 = vadd.f32 %v2169_v33, %v1161_v2 }
 0x103   :  { %v865_v9 = vadd.f32 %v2169_v33, %v864_v4  ;;  %v965_v10 = vadd.f32 %v2169_v33, %v964_v5 }
 0x104   :  { %v1313_v11 = vmax.f32 %v1062_v3, 0.0  ;;  %v1353_v14 = vmax.f32 %v1162_v7, 0.0  ;;  %v570_v3 = vpack.c.b16 %v491_v57, %v491_v57 }
 0x105   :  { %v1234_v12 = vmax.f32 %v865_v9, 0.0  ;;  %v1274_v13 = vmax.f32 %v965_v10, 0.0  ;;  %1868 = vmatmul.msk.bf16.gmra.mxu0 %vm577_vm0, %v1947_v0  ;;  %1888 = vmatmul.msk.bf16.gmra.mxu1 %vm577_vm0, %v1967_v1  ;;  %v1989_v1 = vld [vmem:[%s2993_s0 + $0x1d0] sm:$0xff] }
 0x106   :  { %1470 = vst [vmem:[%s2995_s3 + $0x2f8] sm:$0xff] %v1313_v11  ;;  %1908 = vmatmul.msk.bf16.gmra.mxu2 %vm577_vm0, %v1987_v6  ;;  %1928 = vmatmul.msk.bf16.gmra.mxu3 %vm577_vm0, %v2007_v8 }
 0x107   :  { %1391 = vst [vmem:[%s2995_s3 + $0x80] sm:$0xff] %v1234_v12 }
 0x108   :  { %1431 = vst [vmem:[%s2995_s3 + $0x1c0] sm:$0xff] %v1274_v13 }
 0x109   :  { %v1064_v15 = vpop.f32.mrf.mxu2  ;;  %1510 = vst [vmem:[%s2995_s3 + $0x438] sm:$0xff] %v1353_v14  ;;  %v1164_v16 = vpop.f32.mrf.mxu3 }
 0x10a   :  { %v1065_v17 = vadd.f32 %v2169_v33, %v1064_v15  ;;  %v866_v18 = vpop.f32.mrf.mxu0  ;;  %v966_v19 = vpop.f32.mrf.mxu1  ;;  %v1165_v20 = vadd.f32 %v2169_v33, %v1164_v16 }
 0x10b   :  { %v867_v21 = vadd.f32 %v2169_v33, %v866_v18  ;;  %v967_v22 = vadd.f32 %v2169_v33, %v966_v19 }
 0x10c   :  { %v1314_v23 = vmax.f32 %v1065_v17, 0.0  ;;  %v1354_v26 = vmax.f32 %v1165_v20, 0.0 }
 0x10d   :  { %v1235_v24 = vmax.f32 %v867_v21, 0.0  ;;  %v1275_v25 = vmax.f32 %v967_v22, 0.0 }
 0x10e   :  { %1471 = vst [vmem:[%s2995_s3 + $0x300] sm:$0xff] %v1314_v23  ;;  %v1950_v23 = vld [vmem:[%s2993_s0 + $0x98] sm:$0xff] }
 0x10f   :  { %1392 = vst [vmem:[%s2995_s3 + $0x88] sm:$0xff] %v1235_v24  ;;  %v1970_v24 = vld [vmem:[%s2993_s0 + $0x138] sm:$0xff] }
 0x110   :  { %1432 = vst [vmem:[%s2995_s3 + $0x1c8] sm:$0xff] %v1275_v25 }
 0x111   :  { %v1066_v27 = vpop.f32.mrf.mxu2  ;;  %1511 = vst [vmem:[%s2995_s3 + $0x440] sm:$0xff] %v1354_v26  ;;  %v1166_v30 = vpop.f32.mrf.mxu3 }
 0x112   :  { %v1067_v31 = vadd.f32 %v2169_v33, %v1066_v27  ;;  %v869_v32 = vpop.f32.mrf.mxu0  ;;  %v969_v34 = vpop.f32.mrf.mxu1  ;;  %v1167_v36 = vadd.f32 %v2169_v33, %v1166_v30 }
 0x113   :  { %v870_v38 = vadd.f32 %v2169_v33, %v869_v32  ;;  %v970_v39 = vadd.f32 %v2169_v33, %v969_v34 }
 0x114   :  { %v1315_v40 = vmax.f32 %v1067_v31, 0.0  ;;  %v1355_v43 = vmax.f32 %v1167_v36, 0.0 }
 0x115   :  { %v1236_v41 = vmax.f32 %v870_v38, 0.0  ;;  %v1276_v42 = vmax.f32 %v970_v39, 0.0  ;;  %1869 = vmatmul.msk.bf16.gmra.mxu0 %vm577_vm0, %v1948_v28  ;;  %1889 = vmatmul.msk.bf16.gmra.mxu1 %vm577_vm0, %v1968_v29  ;;  %v1990_v29 = vld [vmem:[%s2993_s0 + $0x1d8] sm:$0xff] }
 0x116   :  { %1472 = vst [vmem:[%s2995_s3 + $0x308] sm:$0xff] %v1315_v40  ;;  %1909 = vmatmul.msk.bf16.gmra.mxu2 %vm577_vm0, %v1988_v35  ;;  %1929 = vmatmul.msk.bf16.gmra.mxu3 %vm577_vm0, %v2008_v37 }
 0x117   :  { %1393 = vst [vmem:[%s2995_s3 + $0x90] sm:$0xff] %v1236_v41 }
 0x118   :  { %1433 = vst [vmem:[%s2995_s3 + $0x1d0] sm:$0xff] %v1276_v42 }
 0x119   :  { %v1069_v44 = vpop.f32.mrf.mxu2  ;;  %1512 = vst [vmem:[%s2995_s3 + $0x448] sm:$0xff] %v1355_v43  ;;  %v1169_v45 = vpop.f32.mrf.mxu3 }
 0x11a   :  { %v1070_v46 = vadd.f32 %v2169_v33, %v1069_v44  ;;  %v871_v47 = vpop.f32.mrf.mxu0  ;;  %v971_v48 = vpop.f32.mrf.mxu1  ;;  %v1170_v49 = vadd.f32 %v2169_v33, %v1169_v45 }
 0x11b   :  { %v872_v50 = vadd.f32 %v2169_v33, %v871_v47  ;;  %v972_v51 = vadd.f32 %v2169_v33, %v971_v48 }
 0x11c   :  { %v1316_v53 = vmax.f32 %v1070_v46, 0.0  ;;  %v1356_v56 = vmax.f32 %v1170_v49, 0.0 }
 0x11d   :  { %v1237_v54 = vmax.f32 %v872_v50, 0.0  ;;  %v1277_v55 = vmax.f32 %v972_v51, 0.0 }
 0x11e   :  { %1473 = vst [vmem:[%s2995_s3 + $0x310] sm:$0xff] %v1316_v53 }
 0x11f   :  { %1394 = vst [vmem:[%s2995_s3 + $0x98] sm:$0xff] %v1237_v54 }
 0x120   :  { %1434 = vst [vmem:[%s2995_s3 + $0x1d8] sm:$0xff] %v1277_v55 }
 0x121   :  { %v1071_v58 = vpop.f32.mrf.mxu2  ;;  %1513 = vst [vmem:[%s2995_s3 + $0x450] sm:$0xff] %v1356_v56  ;;  %v1171_v61 = vpop.f32.mrf.mxu3 }
 0x122   :  { %v1072_v62 = vadd.f32 %v2169_v33, %v1071_v58  ;;  %v874_v63 = vpop.f32.mrf.mxu0  ;;  %v974_v0 = vpop.f32.mrf.mxu1  ;;  %v1172_v2 = vadd.f32 %v2169_v33, %v1171_v61 }
 0x123   :  { %v875_v4 = vadd.f32 %v2169_v33, %v874_v63  ;;  %v975_v5 = vadd.f32 %v2169_v33, %v974_v0 }
 0x124   :  { %v1317_v6 = vmax.f32 %v1072_v62, 0.0  ;;  %v1357_v9 = vmax.f32 %v1172_v2, 0.0 }
 0x125   :  { %v1238_v7 = vmax.f32 %v875_v4, 0.0  ;;  %v1278_v8 = vmax.f32 %v975_v5, 0.0  ;;  %1870 = vmatmul.msk.bf16.gmra.mxu0 %vm577_vm0, %v1949_v59  ;;  %1890 = vmatmul.msk.bf16.gmra.mxu1 %vm577_vm0, %v1969_v60 }
 0x126   :  { %1474 = vst [vmem:[%s2995_s3 + $0x318] sm:$0xff] %v1317_v6  ;;  %1910 = vmatmul.msk.bf16.gmra.mxu2 %vm577_vm0, %v1989_v1  ;;  %1930 = vmatmul.msk.bf16.gmra.mxu3 %vm577_vm0, %v570_v3 }
 0x127   :  { %1395 = vst [vmem:[%s2995_s3 + $0xa0] sm:$0xff] %v1238_v7 }
 0x128   :  { %1435 = vst [vmem:[%s2995_s3 + $0x1e0] sm:$0xff] %v1278_v8 }
 0x129   :  { %v1074_v10 = vpop.f32.mrf.mxu2  ;;  %1514 = vst [vmem:[%s2995_s3 + $0x458] sm:$0xff] %v1357_v9  ;;  %v1174_v11 = vpop.f32.mrf.mxu3 }
 0x12a   :  { %v1075_v12 = vadd.f32 %v2169_v33, %v1074_v10  ;;  %v876_v13 = vpop.f32.mrf.mxu0  ;;  %v976_v14 = vpop.f32.mrf.mxu1  ;;  %v1175_v15 = vadd.f32 %v2169_v33, %v1174_v11 }
 0x12b   :  { %v877_v16 = vadd.f32 %v2169_v33, %v876_v13  ;;  %v977_v17 = vadd.f32 %v2169_v33, %v976_v14 }
 0x12c   :  { %v1318_v18 = vmax.f32 %v1075_v12, 0.0  ;;  %v1358_v21 = vmax.f32 %v1175_v15, 0.0 }
 0x12d   :  { %v1239_v19 = vmax.f32 %v877_v16, 0.0  ;;  %v1279_v20 = vmax.f32 %v977_v17, 0.0  ;;  %v2772_v16 = vld [vmem:[%s2994_s2] ss:$0 sm:$0xff] }
 0x12e   :  { %1475 = vst [vmem:[%s2995_s3 + $0x320] sm:$0xff] %v1318_v18 }
 0x12f   :  { %1396 = vst [vmem:[%s2995_s3 + $0xa8] sm:$0xff] %v1239_v19 }
 0x130   :  { %1436 = vst [vmem:[%s2995_s3 + $0x1e8] sm:$0xff] %v1279_v20 }
 0x131   :  { %v1076_v22 = vpop.f32.mrf.mxu2  ;;  %1515 = vst [vmem:[%s2995_s3 + $0x460] sm:$0xff] %v1358_v21  ;;  %v1176_v25 = vpop.f32.mrf.mxu3 }
 0x132   :  { %v1077_v26 = vadd.f32 %v2169_v33, %v1076_v22  ;;  %v879_v27 = vpop.f32.mrf.mxu0  ;;  %v979_v28 = vpop.f32.mrf.mxu1  ;;  %v1177_v30 = vadd.f32 %v2169_v33, %v1176_v25 }
 0x133   :  { %v880_v31 = vadd.f32 %v2169_v33, %v879_v27  ;;  %v980_v32 = vadd.f32 %v2169_v33, %v979_v28 }
 0x134   :  { %v1319_v34 = vmax.f32 %v1077_v26, 0.0  ;;  %v1359_v37 = vmax.f32 %v1177_v30, 0.0 }
 0x135   :  { %v1240_v35 = vmax.f32 %v880_v31, 0.0  ;;  %v1280_v36 = vmax.f32 %v980_v32, 0.0  ;;  %1871 = vmatmul.msk.bf16.gmra.mxu0 %vm577_vm0, %v1950_v23  ;;  %1891 = vmatmul.msk.bf16.gmra.mxu1 %vm577_vm0, %v1970_v24 }
 0x136   :  { %1476 = vst [vmem:[%s2995_s3 + $0x328] sm:$0xff] %v1319_v34  ;;  %1911 = vmatmul.msk.bf16.gmra.mxu2 %vm577_vm0, %v1990_v29 }
 0x137   :  { %1397 = vst [vmem:[%s2995_s3 + $0xb0] sm:$0xff] %v1240_v35 }
 0x138   :  { %1437 = vst [vmem:[%s2995_s3 + $0x1f0] sm:$0xff] %v1280_v36 }
 0x139   :  { %v1079_v38 = vpop.f32.mrf.mxu2  ;;  %1516 = vst [vmem:[%s2995_s3 + $0x468] sm:$0xff] %v1359_v37  ;;  %v1179_v39 = vpop.f32.mrf.mxu3 }
 0x13a   :  { %v1080_v40 = vadd.f32 %v2169_v33, %v1079_v38  ;;  %v881_v41 = vpop.f32.mrf.mxu0  ;;  %v981_v42 = vpop.f32.mrf.mxu1  ;;  %v1180_v43 = vadd.f32 %v2169_v33, %v1179_v39 }
 0x13b   :  { %v882_v44 = vadd.f32 %v2169_v33, %v881_v41  ;;  %v982_v45 = vadd.f32 %v2169_v33, %v981_v42 }
 0x13c   :  { %v1320_v46 = vmax.f32 %v1080_v40, 0.0  ;;  %v1360_v49 = vmax.f32 %v1180_v43, 0.0 }
 0x13d   :  { %v1241_v47 = vmax.f32 %v882_v44, 0.0  ;;  %v1281_v48 = vmax.f32 %v982_v45, 0.0 }
 0x13e   :  { %1477 = vst [vmem:[%s2995_s3 + $0x330] sm:$0xff] %v1320_v46 }
 0x13f   :  { %1398 = vst [vmem:[%s2995_s3 + $0xb8] sm:$0xff] %v1241_v47 }
 0x140   :  { %1438 = vst [vmem:[%s2995_s3 + $0x1f8] sm:$0xff] %v1281_v48 }
 0x141   :  { %v1081_v50 = vpop.f32.mrf.mxu2  ;;  %1517 = vst [vmem:[%s2995_s3 + $0x470] sm:$0xff] %v1360_v49  ;;  %v1181_v51 = vpop.f32.mrf.mxu3 }
 0x142   :  { %v1082_v52 = vadd.f32 %v2169_v33, %v1081_v50  ;;  %v884_v53 = vpop.f32.mrf.mxu0  ;;  %v984_v54 = vpop.f32.mrf.mxu1  ;;  %v1182_v55 = vadd.f32 %v2169_v33, %v1181_v51 }
 0x143   :  { %v885_v56 = vadd.f32 %v2169_v33, %v884_v53  ;;  %v985_v57 = vadd.f32 %v2169_v33, %v984_v54 }
 0x144   :  { %v1321_v58 = vmax.f32 %v1082_v52, 0.0  ;;  %v1361_v61 = vmax.f32 %v1182_v55, 0.0 }
 0x145   :  { %v1242_v59 = vmax.f32 %v885_v56, 0.0  ;;  %v1282_v60 = vmax.f32 %v985_v57, 0.0 }
 0x146   :  { %1478 = vst [vmem:[%s2995_s3 + $0x338] sm:$0xff] %v1321_v58 }
 0x147   :  { %1399 = vst [vmem:[%s2995_s3 + $0xc0] sm:$0xff] %v1242_v59 }
 0x148   :  { %1439 = vst [vmem:[%s2995_s3 + $0x200] sm:$0xff] %v1282_v60 }
 0x149   :  { %v1084_v62 = vpop.f32.mrf.mxu2  ;;  %1518 = vst [vmem:[%s2995_s3 + $0x478] sm:$0xff] %v1361_v61  ;;  %v1184_v63 = vpop.f32.mrf.mxu3 }
 0x14a   :  { %v1085_v0 = vadd.f32 %v2169_v33, %v1084_v62  ;;  %v886_v1 = vpop.f32.mrf.mxu0  ;;  %v986_v2 = vpop.f32.mrf.mxu1  ;;  %v1185_v3 = vadd.f32 %v2169_v33, %v1184_v63 }
 0x14b   :  { %v887_v4 = vadd.f32 %v2169_v33, %v886_v1  ;;  %v987_v5 = vadd.f32 %v2169_v33, %v986_v2 }
 0x14c   :  { %v1322_v6 = vmax.f32 %v1085_v0, 0.0  ;;  %v1362_v9 = vmax.f32 %v1185_v3, 0.0 }
 0x14d   :  { %v1243_v7 = vmax.f32 %v887_v4, 0.0  ;;  %v1283_v8 = vmax.f32 %v987_v5, 0.0 }
 0x14e   :  { %1479 = vst [vmem:[%s2995_s3 + $0x340] sm:$0xff] %v1322_v6 }
 0x14f   :  { %1400 = vst [vmem:[%s2995_s3 + $0xc8] sm:$0xff] %v1243_v7 }
 0x150   :  { %1440 = vst [vmem:[%s2995_s3 + $0x208] sm:$0xff] %v1283_v8 }
 0x151   :  { %v1086_v10 = vpop.f32.mrf.mxu2  ;;  %1519 = vst [vmem:[%s2995_s3 + $0x480] sm:$0xff] %v1362_v9  ;;  %v1186_v11 = vpop.f32.mrf.mxu3 }
 0x152   :  { %v1087_v12 = vadd.f32 %v2169_v33, %v1086_v10  ;;  %v889_v13 = vpop.f32.mrf.mxu0  ;;  %v989_v14 = vpop.f32.mrf.mxu1  ;;  %v1187_v15 = vadd.f32 %v2169_v33, %v1186_v11 }
 0x153   :  { %v890_v17 = vadd.f32 %v2772_v16, %v889_v13  ;;  %v990_v18 = vadd.f32 %v2772_v16, %v989_v14 }
 0x154   :  { %v1323_v19 = vmax.f32 %v1087_v12, 0.0  ;;  %v1363_v22 = vmax.f32 %v1187_v15, 0.0 }
 0x155   :  { %v1244_v20 = vmax.f32 %v890_v17, 0.0  ;;  %v1284_v21 = vmax.f32 %v990_v18, 0.0 }
 0x156   :  { %1480 = vst [vmem:[%s2995_s3 + $0x348] sm:$0xff] %v1323_v19 }
 0x157   :  { %1401 = vst [vmem:[%s2995_s3 + $0xd0] sm:$0xff] %v1244_v20 }
 0x158   :  { %1441 = vst [vmem:[%s2995_s3 + $0x210] sm:$0xff] %v1284_v21 }
 0x159   :  { %v1089_v33 = vpop.f32.mrf.mxu2  ;;  %1520 = vst [vmem:[%s2995_s3 + $0x488] sm:$0xff] %v1363_v22  ;;  %v1189_v23 = vpop.f32.mrf.mxu3 }
 0x15a   :  { %v1090_v24 = vadd.f32 %v2772_v16, %v1089_v33  ;;  %v891_v25 = vpop.f32.mrf.mxu0  ;;  %v991_v26 = vpop.f32.mrf.mxu1  ;;  %v1190_v27 = vadd.f32 %v2772_v16, %v1189_v23 }
 0x15b   :  { %v892_v28 = vadd.f32 %v2772_v16, %v891_v25  ;;  %v992_v29 = vadd.f32 %v2772_v16, %v991_v26 }
 0x15c   :  { %v1324_v30 = vmax.f32 %v1090_v24, 0.0  ;;  %v1364_v34 = vmax.f32 %v1190_v27, 0.0 }
 0x15d   :  { %v1245_v31 = vmax.f32 %v892_v28, 0.0  ;;  %v1285_v32 = vmax.f32 %v992_v29, 0.0 }
 0x15e   :  { %1481 = vst [vmem:[%s2995_s3 + $0x350] sm:$0xff] %v1324_v30 }
 0x15f   :  { %1402 = vst [vmem:[%s2995_s3 + $0xd8] sm:$0xff] %v1245_v31 }
 0x160   :  { %1442 = vst [vmem:[%s2995_s3 + $0x218] sm:$0xff] %v1285_v32 }
 0x161   :  { %v1091_v35 = vpop.f32.mrf.mxu2  ;;  %1521 = vst [vmem:[%s2995_s3 + $0x490] sm:$0xff] %v1364_v34  ;;  %v1191_v36 = vpop.f32.mrf.mxu3 }
 0x162   :  { %v1092_v37 = vadd.f32 %v2772_v16, %v1091_v35  ;;  %v894_v38 = vpop.f32.mrf.mxu0  ;;  %v994_v39 = vpop.f32.mrf.mxu1  ;;  %v1192_v40 = vadd.f32 %v2772_v16, %v1191_v36 }
 0x163   :  { %v895_v41 = vadd.f32 %v2772_v16, %v894_v38  ;;  %v995_v42 = vadd.f32 %v2772_v16, %v994_v39 }
 0x164   :  { %v1325_v43 = vmax.f32 %v1092_v37, 0.0  ;;  %v1365_v46 = vmax.f32 %v1192_v40, 0.0 }
 0x165   :  { %v1246_v44 = vmax.f32 %v895_v41, 0.0  ;;  %v1286_v45 = vmax.f32 %v995_v42, 0.0 }
 0x166   :  { %1482 = vst [vmem:[%s2995_s3 + $0x358] sm:$0xff] %v1325_v43 }
 0x167   :  { %1403 = vst [vmem:[%s2995_s3 + $0xe0] sm:$0xff] %v1246_v44 }
 0x168   :  { %1443 = vst [vmem:[%s2995_s3 + $0x220] sm:$0xff] %v1286_v45 }
 0x169   :  { %v1094_v47 = vpop.f32.mrf.mxu2  ;;  %1522 = vst [vmem:[%s2995_s3 + $0x498] sm:$0xff] %v1365_v46  ;;  %v1194_v48 = vpop.f32.mrf.mxu3 }
 0x16a   :  { %v1095_v49 = vadd.f32 %v2772_v16, %v1094_v47  ;;  %v896_v50 = vpop.f32.mrf.mxu0  ;;  %v996_v51 = vpop.f32.mrf.mxu1  ;;  %v1195_v52 = vadd.f32 %v2772_v16, %v1194_v48 }
 0x16b   :  { %v897_v53 = vadd.f32 %v2772_v16, %v896_v50  ;;  %v997_v54 = vadd.f32 %v2772_v16, %v996_v51 }
 0x16c   :  { %v1326_v55 = vmax.f32 %v1095_v49, 0.0  ;;  %v1366_v58 = vmax.f32 %v1195_v52, 0.0 }
 0x16d   :  { %v1247_v56 = vmax.f32 %v897_v53, 0.0  ;;  %v1287_v57 = vmax.f32 %v997_v54, 0.0 }
 0x16e   :  { %1483 = vst [vmem:[%s2995_s3 + $0x360] sm:$0xff] %v1326_v55 }
 0x16f   :  { %1404 = vst [vmem:[%s2995_s3 + $0xe8] sm:$0xff] %v1247_v56 }
 0x170   :  { %1444 = vst [vmem:[%s2995_s3 + $0x228] sm:$0xff] %v1287_v57 }
 0x171   :  { %v1096_v59 = vpop.f32.mrf.mxu2  ;;  %1523 = vst [vmem:[%s2995_s3 + $0x4a0] sm:$0xff] %v1366_v58  ;;  %v1196_v60 = vpop.f32.mrf.mxu3 }
 0x172   :  { %v1097_v61 = vadd.f32 %v2772_v16, %v1096_v59  ;;  %v899_v62 = vpop.f32.mrf.mxu0  ;;  %v999_v63 = vpop.f32.mrf.mxu1  ;;  %v1197_v0 = vadd.f32 %v2772_v16, %v1196_v60 }
 0x173   :  { %v900_v1 = vadd.f32 %v2772_v16, %v899_v62  ;;  %v1000_v2 = vadd.f32 %v2772_v16, %v999_v63 }
 0x174   :  { %v1327_v3 = vmax.f32 %v1097_v61, 0.0  ;;  %v1367_v6 = vmax.f32 %v1197_v0, 0.0 }
 0x175   :  { %v1248_v4 = vmax.f32 %v900_v1, 0.0  ;;  %v1288_v5 = vmax.f32 %v1000_v2, 0.0 }
 0x176   :  { %1484 = vst [vmem:[%s2995_s3 + $0x368] sm:$0xff] %v1327_v3 }
 0x177   :  { %1405 = vst [vmem:[%s2995_s3 + $0xf0] sm:$0xff] %v1248_v4 }
 0x178   :  { %1445 = vst [vmem:[%s2995_s3 + $0x230] sm:$0xff] %v1288_v5 }
 0x179   :  { %v1099_v7 = vpop.f32.mrf.mxu2  ;;  %1524 = vst [vmem:[%s2995_s3 + $0x4a8] sm:$0xff] %v1367_v6  ;;  %v1199_v8 = vpop.f32.mrf.mxu3 }
 0x17a   :  { %v1100_v9 = vadd.f32 %v2772_v16, %v1099_v7  ;;  %v901_v10 = vpop.f32.mrf.mxu0  ;;  %v1001_v11 = vpop.f32.mrf.mxu1  ;;  %v1200_v12 = vadd.f32 %v2772_v16, %v1199_v8 }
 0x17b   :  { %v902_v13 = vadd.f32 %v2772_v16, %v901_v10  ;;  %v1002_v14 = vadd.f32 %v2772_v16, %v1001_v11 }
 0x17c   :  { %v1328_v15 = vmax.f32 %v1100_v9, 0.0  ;;  %v1368_v19 = vmax.f32 %v1200_v12, 0.0 }
 0x17d   :  { %v1249_v17 = vmax.f32 %v902_v13, 0.0  ;;  %v1289_v18 = vmax.f32 %v1002_v14, 0.0 }
 0x17e   :  { %1485 = vst [vmem:[%s2995_s3 + $0x370] sm:$0xff] %v1328_v15 }
 0x17f   :  { %1406 = vst [vmem:[%s2995_s3 + $0xf8] sm:$0xff] %v1249_v17 }
 0x180   :  { %1446 = vst [vmem:[%s2995_s3 + $0x238] sm:$0xff] %v1289_v18 }
 0x181   :  { %v1101_v20 = vpop.f32.mrf.mxu2  ;;  %1525 = vst [vmem:[%s2995_s3 + $0x4b0] sm:$0xff] %v1368_v19  ;;  %v1201_v21 = vpop.f32.mrf.mxu3 }
 0x182   :  { %v1102_v22 = vadd.f32 %v2772_v16, %v1101_v20  ;;  %v904_v33 = vpop.f32.mrf.mxu0  ;;  %v1004_v23 = vpop.f32.mrf.mxu1  ;;  %v1202_v24 = vadd.f32 %v2772_v16, %v1201_v21 }
 0x183   :  { %v905_v25 = vadd.f32 %v2772_v16, %v904_v33  ;;  %v1005_v26 = vadd.f32 %v2772_v16, %v1004_v23 }
 0x184   :  { %v1329_v27 = vmax.f32 %v1102_v22, 0.0  ;;  %v1369_v30 = vmax.f32 %v1202_v24, 0.0 }
 0x185   :  { %v1250_v28 = vmax.f32 %v905_v25, 0.0  ;;  %v1290_v29 = vmax.f32 %v1005_v26, 0.0 }
 0x186   :  { %1486 = vst [vmem:[%s2995_s3 + $0x378] sm:$0xff] %v1329_v27 }
 0x187   :  { %1407 = vst [vmem:[%s2995_s3 + $0x100] sm:$0xff] %v1250_v28 }
 0x188   :  { %1447 = vst [vmem:[%s2995_s3 + $0x240] sm:$0xff] %v1290_v29 }
 0x189   :  { %v1104_v31 = vpop.f32.mrf.mxu2  ;;  %1526 = vst [vmem:[%s2995_s3 + $0x4b8] sm:$0xff] %v1369_v30  ;;  %v1204_v32 = vpop.f32.mrf.mxu3 }
 0x18a   :  { %v1105_v34 = vadd.f32 %v2772_v16, %v1104_v31  ;;  %v906_v35 = vpop.f32.mrf.mxu0  ;;  %v1006_v36 = vpop.f32.mrf.mxu1  ;;  %v1205_v37 = vadd.f32 %v2772_v16, %v1204_v32 }
 0x18b   :  { %v907_v38 = vadd.f32 %v2772_v16, %v906_v35  ;;  %v1007_v39 = vadd.f32 %v2772_v16, %v1006_v36 }
 0x18c   :  { %v1330_v40 = vmax.f32 %v1105_v34, 0.0  ;;  %v1370_v43 = vmax.f32 %v1205_v37, 0.0 }
 0x18d   :  { %v1251_v41 = vmax.f32 %v907_v38, 0.0  ;;  %v1291_v42 = vmax.f32 %v1007_v39, 0.0 }
 0x18e   :  { %1487 = vst [vmem:[%s2995_s3 + $0x380] sm:$0xff] %v1330_v40 }
 0x18f   :  { %1408 = vst [vmem:[%s2995_s3 + $0x108] sm:$0xff] %v1251_v41 }
 0x190   :  { %1448 = vst [vmem:[%s2995_s3 + $0x248] sm:$0xff] %v1291_v42 }
 0x191   :  { %v1106_v44 = vpop.f32.mrf.mxu2  ;;  %1527 = vst [vmem:[%s2995_s3 + $0x4c0] sm:$0xff] %v1370_v43  ;;  %v1206_v45 = vpop.f32.mrf.mxu3 }
 0x192   :  { %v1107_v46 = vadd.f32 %v2772_v16, %v1106_v44  ;;  %v909_v47 = vpop.f32.mrf.mxu0  ;;  %v1009_v48 = vpop.f32.mrf.mxu1  ;;  %v1207_v49 = vadd.f32 %v2772_v16, %v1206_v45 }
 0x193   :  { %v910_v50 = vadd.f32 %v2772_v16, %v909_v47  ;;  %v1010_v51 = vadd.f32 %v2772_v16, %v1009_v48 }
 0x194   :  { %v1331_v52 = vmax.f32 %v1107_v46, 0.0  ;;  %v1371_v55 = vmax.f32 %v1207_v49, 0.0 }
 0x195   :  { %v1252_v53 = vmax.f32 %v910_v50, 0.0  ;;  %v1292_v54 = vmax.f32 %v1010_v51, 0.0 }
 0x196   :  { %1488 = vst [vmem:[%s2995_s3 + $0x388] sm:$0xff] %v1331_v52 }
 0x197   :  { %1409 = vst [vmem:[%s2995_s3 + $0x110] sm:$0xff] %v1252_v53 }
 0x198   :  { %1449 = vst [vmem:[%s2995_s3 + $0x250] sm:$0xff] %v1292_v54 }
 0x199   :  { %v1109_v56 = vpop.f32.mrf.mxu2  ;;  %1528 = vst [vmem:[%s2995_s3 + $0x4c8] sm:$0xff] %v1371_v55  ;;  %v1209_v57 = vpop.f32.mrf.mxu3 }
 0x19a   :  { %v1110_v58 = vadd.f32 %v2772_v16, %v1109_v56  ;;  %v911_v59 = vpop.f32.mrf.mxu0  ;;  %v1011_v60 = vpop.f32.mrf.mxu1  ;;  %v1210_v61 = vadd.f32 %v2772_v16, %v1209_v57 }
 0x19b   :  { %v912_v62 = vadd.f32 %v2772_v16, %v911_v59  ;;  %v1012_v63 = vadd.f32 %v2772_v16, %v1011_v60 }
 0x19c   :  { %v1332_v0 = vmax.f32 %v1110_v58, 0.0  ;;  %v1372_v3 = vmax.f32 %v1210_v61, 0.0 }
 0x19d   :  { %v1253_v1 = vmax.f32 %v912_v62, 0.0  ;;  %v1293_v2 = vmax.f32 %v1012_v63, 0.0 }
 0x19e   :  { %1489 = vst [vmem:[%s2995_s3 + $0x390] sm:$0xff] %v1332_v0 }
 0x19f   :  { %1410 = vst [vmem:[%s2995_s3 + $0x118] sm:$0xff] %v1253_v1 }
 0x1a0   :  { %1450 = vst [vmem:[%s2995_s3 + $0x258] sm:$0xff] %v1293_v2 }
 0x1a1   :  { %v1111_v4 = vpop.f32.mrf.mxu2  ;;  %1529 = vst [vmem:[%s2995_s3 + $0x4d0] sm:$0xff] %v1372_v3  ;;  %v1211_v5 = vpop.f32.mrf.mxu3 }
 0x1a2   :  { %v1112_v6 = vadd.f32 %v2772_v16, %v1111_v4  ;;  %v914_v7 = vpop.f32.mrf.mxu0  ;;  %v1014_v8 = vpop.f32.mrf.mxu1  ;;  %v1212_v9 = vadd.f32 %v2772_v16, %v1211_v5 }
 0x1a3   :  { %v915_v10 = vadd.f32 %v2772_v16, %v914_v7  ;;  %v1015_v11 = vadd.f32 %v2772_v16, %v1014_v8 }
 0x1a4   :  { %v1333_v12 = vmax.f32 %v1112_v6, 0.0  ;;  %v1373_v15 = vmax.f32 %v1212_v9, 0.0 }
 0x1a5   :  { %v1254_v13 = vmax.f32 %v915_v10, 0.0  ;;  %v1294_v14 = vmax.f32 %v1015_v11, 0.0 }
 0x1a6   :  { %1490 = vst [vmem:[%s2995_s3 + $0x398] sm:$0xff] %v1333_v12 }
 0x1a7   :  { %1411 = vst [vmem:[%s2995_s3 + $0x120] sm:$0xff] %v1254_v13 }
 0x1a8   :  { %1451 = vst [vmem:[%s2995_s3 + $0x260] sm:$0xff] %v1294_v14 }
 0x1a9   :  { %v1114_v17 = vpop.f32.mrf.mxu2  ;;  %1530 = vst [vmem:[%s2995_s3 + $0x4d8] sm:$0xff] %v1373_v15  ;;  %v1214_v18 = vpop.f32.mrf.mxu3 }
 0x1aa   :  { %v1115_v19 = vadd.f32 %v2772_v16, %v1114_v17  ;;  %v916_v20 = vpop.f32.mrf.mxu0  ;;  %v1016_v21 = vpop.f32.mrf.mxu1  ;;  %v1215_v22 = vadd.f32 %v2772_v16, %v1214_v18 }
 0x1ab   :  { %v917_v33 = vadd.f32 %v2772_v16, %v916_v20  ;;  %v1017_v23 = vadd.f32 %v2772_v16, %v1016_v21 }
 0x1ac   :  { %v1334_v24 = vmax.f32 %v1115_v19, 0.0  ;;  %v1374_v27 = vmax.f32 %v1215_v22, 0.0 }
 0x1ad   :  { %v1255_v25 = vmax.f32 %v917_v33, 0.0  ;;  %v1295_v26 = vmax.f32 %v1017_v23, 0.0 }
 0x1ae   :  { %1491 = vst [vmem:[%s2995_s3 + $0x3a0] sm:$0xff] %v1334_v24 }
 0x1af   :  { %1412 = vst [vmem:[%s2995_s3 + $0x128] sm:$0xff] %v1255_v25 }
 0x1b0   :  { %1452 = vst [vmem:[%s2995_s3 + $0x268] sm:$0xff] %v1295_v26 }
 0x1b1   :  { %v1116_v28 = vpop.f32.mrf.mxu2  ;;  %1531 = vst [vmem:[%s2995_s3 + $0x4e0] sm:$0x3] %v1374_v27  ;;  %v1216_v29 = vpop.f32.mrf.mxu3 }
 0x1b2   :  { %v1117_v30 = vadd.f32 %v2772_v16, %v1116_v28  ;;  %v919_v31 = vpop.f32.mrf.mxu0  ;;  %v1019_v32 = vpop.f32.mrf.mxu1 }
 0x1b3   :  { %v920_v34 = vadd.f32 %v2772_v16, %v919_v31  ;;  %v1020_v35 = vadd.f32 %v2772_v16, %v1019_v32 }
 0x1b4   :  { %v1335_v36 = vmax.f32 %v1117_v30, 0.0 }
 0x1b5   :  { %v1256_v37 = vmax.f32 %v920_v34, 0.0  ;;  %v1296_v38 = vmax.f32 %v1020_v35, 0.0 }
 0x1b6   :  { %1492 = vst [vmem:[%s2995_s3 + $0x3a8] sm:$0xff] %v1335_v36 }
 0x1b7   :  { %1413 = vst [vmem:[%s2995_s3 + $0x130] sm:$0xff] %v1256_v37 }
 0x1b8   :  { %1453 = vst [vmem:[%s2995_s3 + $0x270] sm:$0xff] %v1296_v38 }
 0x1b9   :  { %v1119_v39 = vpop.f32.mrf.mxu2 }
 0x1ba   :  { %v1120_v40 = vadd.f32 %v2772_v16, %v1119_v39  ;;  %v921_v41 = vpop.f32.mrf.mxu0  ;;  %v1021_v42 = vpop.f32.mrf.mxu1 }
 0x1bb   :  { %v922_v43 = vadd.f32 %v2772_v16, %v921_v41  ;;  %v1022_v44 = vadd.f32 %v2772_v16, %v1021_v42 }
 0x1bc   :  { %v1336_v45 = vmax.f32 %v1120_v40, 0.0 }
 0x1bd   :  { %v1257_v46 = vmax.f32 %v922_v43, 0.0  ;;  %v1297_v47 = vmax.f32 %v1022_v44, 0.0 }
 0x1be   :  { %1493 = vst [vmem:[%s2995_s3 + $0x3b0] sm:$0xff] %v1336_v45 }
 0x1bf   :  { %1414 = vst [vmem:[%s2995_s3 + $0x138] sm:$0xff] %v1257_v46 }
 0x1c0   :  { %1454 = vst [vmem:[%s2995_s3 + $0x278] sm:$0xff] %v1297_v47 }
 0x1c1   :  { %v1121_v48 = vpop.f32.mrf.mxu2 }
 0x1c2   :  { %v1122_v49 = vadd.f32 %v2772_v16, %v1121_v48 }
 0x1c4   :  { %v1337_v50 = vmax.f32 %v1122_v49, 0.0 }
 0x1c6   :  { %1494 = vst [vmem:[%s2995_s3 + $0x3b8] sm:$0xff] %v1337_v50 }

// kernel: cnn_forward.4
= control target key start
LH: loop header
LB: loop body
LE: loop exit
PB: predicated region body
PF: predicated region fallthrough
CT: control target
= control target key end

     0   :  { %s1842_s12 = smov 0   ;;  %s2614_s0 = inlined_call_operand.vmem [shape: bf16[4,242,512], index: 0, kind: input, shape index: {}]   ;;  %s2615_s1 = inlined_call_operand.vmem [shape: bf16[512,128], index: 1, kind: input, shape index: {}]   ;;  %s2616_s2 = inlined_call_operand.vmem [shape: f32[1,128], index: 2, kind: input, shape index: {}]   ;;  %s2617_s3 = inlined_call_operand.vmem [shape: f32[242,128], index: 3, kind: output, shape index: {}]  }
   0x1 LB: > { %s1848_s13 = sadd.s32 4294967295, %s1820_s12   ;;  %p1338_p0 = scmp.ge.s32.totalorder %s1820_s12, 1  ;;  %s1820_s12 = sphi %s1842_s12, %s13_s12  }
   0x2   : > { %p132_p1 = scmp.lt.s32.totalorder %s1820_s12, 5 }
   0x4   : > { %p133_p2 = pnand %p1338_p0, %p132_p1 }
   0x5   : > { %p151_p3 = scmp.lt.s32.totalorder (!%p133_p2), %s1848_s13, 3  ;;  %p1708_p4 = scmp.ne.s32.totalorder (!%p133_p2), %s1848_s13, 0 }
   0x6   : > { %136 = sbr.rel (%p133_p2) target bundleno = 498 (0x1f2), region = 32 }
   0xb   : > { %v1779_v0 = vld [vmem:[%s2615_s1 + $0x38] sm:$0xff]  ;;  %v1778_v4 = vld [vmem:[%s2615_s1 + $0x30] sm:$0xff]  ;;  %v1777_v8 = vld [vmem:[%s2615_s1 + $0x28] sm:$0xff]  ;;  %s152_s25 = scalar_select %p151_p3, %s1848_s13, 3 }
   0xc   : > { %v1787_v1 = vld [vmem:[%s2615_s1 + $0x78] sm:$0xff]  ;;  %792 = vmatpush.bf16.msra.mxu0 %v1779_v0  ;;  %v1786_v5 = vld [vmem:[%s2615_s1 + $0x70] sm:$0xff]  ;;  %v1785_v9 = vld [vmem:[%s2615_s1 + $0x68] sm:$0xff] }
   0xd   : > { %v1795_v2 = vld [vmem:[%s2615_s1 + $0xb8] sm:$0xff]  ;;  %880 = vmatpush.bf16.msra.mxu1 %v1787_v1  ;;  %v1794_v6 = vld [vmem:[%s2615_s1 + $0xb0] sm:$0xff]  ;;  %v1793_v10 = vld [vmem:[%s2615_s1 + $0xa8] sm:$0xff]  ;;  %s1804_s7 = smul.u32 496, %s152_s25 }
   0xe   : > { %v1803_v3 = vld [vmem:[%s2615_s1 + $0xf8] sm:$0xff]  ;;  %968 = vmatpush.bf16.msra.mxu2 %v1795_v2  ;;  %v1802_v7 = vld [vmem:[%s2615_s1 + $0xf0] sm:$0xff]  ;;  %v1801_v11 = vld [vmem:[%s2615_s1 + $0xe8] sm:$0xff] }
   0xf   : > { %1056 = vmatpush.bf16.msra.mxu3 %v1803_v3  ;;  %v1776_v12 = vld [vmem:[%s2615_s1 + $0x20] sm:$0xff]  ;;  %v1775_v16 = vld [vmem:[%s2615_s1 + $0x18] sm:$0xff]  ;;  %v1774_v20 = vld [vmem:[%s2615_s1 + $0x10] sm:$0xff]  ;;  %s1935_s20 = scalar_lea.vmem %s2614_s0, %s1804_s7 }
  0x10   : > { %793 = vmatpush.bf16.msra.mxu0 %v1778_v4  ;;  %v1784_v13 = vld [vmem:[%s2615_s1 + $0x60] sm:$0xff]  ;;  %v1783_v17 = vld [vmem:[%s2615_s1 + $0x58] sm:$0xff]  ;;  %v1782_v21 = vld [vmem:[%s2615_s1 + $0x50] sm:$0xff] }
  0x11   : > { %881 = vmatpush.bf16.msra.mxu1 %v1786_v5  ;;  %v1792_v14 = vld [vmem:[%s2615_s1 + $0xa0] sm:$0xff]  ;;  %v1791_v18 = vld [vmem:[%s2615_s1 + $0x98] sm:$0xff]  ;;  %v1790_v22 = vld [vmem:[%s2615_s1 + $0x90] sm:$0xff] }
  0x12   : > { %969 = vmatpush.bf16.msra.mxu2 %v1794_v6  ;;  %v1800_v15 = vld [vmem:[%s2615_s1 + $0xe0] sm:$0xff]  ;;  %v1799_v19 = vld [vmem:[%s2615_s1 + $0xd8] sm:$0xff]  ;;  %v1798_v23 = vld [vmem:[%s2615_s1 + $0xd0] sm:$0xff] }
  0x13   : > { %1057 = vmatpush.bf16.msra.mxu3 %v1802_v7  ;;  %v1773_v24 = vld [vmem:[%s2615_s1 + $0x8] sm:$0xff]  ;;  %v1772_v28 = vld [vmem:[%s2615_s1] sm:$0xff]  ;;  %v1714_v33 = vld [vmem:[%s1935_s20 + $0xc] sm:$0xf0] }
  0x14   : > { %794 = vmatpush.bf16.msra.mxu0 %v1777_v8  ;;  %v1781_v25 = vld [vmem:[%s2615_s1 + $0x48] sm:$0xff]  ;;  %v1780_v29 = vld [vmem:[%s2615_s1 + $0x40] sm:$0xff]  ;;  %v1344_v35 = vld [vmem:[%s1935_s20 + $0x10] sm:$0xf0] }
  0x15   : > { %882 = vmatpush.bf16.msra.mxu1 %v1785_v9  ;;  %v1789_v26 = vld [vmem:[%s2615_s1 + $0x88] sm:$0xff]  ;;  %v1788_v30 = vld [vmem:[%s2615_s1 + $0x80] sm:$0xff]  ;;  %v1715_v37 = vld [vmem:[%s1935_s20 + $0x14] sm:$0xf0] }
  0x16   : > { %970 = vmatpush.bf16.msra.mxu2 %v1793_v10  ;;  %v1797_v27 = vld [vmem:[%s2615_s1 + $0xc8] sm:$0xff]  ;;  %v1796_v31 = vld [vmem:[%s2615_s1 + $0xc0] sm:$0xff]  ;;  %v1352_v39 = vld [vmem:[%s1935_s20 + $0x18] sm:$0xf0] }
  0x17   : > { %1058 = vmatpush.bf16.msra.mxu3 %v1801_v11  ;;  %v1342_v32 = vld [vmem:[%s1935_s20] sm:$0xf]  ;;  %v1712_v34 = vld [vmem:[%s1935_s20 + $0x4] sm:$0xf]  ;;  %v1350_v36 = vld [vmem:[%s1935_s20 + $0x8] sm:$0xf] }
  0x18   : > { %795 = vmatpush.bf16.msra.mxu0 %v1776_v12  ;;  %v1713_v38 = vld [vmem:[%s1935_s20 + $0xc] sm:$0xf]  ;;  %v1343_v40 = vor.u32 %v1714_v33, %v1342_v32  ;;  %v1347_v41 = vor.u32 %v1712_v34, %v1344_v35  ;;  %v1351_v42 = vor.u32 %v1715_v37, %v1350_v36  ;;  %v1358_v44 = vld [vmem:[%s1935_s20 + $0x20] sm:$0xf]  ;;  %v1718_v45 = vld [vmem:[%s1935_s20 + $0x2c] sm:$0xf0] }
  0x19   : > { %883 = vmatpush.bf16.msra.mxu1 %v1784_v13  ;;  %v1355_v43 = vor.u32 %v1713_v38, %v1352_v39  ;;  %v1716_v46 = vld [vmem:[%s1935_s20 + $0x24] sm:$0xf]  ;;  %v1360_v47 = vld [vmem:[%s1935_s20 + $0x30] sm:$0xf0]  ;;  %v1366_v48 = vld [vmem:[%s1935_s20 + $0x28] sm:$0xf]  ;;  %v1359_v52 = vor.u32 %v1718_v45, %v1358_v44 }
  0x1a   : > { %971 = vmatpush.bf16.msra.mxu2 %v1792_v14  ;;  %v1719_v49 = vld [vmem:[%s1935_s20 + $0x34] sm:$0xf0]  ;;  %v1717_v50 = vld [vmem:[%s1935_s20 + $0x2c] sm:$0xf]  ;;  %v1368_v51 = vld [vmem:[%s1935_s20 + $0x38] sm:$0xf0]  ;;  %v1363_v53 = vor.u32 %v1716_v46, %v1360_v47 }
  0x1b   : > { %1059 = vmatpush.bf16.msra.mxu3 %v1800_v15  ;;  %v1367_v54 = vor.u32 %v1719_v49, %v1366_v48  ;;  %v1371_v55 = vor.u32 %v1717_v50, %v1368_v51  ;;  %v1374_v56 = vld [vmem:[%s1935_s20 + $0x40] sm:$0xf]  ;;  %v1722_v57 = vld [vmem:[%s1935_s20 + $0x4c] sm:$0xf0]  ;;  %v1720_v58 = vld [vmem:[%s1935_s20 + $0x44] sm:$0xf] }
  0x1c   : > { %796 = vmatpush.bf16.msra.mxu0 %v1775_v16  ;;  %v1376_v59 = vld [vmem:[%s1935_s20 + $0x50] sm:$0xf0]  ;;  %v1382_v60 = vld [vmem:[%s1935_s20 + $0x48] sm:$0xf]  ;;  %v1723_v61 = vld [vmem:[%s1935_s20 + $0x54] sm:$0xf0]  ;;  %v1375_v0 = vor.u32 %v1722_v57, %v1374_v56 }
  0x1d   : > { %884 = vmatpush.bf16.msra.mxu1 %v1783_v17  ;;  %v1721_v62 = vld [vmem:[%s1935_s20 + $0x4c] sm:$0xf]  ;;  %v1384_v63 = vld [vmem:[%s1935_s20 + $0x58] sm:$0xf0]  ;;  %v1379_v1 = vor.u32 %v1720_v58, %v1376_v59  ;;  %v1383_v2 = vor.u32 %v1723_v61, %v1382_v60  ;;  %v1390_v4 = vld [vmem:[%s1935_s20 + $0x60] sm:$0xf] }
  0x1e   : > { %972 = vmatpush.bf16.msra.mxu2 %v1791_v18  ;;  %v1387_v3 = vor.u32 %v1721_v62, %v1384_v63  ;;  %v1726_v5 = vld [vmem:[%s1935_s20 + $0x6c] sm:$0xf0]  ;;  %v1724_v6 = vld [vmem:[%s1935_s20 + $0x64] sm:$0xf]  ;;  %v1392_v7 = vld [vmem:[%s1935_s20 + $0x70] sm:$0xf0] }
  0x1f   : > { %1060 = vmatpush.bf16.msra.mxu3 %v1799_v19  ;;  %v1398_v8 = vld [vmem:[%s1935_s20 + $0x68] sm:$0xf]  ;;  %v1727_v9 = vld [vmem:[%s1935_s20 + $0x74] sm:$0xf0]  ;;  %v1725_v10 = vld [vmem:[%s1935_s20 + $0x6c] sm:$0xf]  ;;  %v1391_v12 = vor.u32 %v1726_v5, %v1390_v4  ;;  %v1395_v13 = vor.u32 %v1724_v6, %v1392_v7 }
  0x20   : > { %797 = vmatpush.bf16.msra.mxu0 %v1774_v20  ;;  %v1400_v11 = vld [vmem:[%s1935_s20 + $0x78] sm:$0xf0]  ;;  %v1399_v14 = vor.u32 %v1727_v9, %v1398_v8  ;;  %v1406_v16 = vld [vmem:[%s1935_s20 + $0x80] sm:$0xf]  ;;  %v1730_v17 = vld [vmem:[%s1935_s20 + $0x8c] sm:$0xf0] }
  0x21   : > { %885 = vmatpush.bf16.msra.mxu1 %v1782_v21  ;;  %v1403_v15 = vor.u32 %v1725_v10, %v1400_v11  ;;  %v1728_v18 = vld [vmem:[%s1935_s20 + $0x84] sm:$0xf]  ;;  %v1408_v19 = vld [vmem:[%s1935_s20 + $0x90] sm:$0xf0]  ;;  %v1414_v20 = vld [vmem:[%s1935_s20 + $0x88] sm:$0xf] }
  0x22   : > { %973 = vmatpush.bf16.msra.mxu2 %v1790_v22  ;;  %v1731_v21 = vld [vmem:[%s1935_s20 + $0x94] sm:$0xf0]  ;;  %v1729_v22 = vld [vmem:[%s1935_s20 + $0x8c] sm:$0xf]  ;;  %v1430_v32 = vld [vmem:[%s1935_s20 + $0xa8] sm:$0xf] }
  0x23   : > { %1061 = vmatpush.bf16.msra.mxu3 %v1798_v23  ;;  %v1416_v23 = vld [vmem:[%s1935_s20 + $0x98] sm:$0xf0]  ;;  %v1735_v33 = vld [vmem:[%s1935_s20 + $0xb4] sm:$0xf0]  ;;  %v1733_v34 = vld [vmem:[%s1935_s20 + $0xac] sm:$0xf] }
  0x24   : > { %798 = vmatpush.bf16.msra.mxu0 %v1773_v24  ;;  %v1407_v24 = vor.u32 %v1730_v17, %v1406_v16  ;;  %v1432_v35 = vld [vmem:[%s1935_s20 + $0xb8] sm:$0xf0]  ;;  %v1431_v38 = vor.u32 %v1735_v33, %v1430_v32  ;;  %v1446_v44 = vld [vmem:[%s1935_s20 + $0xc8] sm:$0xf]  ;;  %v1739_v45 = vld [vmem:[%s1935_s20 + $0xd4] sm:$0xf0] }
  0x25   : > { %886 = vmatpush.bf16.msra.mxu1 %v1781_v25  ;;  %v1411_v25 = vor.u32 %v1728_v18, %v1408_v19  ;;  %v1435_v39 = vor.u32 %v1733_v34, %v1432_v35  ;;  %v1737_v46 = vld [vmem:[%s1935_s20 + $0xcc] sm:$0xf]  ;;  %v1448_v47 = vld [vmem:[%s1935_s20 + $0xd8] sm:$0xf0]  ;;  %v1447_v50 = vor.u32 %v1739_v45, %v1446_v44  ;;  %v1462_v56 = vld [vmem:[%s1935_s20 + $0xe8] sm:$0xf] }
  0x26   : > { %974 = vmatpush.bf16.msra.mxu2 %v1789_v26  ;;  %v1415_v26 = vor.u32 %v1731_v21, %v1414_v20  ;;  %v1451_v51 = vor.u32 %v1737_v46, %v1448_v47  ;;  %v1743_v57 = vld [vmem:[%s1935_s20 + $0xf4] sm:$0xf0]  ;;  %v1741_v58 = vld [vmem:[%s1935_s20 + $0xec] sm:$0xf]  ;;  %v1464_v59 = vld [vmem:[%s1935_s20 + $0xf8] sm:$0xf0] }
  0x27   : > { %1062 = vmatpush.bf16.msra.mxu3 %v1797_v27  ;;  %v1419_v27 = vor.u32 %v1729_v22, %v1416_v23  ;;  %v1463_v62 = vor.u32 %v1743_v57, %v1462_v56  ;;  %v1467_v63 = vor.u32 %v1741_v58, %v1464_v59  ;;  %v1472_v4 = vld [vmem:[%s1935_s20 + $0x110] sm:$0xf0]  ;;  %v1478_v5 = vld [vmem:[%s1935_s20 + $0x108] sm:$0xf]  ;;  %v1747_v6 = vld [vmem:[%s1935_s20 + $0x114] sm:$0xf0] }
  0x28   : > { %799 = vmatpush.bf16.msra.mxu0 %v1772_v28  ;;  %v1422_v28 = vld [vmem:[%s1935_s20 + $0xa0] sm:$0xf]  ;;  %v1745_v7 = vld [vmem:[%s1935_s20 + $0x10c] sm:$0xf]  ;;  %v1480_v8 = vld [vmem:[%s1935_s20 + $0x118] sm:$0xf0] }
  0x29   : > { %887 = vmatpush.bf16.msra.mxu1 %v1780_v29  ;;  %v1734_v29 = vld [vmem:[%s1935_s20 + $0xac] sm:$0xf0]  ;;  %v1749_v32 = vld [vmem:[%s1935_s20 + $0x12c] sm:$0xf]  ;;  %v1496_v33 = vld [vmem:[%s1935_s20 + $0x138] sm:$0xf0] }
  0x2a   : > { %975 = vmatpush.bf16.msra.mxu2 %v1788_v30  ;;  %v1732_v30 = vld [vmem:[%s1935_s20 + $0xa4] sm:$0xf]  ;;  %v1423_v36 = vor.u32 %v1734_v29, %v1422_v28  ;;  %v1488_v29 = vld [vmem:[%s1935_s20 + $0x130] sm:$0xf0]  ;;  %v1754_v56 = vld [vmem:[%s1935_s20 + $0x14c] sm:$0xf0] }
  0x2b   : > { %1063 = vmatpush.bf16.msra.mxu3 %v1796_v31  ;;  %800 = vmatmul.bf16.vlgmr.msra.gmra.mxu0 %v1343_v40  ;;  %v1424_v31 = vld [vmem:[%s1935_s20 + $0xb0] sm:$0xf0]  ;;  %v1438_v40 = vld [vmem:[%s1935_s20 + $0xc0] sm:$0xf]  ;;  %v1752_v57 = vld [vmem:[%s1935_s20 + $0x144] sm:$0xf] }
  0x2c   : > { %888 = vmatmul.bf16.vlgmr.msra.gmra.mxu1 %v1347_v41  ;;  %v1427_v37 = vor.u32 %v1732_v30, %v1424_v31  ;;  %v1738_v41 = vld [vmem:[%s1935_s20 + $0xcc] sm:$0xf0]  ;;  %v1494_v30 = vld [vmem:[%s1935_s20 + $0x128] sm:$0xf]  ;;  %v1751_v31 = vld [vmem:[%s1935_s20 + $0x134] sm:$0xf0] }
  0x2d   : > { %976 = vmatmul.bf16.vlgmr.msra.gmra.mxu2 %v1351_v42  ;;  %v1736_v42 = vld [vmem:[%s1935_s20 + $0xc4] sm:$0xf]  ;;  %v1439_v48 = vor.u32 %v1738_v41, %v1438_v40  ;;  %v1495_v41 = vor.u32 %v1751_v31, %v1494_v30  ;;  %v1504_v59 = vld [vmem:[%s1935_s20 + $0x150] sm:$0xf0]  ;;  %v1759_v30 = vld [vmem:[%s1935_s20 + $0x174] sm:$0xf0] }
  0x2e   : > { %1064 = vmatmul.bf16.vlgmr.msra.gmra.mxu3 %v1355_v43  ;;  %v1440_v43 = vld [vmem:[%s1935_s20 + $0xd0] sm:$0xf0]  ;;  %v1757_v31 = vld [vmem:[%s1935_s20 + $0x16c] sm:$0xf] }
  0x2f   : > { %v1443_v49 = vor.u32 %v1736_v42, %v1440_v43  ;;  %v1499_v42 = vor.u32 %v1749_v32, %v1496_v33  ;;  %v1528_v32 = vld [vmem:[%s1935_s20 + $0x178] sm:$0xf0] }
  0x3b   : > { %805 = vmatmul.bf16.gmra.mxu0 %v1359_v52  ;;  %v1454_v52 = vld [vmem:[%s1935_s20 + $0xe0] sm:$0xf] }
  0x3c   : > { %893 = vmatmul.bf16.gmra.mxu1 %v1363_v53  ;;  %v1742_v53 = vld [vmem:[%s1935_s20 + $0xec] sm:$0xf0] }
  0x3d   : > { %981 = vmatmul.bf16.gmra.mxu2 %v1367_v54  ;;  %v1740_v54 = vld [vmem:[%s1935_s20 + $0xe4] sm:$0xf]  ;;  %v1455_v60 = vor.u32 %v1742_v53, %v1454_v52 }
  0x3e   : > { %1069 = vmatmul.bf16.gmra.mxu3 %v1371_v55  ;;  %v1456_v55 = vld [vmem:[%s1935_s20 + $0xf0] sm:$0xf0] }
  0x3f   : > { %v1459_v61 = vor.u32 %v1740_v54, %v1456_v55  ;;  %v1502_v55 = vld [vmem:[%s1935_s20 + $0x140] sm:$0xf] }
  0x4b   : > { %810 = vmatmul.bf16.gmra.mxu0 %v1375_v0  ;;  %v2022_v0 = vld [vmem:[%s2616_s2] ss:$0 sm:$0xff] }
  0x4c   : > { %898 = vmatmul.bf16.gmra.mxu1 %v1379_v1  ;;  %v1470_v1 = vld [vmem:[%s1935_s20 + $0x100] sm:$0xf] }
  0x4d   : > { %986 = vmatmul.bf16.gmra.mxu2 %v1383_v2  ;;  %v1746_v2 = vld [vmem:[%s1935_s20 + $0x10c] sm:$0xf0] }
  0x4e   : > { %1074 = vmatmul.bf16.gmra.mxu3 %v1387_v3  ;;  %v1744_v3 = vld [vmem:[%s1935_s20 + $0x104] sm:$0xf]  ;;  %v1471_v9 = vor.u32 %v1746_v2, %v1470_v1 }
  0x4f   : > { %v1475_v10 = vor.u32 %v1744_v3, %v1472_v4  ;;  %v1503_v3 = vor.u32 %v1754_v56, %v1502_v55  ;;  %v1507_v4 = vor.u32 %v1752_v57, %v1504_v59  ;;  %v1534_v57 = vld [vmem:[%s1935_s20 + $0x180] sm:$0xf]  ;;  %v1762_v59 = vld [vmem:[%s1935_s20 + $0x18c] sm:$0xf0] }
  0x5b   : > { %815 = vmatmul.bf16.gmra.mxu0 %v1391_v12 }
  0x5c   : > { %903 = vmatmul.bf16.gmra.mxu1 %v1395_v13  ;;  %v1479_v13 = vor.u32 %v1747_v6, %v1478_v5 }
  0x5d   : > { %991 = vmatmul.bf16.gmra.mxu2 %v1399_v14  ;;  %v1483_v14 = vor.u32 %v1745_v7, %v1480_v8 }
  0x5e   : > { %1079 = vmatmul.bf16.gmra.mxu3 %v1403_v15 }
  0x6b   : > { %820 = vmatmul.bf16.gmra.mxu0 %v1407_v24 }
  0x6c   : > { %908 = vmatmul.bf16.gmra.mxu1 %v1411_v25  ;;  %v1486_v25 = vld [vmem:[%s1935_s20 + $0x120] sm:$0xf] }
  0x6d   : > { %996 = vmatmul.bf16.gmra.mxu2 %v1415_v26  ;;  %v1750_v26 = vld [vmem:[%s1935_s20 + $0x12c] sm:$0xf0] }
  0x6e   : > { %1084 = vmatmul.bf16.gmra.mxu3 %v1419_v27  ;;  %v1748_v27 = vld [vmem:[%s1935_s20 + $0x124] sm:$0xf] }
  0x7b   : > { %825 = vmatmul.bf16.gmra.mxu0 %v1423_v36  ;;  %v1487_v36 = vor.u32 %v1750_v26, %v1486_v25  ;;  %v1756_v25 = vld [vmem:[%s1935_s20 + $0x164] sm:$0xf] }
  0x7c   : > { %913 = vmatmul.bf16.gmra.mxu1 %v1427_v37  ;;  %v1491_v37 = vor.u32 %v1748_v27, %v1488_v29  ;;  %v1520_v27 = vld [vmem:[%s1935_s20 + $0x170] sm:$0xf0]  ;;  %v1526_v29 = vld [vmem:[%s1935_s20 + $0x168] sm:$0xf] }
  0x7d   : > { %1001 = vmatmul.bf16.gmra.mxu2 %v1431_v38 }
  0x7e   : > { %1089 = vmatmul.bf16.gmra.mxu3 %v1435_v39 }
  0x8b   : > { %830 = vmatmul.bf16.gmra.mxu0 %v1439_v48 }
  0x8c   : > { %918 = vmatmul.bf16.gmra.mxu1 %v1443_v49 }
  0x8d   : > { %1006 = vmatmul.bf16.gmra.mxu2 %v1447_v50 }
  0x8e   : > { %1094 = vmatmul.bf16.gmra.mxu3 %v1451_v51 }
  0x9b   : > { %835 = vmatmul.bf16.gmra.mxu0 %v1455_v60  ;;  %v1510_v60 = vld [vmem:[%s1935_s20 + $0x148] sm:$0xf] }
  0x9c   : > { %923 = vmatmul.bf16.gmra.mxu1 %v1459_v61  ;;  %v1755_v61 = vld [vmem:[%s1935_s20 + $0x154] sm:$0xf0] }
  0x9d   : > { %1011 = vmatmul.bf16.gmra.mxu2 %v1463_v62  ;;  %v1753_v62 = vld [vmem:[%s1935_s20 + $0x14c] sm:$0xf]  ;;  %v1511_v8 = vor.u32 %v1755_v61, %v1510_v60  ;;  %v1760_v60 = vld [vmem:[%s1935_s20 + $0x184] sm:$0xf] }
  0x9e   : > { %1099 = vmatmul.bf16.gmra.mxu3 %v1467_v63  ;;  %v1512_v63 = vld [vmem:[%s1935_s20 + $0x158] sm:$0xf0] }
  0xa8   : > { %v801_v11 = vpop.f32.mrf.mxu0 }
  0xa9   : > { %v889_v12 = vpop.f32.mrf.mxu1  ;;  %v802_v15 = vadd.f32 %v2022_v0, %v801_v11 }
  0xab   : > { %v890_v16 = vadd.f32 %v889_v12, %v802_v15  ;;  %840 = vmatmul.bf16.gmra.mxu0 %v1471_v9  ;;  %v1515_v9 = vor.u32 %v1753_v62, %v1512_v63  ;;  %v1536_v62 = vld [vmem:[%s1935_s20 + $0x190] sm:$0xf0]  ;;  %v1542_v63 = vld [vmem:[%s1935_s20 + $0x188] sm:$0xf] }
  0xac   : > { %928 = vmatmul.bf16.gmra.mxu1 %v1475_v10 }
  0xad   : > { %1016 = vmatmul.bf16.gmra.mxu2 %v1479_v13 }
  0xae   : > { %1104 = vmatmul.bf16.gmra.mxu3 %v1483_v14 }
  0xb0   : > { %v977_v17 = vpop.f32.mrf.mxu2  ;;  %v803_v20 = vpop.f32.mrf.mxu0 }
  0xb1   : > { %v1065_v18 = vpop.f32.mrf.mxu3  ;;  %v978_v19 = vadd.f32 %v977_v17, %v890_v16  ;;  %v891_v21 = vpop.f32.mrf.mxu1  ;;  %v804_v22 = vadd.f32 %v2022_v0, %v803_v20 }
  0xb3   : > { %v2034_v23 = vadd.f32 %v1065_v18, %v978_v19  ;;  %v892_v24 = vadd.f32 %v891_v21, %v804_v22  ;;  %v1518_v22 = vld [vmem:[%s1935_s20 + $0x160] sm:$0xf] }
  0xb5   : > { %v1144_v28 = vmax.f32 %v2034_v23, 0.0 }
  0xb8   : > { %v979_v34 = vpop.f32.mrf.mxu2  ;;  %v806_v39 = vpop.f32.mrf.mxu0 }
  0xb9   : > { %v1067_v35 = vpop.f32.mrf.mxu3  ;;  %v980_v38 = vadd.f32 %v979_v34, %v892_v24  ;;  %v894_v40 = vpop.f32.mrf.mxu1  ;;  %v807_v43 = vadd.f32 %v2022_v0, %v806_v39  ;;  %v1758_v24 = vld [vmem:[%s1935_s20 + $0x16c] sm:$0xf0] }
  0xbb   : > { %v2046_v44 = vadd.f32 %v1067_v35, %v980_v38  ;;  %v895_v45 = vadd.f32 %v894_v40, %v807_v43  ;;  %845 = vmatmul.bf16.gmra.mxu0 %v1487_v36  ;;  %v1519_v35 = vor.u32 %v1758_v24, %v1518_v22  ;;  %v1523_v36 = vor.u32 %v1756_v25, %v1520_v27 }
  0xbc   : > { %933 = vmatmul.bf16.gmra.mxu1 %v1491_v37  ;;  %v1527_v40 = vor.u32 %v1759_v30, %v1526_v29 }
  0xbd   : > { %v1145_v46 = vmax.f32 %v2046_v44, 0.0  ;;  %1021 = vmatmul.bf16.gmra.mxu2 %v1495_v41  ;;  %v1531_v41 = vor.u32 %v1757_v31, %v1528_v32  ;;  %v1550_v31 = vld [vmem:[%s1935_s20 + $0x1a0] sm:$0xf]  ;;  %v1766_v32 = vld [vmem:[%s1935_s20 + $0x1ac] sm:$0xf0] }
  0xbe   : > { %1109 = vmatmul.bf16.gmra.mxu3 %v1499_v42 }
  0xc0   : > { %v982_v47 = vpop.f32.mrf.mxu2  ;;  %v808_v50 = vpop.f32.mrf.mxu0 }
  0xc1   : > { %v1070_v48 = vpop.f32.mrf.mxu3  ;;  %v983_v49 = vadd.f32 %v982_v47, %v895_v45  ;;  %v896_v51 = vpop.f32.mrf.mxu1  ;;  %v809_v52 = vadd.f32 %v2022_v0, %v808_v50 }
  0xc3   : > { %v2050_v53 = vadd.f32 %v1070_v48, %v983_v49  ;;  %v897_v54 = vadd.f32 %v896_v51, %v809_v52 }
  0xc5   : > { %v1146_v58 = vmax.f32 %v2050_v53, 0.0 }
  0xc8   : > { %v984_v1 = vpop.f32.mrf.mxu2  ;;  %v811_v6 = vpop.f32.mrf.mxu0 }
  0xc9   : > { %v1072_v2 = vpop.f32.mrf.mxu3  ;;  %v985_v5 = vadd.f32 %v984_v1, %v897_v54  ;;  %v899_v7 = vpop.f32.mrf.mxu1  ;;  %v812_v10 = vadd.f32 %v2022_v0, %v811_v6  ;;  %v1763_v1 = vld [vmem:[%s1935_s20 + $0x194] sm:$0xf0]  ;;  %v1535_v6 = vor.u32 %v1762_v59, %v1534_v57 }
  0xcb   : > { %v2062_v11 = vadd.f32 %v1072_v2, %v985_v5  ;;  %v900_v12 = vadd.f32 %v899_v7, %v812_v10  ;;  %850 = vmatmul.bf16.gmra.mxu0 %v1503_v3  ;;  %v1761_v2 = vld [vmem:[%s1935_s20 + $0x18c] sm:$0xf]  ;;  %v1544_v3 = vld [vmem:[%s1935_s20 + $0x198] sm:$0xf0]  ;;  %v1539_v7 = vor.u32 %v1760_v60, %v1536_v62 }
  0xcc   : > { %938 = vmatmul.bf16.gmra.mxu1 %v1507_v4 }
  0xcd   : > { %v1147_v13 = vmax.f32 %v2062_v11, 0.0  ;;  %1026 = vmatmul.bf16.gmra.mxu2 %v1511_v8 }
  0xce   : > { %1114 = vmatmul.bf16.gmra.mxu3 %v1515_v9 }
  0xd0   : > { %v987_v14 = vpop.f32.mrf.mxu2  ;;  %v813_v17 = vpop.f32.mrf.mxu0 }
  0xd1   : > { %v1075_v15 = vpop.f32.mrf.mxu3  ;;  %v988_v16 = vadd.f32 %v987_v14, %v900_v12  ;;  %v901_v18 = vpop.f32.mrf.mxu1  ;;  %v814_v19 = vadd.f32 %v2022_v0, %v813_v17  ;;  %v1543_v12 = vor.u32 %v1763_v1, %v1542_v63  ;;  %v1547_v14 = vor.u32 %v1761_v2, %v1544_v3 }
  0xd3   : > { %v2066_v20 = vadd.f32 %v1075_v15, %v988_v16  ;;  %v902_v21 = vadd.f32 %v901_v18, %v814_v19 }
  0xd5   : > { %v1148_v26 = vmax.f32 %v2066_v20, 0.0 }
  0xd8   : > { %v989_v33 = vpop.f32.mrf.mxu2  ;;  %v816_v38 = vpop.f32.mrf.mxu0 }
  0xd9   : > { %v1077_v34 = vpop.f32.mrf.mxu3  ;;  %v990_v37 = vadd.f32 %v989_v33, %v902_v21  ;;  %v904_v39 = vpop.f32.mrf.mxu1  ;;  %v817_v42 = vadd.f32 %v2022_v0, %v816_v38  ;;  %v1764_v33 = vld [vmem:[%s1935_s20 + $0x1a4] sm:$0xf]  ;;  %v1765_v38 = vld [vmem:[%s1935_s20 + $0x1ac] sm:$0xf] }
  0xdb   : > { %v2078_v43 = vadd.f32 %v1077_v34, %v990_v37  ;;  %v905_v45 = vadd.f32 %v904_v39, %v817_v42  ;;  %855 = vmatmul.bf16.gmra.mxu0 %v1519_v35  ;;  %v1552_v35 = vld [vmem:[%s1935_s20 + $0x1b0] sm:$0xf0]  ;;  %v1767_v37 = vld [vmem:[%s1935_s20 + $0x1b4] sm:$0xf0]  ;;  %v1560_v39 = vld [vmem:[%s1935_s20 + $0x1b8] sm:$0xf0]  ;;  %v1551_v42 = vor.u32 %v1766_v32, %v1550_v31 }
  0xdc   : > { %943 = vmatmul.bf16.gmra.mxu1 %v1523_v36  ;;  %v1558_v36 = vld [vmem:[%s1935_s20 + $0x1a8] sm:$0xf] }
  0xdd   : > { %v1149_v47 = vmax.f32 %v2078_v43, 0.0  ;;  %1031 = vmatmul.bf16.gmra.mxu2 %v1527_v40 }
  0xde   : > { %1119 = vmatmul.bf16.gmra.mxu3 %v1531_v41 }
  0xe0   : > { %v992_v48 = vpop.f32.mrf.mxu2  ;;  %v818_v51 = vpop.f32.mrf.mxu0 }
  0xe1   : > { %v1080_v49 = vpop.f32.mrf.mxu3  ;;  %v993_v50 = vadd.f32 %v992_v48, %v905_v45  ;;  %v906_v52 = vpop.f32.mrf.mxu1  ;;  %v819_v54 = vadd.f32 %v2022_v0, %v818_v51  ;;  %v1555_v45 = vor.u32 %v1764_v33, %v1552_v35  ;;  %v1559_v51 = vor.u32 %v1767_v37, %v1558_v36 }
  0xe3   : > { %v2082_v55 = vadd.f32 %v1080_v49, %v993_v50  ;;  %v907_v56 = vadd.f32 %v906_v52, %v819_v54  ;;  %v1563_v52 = vor.u32 %v1765_v38, %v1560_v39 }
  0xe5   : > { %v1150_v61 = vmax.f32 %v2082_v55, 0.0 }
  0xe8   : > { %v994_v4 = vpop.f32.mrf.mxu2  ;;  %v821_v9 = vpop.f32.mrf.mxu0 }
  0xe9   : > { %v1082_v5 = vpop.f32.mrf.mxu3  ;;  %v995_v8 = vadd.f32 %v994_v4, %v907_v56  ;;  %v909_v10 = vpop.f32.mrf.mxu1  ;;  %v822_v15 = vadd.f32 %v2022_v0, %v821_v9 }
  0xeb   : > { %v2094_v16 = vadd.f32 %v1082_v5, %v995_v8  ;;  %v910_v17 = vadd.f32 %v909_v10, %v822_v15  ;;  %860 = vmatmul.bf16.gmra.mxu0 %v1535_v6  ;;  %v1566_v6 = vld [vmem:[%s1935_s20 + $0x1c0] sm:$0xf]  ;;  %v1768_v8 = vld [vmem:[%s1935_s20 + $0x1c4] sm:$0xf]  ;;  %v1568_v10 = vld [vmem:[%s1935_s20 + $0x1d0] sm:$0xf0] }
  0xec   : > { %948 = vmatmul.bf16.gmra.mxu1 %v1539_v7  ;;  %v1770_v7 = vld [vmem:[%s1935_s20 + $0x1cc] sm:$0xf0]  ;;  %v1769_v15 = vld [vmem:[%s1935_s20 + $0x1cc] sm:$0xf] }
  0xed   : > { %v1151_v18 = vmax.f32 %v2094_v16, 0.0  ;;  %1036 = vmatmul.bf16.gmra.mxu2 %v1543_v12  ;;  %v1574_v12 = vld [vmem:[%s1935_s20 + $0x1c8] sm:$0xf] }
  0xee   : > { %1124 = vmatmul.bf16.gmra.mxu3 %v1547_v14  ;;  %v1771_v14 = vld [vmem:[%s1935_s20 + $0x1d4] sm:$0xf0] }
  0xef   : > { %v1575_v31 = vor.u32 %v1771_v14, %v1574_v12 }
  0xf0   : > { %v997_v19 = vpop.f32.mrf.mxu2  ;;  %v823_v24 = vpop.f32.mrf.mxu0 }
  0xf1   : > { %v1085_v21 = vpop.f32.mrf.mxu3  ;;  %v998_v22 = vadd.f32 %v997_v19, %v910_v17  ;;  %v911_v25 = vpop.f32.mrf.mxu1  ;;  %v824_v27 = vadd.f32 %v2022_v0, %v823_v24  ;;  %v1576_v17 = vld [vmem:[%s1935_s20 + $0x1d8] sm:$0xf0]  ;;  %v1571_v24 = vor.u32 %v1768_v8, %v1568_v10 }
  0xf2   : > { %v1579_v32 = vor.u32 %v1769_v15, %v1576_v17 }
  0xf3   : > { %v2098_v29 = vadd.f32 %v1085_v21, %v998_v22  ;;  %v912_v30 = vadd.f32 %v911_v25, %v824_v27  ;;  %v1567_v22 = vor.u32 %v1770_v7, %v1566_v6 }
  0xf5   : > { %v1152_v34 = vmax.f32 %v2098_v29, 0.0 }
  0xf8   : > { %v999_v40 = vpop.f32.mrf.mxu2  ;;  %v826_v49 = vpop.f32.mrf.mxu0 }
  0xf9   : > { %v1087_v41 = vpop.f32.mrf.mxu3  ;;  %v1000_v48 = vadd.f32 %v999_v40, %v912_v30  ;;  %v914_v50 = vpop.f32.mrf.mxu1  ;;  %v827_v54 = vadd.f32 %v2022_v0, %v826_v49  ;;  %v217_v49 = vld [vmem:[%s1935_s20 + $0x1e8] sm:$0x11] }
  0xfb   : > { %v2110_v56 = vadd.f32 %v1087_v41, %v1000_v48  ;;  %v915_v57 = vadd.f32 %v914_v50, %v827_v54  ;;  %865 = vmatmul.bf16.gmra.mxu0 %v1551_v42 }
  0xfc   : > { %953 = vmatmul.bf16.gmra.mxu1 %v1555_v45  ;;  %v216_v45 = vld [vmem:[%s1935_s20 + $0x1e0] sm:$0x11] }
  0xfd   : > { %v1153_v59 = vmax.f32 %v2110_v56, 0.0  ;;  %1041 = vmatmul.bf16.gmra.mxu2 %v1559_v51  ;;  %v469_v54 = vunpack.c.h.b16 %v216_v45 }
  0xfe   : > { %1129 = vmatmul.bf16.gmra.mxu3 %v1563_v52  ;;  %v468_v52 = vunpack.c.l.b16 %v216_v45 }
 0x100   : > { %v1002_v60 = vpop.f32.mrf.mxu2  ;;  %v828_v1 = vpop.f32.mrf.mxu0 }
 0x101   : > { %v1090_v62 = vpop.f32.mrf.mxu3  ;;  %v1003_v63 = vadd.f32 %v1002_v60, %v915_v57  ;;  %v916_v2 = vpop.f32.mrf.mxu1  ;;  %v829_v3 = vadd.f32 %v2022_v0, %v828_v1  ;;  %v470_v60 = vunpack.c.l.b16 %v217_v49 }
 0x103   : > { %v2114_v4 = vadd.f32 %v1090_v62, %v1003_v63  ;;  %v917_v5 = vadd.f32 %v916_v2, %v829_v3  ;;  %v471_v62 = vunpack.c.h.b16 %v217_v49  ;;  %v532_v2 = vpack.c.b16 %v468_v52, %v468_v52 }
 0x104   : > { %v533_v3 = vpack.c.b16 %v469_v54, %v469_v54  ;;  %v534_v8 = vpack.c.b16 %v470_v60, %v470_v60 }
 0x105   : > { %v1154_v9 = vmax.f32 %v2114_v4, 0.0  ;;  %v535_v10 = vpack.c.b16 %v471_v62, %v471_v62 }
 0x108   : > { %v1004_v19 = vpop.f32.mrf.mxu2  ;;  %v831_v27 = vpop.f32.mrf.mxu0 }
 0x109   : > { %v1092_v21 = vpop.f32.mrf.mxu3  ;;  %v1005_v25 = vadd.f32 %v1004_v19, %v917_v5  ;;  %v919_v30 = vpop.f32.mrf.mxu1  ;;  %v832_v33 = vadd.f32 %v2022_v0, %v831_v27 }
 0x10b   : > { %v2126_v35 = vadd.f32 %v1092_v21, %v1005_v25  ;;  %v920_v36 = vadd.f32 %v919_v30, %v832_v33  ;;  %870 = vmatmul.bf16.gmra.mxu0 %v1567_v22 }
 0x10c   : > { %958 = vmatmul.bf16.gmra.mxu1 %v1571_v24 }
 0x10d   : > { %v1155_v37 = vmax.f32 %v2126_v35, 0.0  ;;  %1046 = vmatmul.bf16.gmra.mxu2 %v1575_v31 }
 0x10e   : > { %1134 = vmatmul.bf16.gmra.mxu3 %v1579_v32 }
 0x110   : > { %v1007_v38 = vpop.f32.mrf.mxu2  ;;  %v833_v41 = vpop.f32.mrf.mxu0 }
 0x111   : > { %v1095_v39 = vpop.f32.mrf.mxu3  ;;  %v1008_v40 = vadd.f32 %v1007_v38, %v920_v36  ;;  %v921_v42 = vpop.f32.mrf.mxu1  ;;  %v834_v48 = vadd.f32 %v2022_v0, %v833_v41 }
 0x113   : > { %v2132_v50 = vadd.f32 %v1095_v39, %v1008_v40  ;;  %v922_v51 = vadd.f32 %v921_v42, %v834_v48 }
 0x115   : > { %v1156_v57 = vmax.f32 %v2132_v50, 0.0 }
 0x118   : > { %v1009_v63 = vpop.f32.mrf.mxu2  ;;  %v836_v6 = vpop.f32.mrf.mxu0 }
 0x119   : > { %v1097_v1 = vpop.f32.mrf.mxu3  ;;  %v1010_v5 = vadd.f32 %v1009_v63, %v922_v51  ;;  %v924_v7 = vpop.f32.mrf.mxu1  ;;  %v837_v12 = vadd.f32 %v2022_v0, %v836_v6 }
 0x11b   : > { %v2136_v14 = vadd.f32 %v1097_v1, %v1010_v5  ;;  %v925_v15 = vadd.f32 %v924_v7, %v837_v12  ;;  %875 = vmatmul.bf16.gmra.mxu0 %v532_v2 }
 0x11c   : > { %963 = vmatmul.bf16.gmra.mxu1 %v533_v3 }
 0x11d   : > { %v1157_v17 = vmax.f32 %v2136_v14, 0.0  ;;  %1051 = vmatmul.bf16.gmra.mxu2 %v534_v8 }
 0x11e   : > { %1139 = vmatmul.bf16.gmra.mxu3 %v535_v10 }
 0x120   : > { %v1012_v19 = vpop.f32.mrf.mxu2  ;;  %v838_v24 = vpop.f32.mrf.mxu0 }
 0x121   : > { %v1100_v21 = vpop.f32.mrf.mxu3  ;;  %v1013_v22 = vadd.f32 %v1012_v19, %v925_v15  ;;  %v926_v25 = vpop.f32.mrf.mxu1  ;;  %v839_v27 = vadd.f32 %v2022_v0, %v838_v24 }
 0x123   : > { %v2140_v30 = vadd.f32 %v1100_v21, %v1013_v22  ;;  %v927_v31 = vadd.f32 %v926_v25, %v839_v27 }
 0x125   : > { %v1158_v32 = vmax.f32 %v2140_v30, 0.0 }
 0x128   : > { %v1014_v33 = vpop.f32.mrf.mxu2  ;;  %v841_v39 = vpop.f32.mrf.mxu0 }
 0x129   : > { %v1102_v36 = vpop.f32.mrf.mxu3  ;;  %v1015_v38 = vadd.f32 %v1014_v33, %v927_v31  ;;  %v929_v40 = vpop.f32.mrf.mxu1  ;;  %v842_v41 = vadd.f32 %v2022_v0, %v841_v39 }
 0x12b   : > { %v2144_v42 = vadd.f32 %v1102_v36, %v1015_v38  ;;  %v930_v45 = vadd.f32 %v929_v40, %v842_v41 }
 0x130   : > { %v1017_v49 = vpop.f32.mrf.mxu2  ;;  %v843_v54 = vpop.f32.mrf.mxu0 }
 0x131   : > { %v1105_v51 = vpop.f32.mrf.mxu3  ;;  %v1018_v52 = vadd.f32 %v1017_v49, %v930_v45  ;;  %v931_v60 = vpop.f32.mrf.mxu1  ;;  %v844_v62 = vadd.f32 %v2022_v0, %v843_v54 }
 0x133   : > { %v2148_v63 = vadd.f32 %v1105_v51, %v1018_v52  ;;  %v932_v1 = vadd.f32 %v931_v60, %v844_v62 }
 0x138   : > { %v1019_v3 = vpop.f32.mrf.mxu2  ;;  %v846_v7 = vpop.f32.mrf.mxu0 }
 0x139   : > { %v1107_v5 = vpop.f32.mrf.mxu3  ;;  %v1020_v6 = vadd.f32 %v1019_v3, %v932_v1  ;;  %v934_v8 = vpop.f32.mrf.mxu1  ;;  %v847_v10 = vadd.f32 %v2022_v0, %v846_v7 }
 0x13b   : > { %v2152_v12 = vadd.f32 %v1107_v5, %v1020_v6  ;;  %v935_v15 = vadd.f32 %v934_v8, %v847_v10 }
 0x140   : > { %v1022_v21 = vpop.f32.mrf.mxu2  ;;  %v848_v25 = vpop.f32.mrf.mxu0 }
 0x141   : > { %v1110_v22 = vpop.f32.mrf.mxu3  ;;  %v1023_v24 = vadd.f32 %v1022_v21, %v935_v15  ;;  %v936_v27 = vpop.f32.mrf.mxu1  ;;  %v849_v31 = vadd.f32 %v2022_v0, %v848_v25 }
 0x143   : > { %v2156_v33 = vadd.f32 %v1110_v22, %v1023_v24  ;;  %v937_v36 = vadd.f32 %v936_v27, %v849_v31 }
 0x148   : > { %v1024_v39 = vpop.f32.mrf.mxu2  ;;  %v851_v45 = vpop.f32.mrf.mxu0 }
 0x149   : > { %v1112_v40 = vpop.f32.mrf.mxu3  ;;  %v1025_v41 = vadd.f32 %v1024_v39, %v937_v36  ;;  %v939_v49 = vpop.f32.mrf.mxu1  ;;  %v852_v51 = vadd.f32 %v2022_v0, %v851_v45 }
 0x14b   : > { %v2160_v52 = vadd.f32 %v1112_v40, %v1025_v41  ;;  %v940_v54 = vadd.f32 %v939_v49, %v852_v51 }
 0x150   : > { %v1027_v62 = vpop.f32.mrf.mxu2  ;;  %v853_v5 = vpop.f32.mrf.mxu0 }
 0x151   : > { %v1115_v1 = vpop.f32.mrf.mxu3  ;;  %v1028_v3 = vadd.f32 %v1027_v62, %v940_v54  ;;  %v941_v6 = vpop.f32.mrf.mxu1  ;;  %v854_v7 = vadd.f32 %v2022_v0, %v853_v5 }
 0x153   : > { %v2164_v8 = vadd.f32 %v1115_v1, %v1028_v3  ;;  %v942_v10 = vadd.f32 %v941_v6, %v854_v7 }
 0x158   : > { %v1029_v21 = vpop.f32.mrf.mxu2  ;;  %v856_v25 = vpop.f32.mrf.mxu0 }
 0x159   : > { %v1117_v22 = vpop.f32.mrf.mxu3  ;;  %v1030_v24 = vadd.f32 %v1029_v21, %v942_v10  ;;  %v944_v27 = vpop.f32.mrf.mxu1  ;;  %v857_v31 = vadd.f32 %v2022_v0, %v856_v25 }
 0x15b   : > { %v2168_v36 = vadd.f32 %v1117_v22, %v1030_v24  ;;  %v945_v39 = vadd.f32 %v944_v27, %v857_v31 }
 0x160   : > { %v1032_v41 = vpop.f32.mrf.mxu2  ;;  %v858_v51 = vpop.f32.mrf.mxu0 }
 0x161   : > { %v1120_v45 = vpop.f32.mrf.mxu3  ;;  %v1033_v49 = vadd.f32 %v1032_v41, %v945_v39  ;;  %v946_v54 = vpop.f32.mrf.mxu1  ;;  %v859_v1 = vadd.f32 %v2022_v0, %v858_v51 }
 0x163   : > { %v2171_v62 = vadd.f32 %v1120_v45, %v1033_v49  ;;  %v947_v5 = vadd.f32 %v946_v54, %v859_v1 }
 0x168   : > { %v1034_v6 = vpop.f32.mrf.mxu2  ;;  %v861_v21 = vpop.f32.mrf.mxu0 }
 0x169   : > { %v1122_v7 = vpop.f32.mrf.mxu3  ;;  %v1035_v10 = vadd.f32 %v1034_v6, %v947_v5  ;;  %v949_v22 = vpop.f32.mrf.mxu1  ;;  %v862_v24 = vadd.f32 %v2022_v0, %v861_v21 }
 0x16b   : > { %v2176_v25 = vadd.f32 %v1122_v7, %v1035_v10  ;;  %v950_v31 = vadd.f32 %v949_v22, %v862_v24 }
 0x170   : > { %v1037_v39 = vpop.f32.mrf.mxu2  ;;  %v863_v49 = vpop.f32.mrf.mxu0 }
 0x171   : > { %v1125_v41 = vpop.f32.mrf.mxu3  ;;  %v1038_v45 = vadd.f32 %v1037_v39, %v950_v31  ;;  %v951_v51 = vpop.f32.mrf.mxu1  ;;  %v864_v54 = vadd.f32 %v2022_v0, %v863_v49 }
 0x173   : > { %v2179_v40 = vadd.f32 %v1125_v41, %v1038_v45  ;;  %v952_v5 = vadd.f32 %v951_v51, %v864_v54 }
 0x178   : > { %v1039_v6 = vpop.f32.mrf.mxu2  ;;  %v866_v7 = vpop.f32.mrf.mxu0 }
 0x179   : > { %v1127_v3 = vpop.f32.mrf.mxu3  ;;  %v1040_v21 = vadd.f32 %v1039_v6, %v952_v5  ;;  %v954_v10 = vpop.f32.mrf.mxu1  ;;  %v867_v27 = vadd.f32 %v2022_v0, %v866_v7 }
 0x17b   : > { %v2184_v22 = vadd.f32 %v1127_v3, %v1040_v21  ;;  %v955_v31 = vadd.f32 %v954_v10, %v867_v27 }
 0x180   : > { %v1042_v39 = vpop.f32.mrf.mxu2  ;;  %v868_v15 = vpop.f32.mrf.mxu0 }
 0x181   : > { %v1130_v41 = vpop.f32.mrf.mxu3  ;;  %v1043_v45 = vadd.f32 %v1042_v39, %v955_v31  ;;  %v956_v49 = vpop.f32.mrf.mxu1  ;;  %v869_v51 = vadd.f32 %v2022_v0, %v868_v15 }
 0x183   : > { %v2187_v60 = vadd.f32 %v1130_v41, %v1043_v45  ;;  %v957_v5 = vadd.f32 %v956_v49, %v869_v51 }
 0x188   : > { %v1044_v6 = vpop.f32.mrf.mxu2  ;;  %v871_v3 = vpop.f32.mrf.mxu0 }
 0x189   : > { %v1132_v1 = vpop.f32.mrf.mxu3  ;;  %v1045_v7 = vadd.f32 %v1044_v6, %v957_v5  ;;  %v959_v21 = vpop.f32.mrf.mxu1  ;;  %v872_v24 = vadd.f32 %v2022_v0, %v871_v3 }
 0x18b   : > { %v2192_v27 = vadd.f32 %v1132_v1, %v1045_v7  ;;  %v960_v31 = vadd.f32 %v959_v21, %v872_v24 }
 0x190   : > { %v1047_v39 = vpop.f32.mrf.mxu2  ;;  %v873_v38 = vpop.f32.mrf.mxu0 }
 0x191   : > { %v1135_v41 = vpop.f32.mrf.mxu3  ;;  %v1048_v45 = vadd.f32 %v1047_v39, %v960_v31  ;;  %v961_v15 = vpop.f32.mrf.mxu1  ;;  %v874_v49 = vadd.f32 %v2022_v0, %v873_v38 }
 0x193   : > { %v2195_v19 = vadd.f32 %v1135_v41, %v1048_v45  ;;  %v962_v5 = vadd.f32 %v961_v15, %v874_v49 }
 0x195   : > { %v1172_v51 = vmax.f32 %v2195_v19, 0.0 }
 0x198   : > { %v1049_v6 = vpop.f32.mrf.mxu2  ;;  %v876_v1 = vpop.f32.mrf.mxu0 }
 0x199   : > { %v1137_v54 = vpop.f32.mrf.mxu3  ;;  %v1050_v3 = vadd.f32 %v1049_v6, %v962_v5  ;;  %v964_v7 = vpop.f32.mrf.mxu1  ;;  %v877_v10 = vadd.f32 %v2022_v0, %v876_v1 }
 0x19b   : > { %v2200_v24 = vadd.f32 %v1137_v54, %v1050_v3  ;;  %v965_v31 = vadd.f32 %v964_v7, %v877_v10 }
 0x19d   : > { %v1173_v21 = vmax.f32 %v2200_v24, 0.0 }
 0x1a0   : > { %v1052_v39 = vpop.f32.mrf.mxu2  ;;  %v878_v2 = vpop.f32.mrf.mxu0 }
 0x1a1   : > { %v1140_v41 = vpop.f32.mrf.mxu3  ;;  %v1053_v45 = vadd.f32 %v1052_v39, %v965_v31  ;;  %v966_v38 = vpop.f32.mrf.mxu1 }
 0x1a3   : > { %v2203_v48 = vadd.f32 %v1140_v41, %v1053_v45 }
 0x1a5   : > { %v1174_v15 = vmax.f32 %v2203_v48, 0.0  ;;  %1178 = sbr.rel (%p1708_p4) target bundleno = 457 (0x1c9), region = 36 }
 0x1a8   : > { %v1054_v49 = vpop.f32.mrf.mxu2 }
 0x1a9   : > { %v1142_v5 = vpop.f32.mrf.mxu3 }
 0x1aa   : > { %1179 = vst [vmem:[%s2617_s3] sm:$0xff] %v1144_v28  ;;  %v2618_v0 = vmax.f32 %v2144_v42, 0.0  ;;  %v2619_v2 = vmax.f32 %v2148_v63, 0.0  ;;  %v2620_v54 = vmax.f32 %v2152_v12, 0.0  ;;  %v2621_v10 = vmax.f32 %v2156_v33, 0.0 }
 0x1ab   : > { %1180 = vst [vmem:[%s2617_s3 + $0x8] sm:$0xff] %v1145_v46  ;;  %v2622_v6 = vmax.f32 %v2160_v52, 0.0  ;;  %v2623_v3 = vmax.f32 %v2164_v8, 0.0  ;;  %v2624_v1 = vmax.f32 %v2168_v36, 0.0  ;;  %v2625_v7 = vmax.f32 %v2171_v62, 0.0 }
 0x1ac   : > { %1181 = vst [vmem:[%s2617_s3 + $0x10] sm:$0xff] %v1146_v58  ;;  %v2626_v31 = vmax.f32 %v2176_v25, 0.0  ;;  %v2627_v39 = vmax.f32 %v2179_v40, 0.0  ;;  %v2628_v41 = vmax.f32 %v2184_v22, 0.0  ;;  %v2629_v45 = vmax.f32 %v2187_v60, 0.0 }
 0x1ad   : > { %1182 = vst [vmem:[%s2617_s3 + $0x18] sm:$0xff] %v1147_v13  ;;  %v2630_v38 = vmax.f32 %v2192_v27, 0.0 }
 0x1ae   : > { %1183 = vst [vmem:[%s2617_s3 + $0x20] sm:$0xff] %v1148_v26 }
 0x1af   : > { %1184 = vst [vmem:[%s2617_s3 + $0x28] sm:$0xff] %v1149_v47 }
 0x1b0   : > { %1185 = vst [vmem:[%s2617_s3 + $0x30] sm:$0xff] %v1150_v61 }
 0x1b1   : > { %1186 = vst [vmem:[%s2617_s3 + $0x38] sm:$0xff] %v1151_v18 }
 0x1b2   : > { %1187 = vst [vmem:[%s2617_s3 + $0x40] sm:$0xff] %v1152_v34 }
 0x1b3   : > { %1188 = vst [vmem:[%s2617_s3 + $0x48] sm:$0xff] %v1153_v59 }
 0x1b4   : > { %1189 = vst [vmem:[%s2617_s3 + $0x50] sm:$0xff] %v1154_v9 }
 0x1b5   : > { %1190 = vst [vmem:[%s2617_s3 + $0x58] sm:$0xff] %v1155_v37 }
 0x1b6   : > { %1191 = vst [vmem:[%s2617_s3 + $0x60] sm:$0xff] %v1156_v57 }
 0x1b7   : > { %1192 = vst [vmem:[%s2617_s3 + $0x68] sm:$0xff] %v1157_v17 }
 0x1b8   : > { %1193 = vst [vmem:[%s2617_s3 + $0x70] sm:$0xff] %v1158_v32 }
 0x1b9   : > { %1194 = vst [vmem:[%s2617_s3 + $0x78] sm:$0xff] %v2618_v0 }
 0x1ba   : > { %1195 = vst [vmem:[%s2617_s3 + $0x80] sm:$0xff] %v2619_v2 }
 0x1bb   : > { %1196 = vst [vmem:[%s2617_s3 + $0x88] sm:$0xff] %v2620_v54 }
 0x1bc   : > { %1197 = vst [vmem:[%s2617_s3 + $0x90] sm:$0xff] %v2621_v10 }
 0x1bd   : > { %1198 = vst [vmem:[%s2617_s3 + $0x98] sm:$0xff] %v2622_v6 }
 0x1be   : > { %1199 = vst [vmem:[%s2617_s3 + $0xa0] sm:$0xff] %v2623_v3 }
 0x1bf   : > { %1200 = vst [vmem:[%s2617_s3 + $0xa8] sm:$0xff] %v2624_v1 }
 0x1c0   : > { %1201 = vst [vmem:[%s2617_s3 + $0xb0] sm:$0xff] %v2625_v7 }
 0x1c1   : > { %1202 = vst [vmem:[%s2617_s3 + $0xb8] sm:$0xff] %v2626_v31 }
 0x1c2   : > { %1203 = vst [vmem:[%s2617_s3 + $0xc0] sm:$0xff] %v2627_v39 }
 0x1c3   : > { %1204 = vst [vmem:[%s2617_s3 + $0xc8] sm:$0xff] %v2628_v41 }
 0x1c4   : > { %1205 = vst [vmem:[%s2617_s3 + $0xd0] sm:$0xff] %v2629_v45 }
 0x1c5   : > { %1206 = vst [vmem:[%s2617_s3 + $0xd8] sm:$0xff] %v2630_v38 }
 0x1c6   : > { %1207 = vst [vmem:[%s2617_s3 + $0xe0] sm:$0xff] %v1172_v51 }
 0x1c7   : > { %1208 = vst [vmem:[%s2617_s3 + $0xe8] sm:$0xff] %v1173_v21 }
 0x1c8   : > { %1209 = vst [vmem:[%s2617_s3 + $0xf0] sm:$0x3] %v1174_v15 }
 0x1c9 PF: > { %p1709_p5 = scmp.le.s32.totalorder %s1848_s13, 0 }
 0x1cb   : > { %1213 = sbr.rel (%p1709_p5) target bundleno = 498 (0x1f2), region = 40 }
 0x1d0   : > { %v1214_v49 = vld [vmem:[%s2617_s3] sm:$0xff]  ;;  %v1215_v5 = vld [vmem:[%s2617_s3 + $0x8] sm:$0xff]  ;;  %v1216_v0 = vld [vmem:[%s2617_s3 + $0x10] sm:$0xff]  ;;  %v2631_v50 = vmax.f32 %v2144_v42, 0.0  ;;  %v2633_v42 = vmax.f32 %v2152_v12, 0.0  ;;  %v2635_v12 = vmax.f32 %v2160_v52, 0.0 }
 0x1d1   : > { %v1245_v2 = vmax.f32 %v1214_v49, %v1144_v28  ;;  %v1246_v54 = vmax.f32 %v1215_v5, %v1145_v46  ;;  %v1247_v10 = vmax.f32 %v1216_v0, %v1146_v58  ;;  %v1217_v6 = vld [vmem:[%s2617_s3 + $0x18] sm:$0xff]  ;;  %v1218_v3 = vld [vmem:[%s2617_s3 + $0x20] sm:$0xff]  ;;  %v1219_v1 = vld [vmem:[%s2617_s3 + $0x28] sm:$0xff]  ;;  %v2637_v52 = vmax.f32 %v2168_v36, 0.0 }
 0x1d2   : > { %v1248_v23 = vmax.f32 %v1217_v6, %v1147_v13  ;;  %v1220_v28 = vld [vmem:[%s2617_s3 + $0x30] sm:$0xff]  ;;  %v1249_v44 = vmax.f32 %v1218_v3, %v1148_v26  ;;  %v1221_v46 = vld [vmem:[%s2617_s3 + $0x38] sm:$0xff]  ;;  %v1250_v53 = vmax.f32 %v1219_v1, %v1149_v47  ;;  %v1222_v58 = vld [vmem:[%s2617_s3 + $0x40] sm:$0xff]  ;;  %v2639_v36 = vmax.f32 %v2176_v25, 0.0 }
 0x1d3   : > { %1276 = vst [vmem:[%s2617_s3] sm:$0xff] %v1245_v2  ;;  %v1251_v11 = vmax.f32 %v1220_v28, %v1150_v61  ;;  %v1223_v13 = vld [vmem:[%s2617_s3 + $0x48] sm:$0xff]  ;;  %v1252_v20 = vmax.f32 %v1221_v46, %v1151_v18  ;;  %v1224_v26 = vld [vmem:[%s2617_s3 + $0x50] sm:$0xff]  ;;  %v1253_v43 = vmax.f32 %v1222_v58, %v1152_v34  ;;  %v1225_v47 = vld [vmem:[%s2617_s3 + $0x58] sm:$0xff]  ;;  %v2641_v25 = vmax.f32 %v2184_v22, 0.0 }
 0x1d4   : > { %1277 = vst [vmem:[%s2617_s3 + $0x8] sm:$0xff] %v1246_v54  ;;  %v1254_v55 = vmax.f32 %v1223_v13, %v1153_v59  ;;  %v1226_v61 = vld [vmem:[%s2617_s3 + $0x60] sm:$0xff]  ;;  %v1255_v16 = vmax.f32 %v1224_v26, %v1154_v9  ;;  %v1227_v18 = vld [vmem:[%s2617_s3 + $0x68] sm:$0xff]  ;;  %v1256_v29 = vmax.f32 %v1225_v47, %v1155_v37  ;;  %v1228_v34 = vld [vmem:[%s2617_s3 + $0x70] sm:$0xff]  ;;  %v2643_v22 = vmax.f32 %v2192_v27, 0.0 }
 0x1d5   : > { %1278 = vst [vmem:[%s2617_s3 + $0x10] sm:$0xff] %v1247_v10  ;;  %v1257_v56 = vmax.f32 %v1226_v61, %v1156_v57  ;;  %v1229_v59 = vld [vmem:[%s2617_s3 + $0x78] sm:$0xff]  ;;  %v1258_v4 = vmax.f32 %v1227_v18, %v1157_v17  ;;  %v1230_v9 = vld [vmem:[%s2617_s3 + $0x80] sm:$0xff]  ;;  %v1259_v35 = vmax.f32 %v1228_v34, %v1158_v32  ;;  %v1231_v37 = vld [vmem:[%s2617_s3 + $0x88] sm:$0xff]  ;;  %v2632_v17 = vmax.f32 %v2148_v63, 0.0 }
 0x1d6   : > { %1279 = vst [vmem:[%s2617_s3 + $0x18] sm:$0xff] %v1248_v23  ;;  %v1260_v57 = vmax.f32 %v1229_v59, %v2631_v50  ;;  %v1232_v14 = vld [vmem:[%s2617_s3 + $0x90] sm:$0xff]  ;;  %v1233_v32 = vld [vmem:[%s2617_s3 + $0x98] sm:$0xff]  ;;  %v1262_v7 = vmax.f32 %v1231_v37, %v2633_v42  ;;  %v1234_v31 = vld [vmem:[%s2617_s3 + $0xa0] sm:$0xff]  ;;  %v2634_v63 = vmax.f32 %v2156_v33, 0.0  ;;  %v2636_v33 = vmax.f32 %v2164_v8, 0.0 }
 0x1d7   : > { %1280 = vst [vmem:[%s2617_s3 + $0x20] sm:$0xff] %v1249_v44  ;;  %v1261_v30 = vmax.f32 %v1230_v9, %v2632_v17  ;;  %v1235_v41 = vld [vmem:[%s2617_s3 + $0xa8] sm:$0xff]  ;;  %v1264_v45 = vmax.f32 %v1233_v32, %v2635_v12  ;;  %v1236_v38 = vld [vmem:[%s2617_s3 + $0xb0] sm:$0xff]  ;;  %v1237_v5 = vld [vmem:[%s2617_s3 + $0xb8] sm:$0xff]  ;;  %v2638_v8 = vmax.f32 %v2171_v62, 0.0  ;;  %v2640_v62 = vmax.f32 %v2179_v40, 0.0 }
 0x1d8   : > { %1281 = vst [vmem:[%s2617_s3 + $0x28] sm:$0xff] %v1250_v53  ;;  %v1263_v39 = vmax.f32 %v1232_v14, %v2634_v63  ;;  %v1265_v49 = vmax.f32 %v1234_v31, %v2636_v33  ;;  %v1266_v0 = vmax.f32 %v1235_v41, %v2637_v52  ;;  %v1238_v2 = vld [vmem:[%s2617_s3 + $0xc0] sm:$0xff]  ;;  %v1239_v10 = vld [vmem:[%s2617_s3 + $0xc8] sm:$0xff]  ;;  %v1268_v6 = vmax.f32 %v1237_v5, %v2639_v36  ;;  %v1240_v3 = vld [vmem:[%s2617_s3 + $0xd0] sm:$0xff] }
 0x1d9   : > { %1282 = vst [vmem:[%s2617_s3 + $0x30] sm:$0xff] %v1251_v11  ;;  %v1267_v54 = vmax.f32 %v1236_v38, %v2638_v8  ;;  %v1269_v1 = vmax.f32 %v1238_v2, %v2640_v62  ;;  %v1241_v23 = vld [vmem:[%s2617_s3 + $0xd8] sm:$0xff]  ;;  %v1270_v28 = vmax.f32 %v1239_v10, %v2641_v25  ;;  %v1242_v44 = vld [vmem:[%s2617_s3 + $0xe0] sm:$0xff]  ;;  %v2642_v40 = vmax.f32 %v2187_v60, 0.0  ;;  %v1243_v53 = vld [vmem:[%s2617_s3 + $0xe8] sm:$0xff] }
 0x1da   : > { %1283 = vst [vmem:[%s2617_s3 + $0x38] sm:$0xff] %v1252_v20  ;;  %v1272_v58 = vmax.f32 %v1241_v23, %v2643_v22  ;;  %v1244_v11 = vld [vmem:[%s2617_s3 + $0xf0] sm:$0x3]  ;;  %v1273_v60 = vmax.f32 %v1242_v44, %v1172_v51  ;;  %v1274_v13 = vmax.f32 %v1243_v53, %v1173_v21 }
 0x1db   : > { %1284 = vst [vmem:[%s2617_s3 + $0x40] sm:$0xff] %v1253_v43  ;;  %v1271_v46 = vmax.f32 %v1240_v3, %v2642_v40  ;;  %v1275_v27 = vmax.f32 %v1244_v11, %v1174_v15 }
 0x1dc   : > { %1285 = vst [vmem:[%s2617_s3 + $0x48] sm:$0xff] %v1254_v55 }
 0x1dd   : > { %1286 = vst [vmem:[%s2617_s3 + $0x50] sm:$0xff] %v1255_v16 }
 0x1de   : > { %1287 = vst [vmem:[%s2617_s3 + $0x58] sm:$0xff] %v1256_v29 }
 0x1df   : > { %1288 = vst [vmem:[%s2617_s3 + $0x60] sm:$0xff] %v1257_v56 }
 0x1e0   : > { %1289 = vst [vmem:[%s2617_s3 + $0x68] sm:$0xff] %v1258_v4 }
 0x1e1   : > { %1290 = vst [vmem:[%s2617_s3 + $0x70] sm:$0xff] %v1259_v35 }
 0x1e2   : > { %1291 = vst [vmem:[%s2617_s3 + $0x78] sm:$0xff] %v1260_v57 }
 0x1e3   : > { %1292 = vst [vmem:[%s2617_s3 + $0x80] sm:$0xff] %v1261_v30 }
 0x1e4   : > { %1293 = vst [vmem:[%s2617_s3 + $0x88] sm:$0xff] %v1262_v7 }
 0x1e5   : > { %1294 = vst [vmem:[%s2617_s3 + $0x90] sm:$0xff] %v1263_v39 }
 0x1e6   : > { %1295 = vst [vmem:[%s2617_s3 + $0x98] sm:$0xff] %v1264_v45 }
 0x1e7   : > { %1296 = vst [vmem:[%s2617_s3 + $0xa0] sm:$0xff] %v1265_v49 }
 0x1e8   : > { %1297 = vst [vmem:[%s2617_s3 + $0xa8] sm:$0xff] %v1266_v0 }
 0x1e9   : > { %1298 = vst [vmem:[%s2617_s3 + $0xb0] sm:$0xff] %v1267_v54 }
 0x1ea   : > { %1299 = vst [vmem:[%s2617_s3 + $0xb8] sm:$0xff] %v1268_v6 }
 0x1eb   : > { %1300 = vst [vmem:[%s2617_s3 + $0xc0] sm:$0xff] %v1269_v1 }
 0x1ec   : > { %1301 = vst [vmem:[%s2617_s3 + $0xc8] sm:$0xff] %v1270_v28 }
 0x1ed   : > { %1302 = vst [vmem:[%s2617_s3 + $0xd0] sm:$0xff] %v1271_v46 }
 0x1ee   : > { %1303 = vst [vmem:[%s2617_s3 + $0xd8] sm:$0xff] %v1272_v58 }
 0x1ef   : > { %1304 = vst [vmem:[%s2617_s3 + $0xe0] sm:$0xff] %v1273_v60 }
 0x1f0   : > { %1305 = vst [vmem:[%s2617_s3 + $0xe8] sm:$0xff] %v1274_v13 }
 0x1f1   : > { %1306 = vst [vmem:[%s2617_s3 + $0xf0] sm:$0x3] %v1275_v27 }
 0x1f2 PF: > { %s13_s12 = sadd.s32 1, %s1820_s12  }
 0x1f3   : > { %p10_p6 = scmp.ge.s32.totalorder %s13_s12, 6  }
 0x1f5   :  { %12 = sbr.rel (!%p10_p6) target bundleno = 1 (0x1), region = 66 }

// kernel: cnn_forward.5
= control target key start
LH: loop header
LB: loop body
LE: loop exit
PB: predicated region body
PF: predicated region fallthrough
CT: control target
= control target key end

     0   :  { %s4568_s0 = inlined_call_operand.vmem [shape: bf16[2,3872], index: 0, kind: input, shape index: {}]   ;;  %s4569_s1 = inlined_call_operand.vmem [shape: bf16[3872,128], index: 1, kind: input, shape index: {}]   ;;  %s4570_s2 = inlined_call_operand.vmem [shape: f32[1,128], index: 2, kind: input, shape index: {}]   ;;  %s4571_s3 = inlined_call_operand.vmem [shape: f32[128,128], index: 3, kind: input, shape index: {}]   ;;  %s4572_s4 = inlined_call_operand.vmem [shape: f32[1,128], index: 4, kind: input, shape index: {}]   ;;  %s4573_s5 = inlined_call_operand.hbm [shape: f32[2,128], index: 5, kind: output, shape index: {}]  }
   0x1   :  { %v3475_v0 = vld [vmem:[%s4569_s1 + $0x38] sm:$0xff]  ;;  %v3474_v4 = vld [vmem:[%s4569_s1 + $0x30] sm:$0xff]  ;;  %v3473_v8 = vld [vmem:[%s4569_s1 + $0x28] sm:$0xff] }
   0x2   :  { %v3483_v1 = vld [vmem:[%s4569_s1 + $0x78] sm:$0xff]  ;;  %2038 = vmatpush.bf16.msra.mxu0 %v3475_v0  ;;  %v3482_v5 = vld [vmem:[%s4569_s1 + $0x70] sm:$0xff]  ;;  %v3481_v9 = vld [vmem:[%s4569_s1 + $0x68] sm:$0xff] }
   0x3   :  { %v3491_v2 = vld [vmem:[%s4569_s1 + $0xb8] sm:$0xff]  ;;  %2051 = vmatpush.bf16.msra.mxu1 %v3483_v1  ;;  %v3490_v6 = vld [vmem:[%s4569_s1 + $0xb0] sm:$0xff]  ;;  %v3489_v10 = vld [vmem:[%s4569_s1 + $0xa8] sm:$0xff] }
   0x4   :  { %v3499_v3 = vld [vmem:[%s4569_s1 + $0xf8] sm:$0xff]  ;;  %2064 = vmatpush.bf16.msra.mxu2 %v3491_v2  ;;  %v3498_v7 = vld [vmem:[%s4569_s1 + $0xf0] sm:$0xff]  ;;  %v3497_v11 = vld [vmem:[%s4569_s1 + $0xe8] sm:$0xff] }
   0x5   :  { %2077 = vmatpush.bf16.msra.mxu3 %v3499_v3  ;;  %v3472_v12 = vld [vmem:[%s4569_s1 + $0x20] sm:$0xff]  ;;  %v3471_v16 = vld [vmem:[%s4569_s1 + $0x18] sm:$0xff]  ;;  %v3470_v21 = vld [vmem:[%s4569_s1 + $0x10] sm:$0xff] }
   0x6   :  { %2039 = vmatpush.bf16.msra.mxu0 %v3474_v4  ;;  %v3480_v13 = vld [vmem:[%s4569_s1 + $0x60] sm:$0xff]  ;;  %v3479_v17 = vld [vmem:[%s4569_s1 + $0x58] sm:$0xff]  ;;  %v3478_v22 = vld [vmem:[%s4569_s1 + $0x50] sm:$0xff] }
   0x7   :  { %2052 = vmatpush.bf16.msra.mxu1 %v3482_v5  ;;  %v3488_v14 = vld [vmem:[%s4569_s1 + $0xa0] sm:$0xff]  ;;  %v3487_v18 = vld [vmem:[%s4569_s1 + $0x98] sm:$0xff]  ;;  %v3486_v23 = vld [vmem:[%s4569_s1 + $0x90] sm:$0xff] }
   0x8   :  { %2065 = vmatpush.bf16.msra.mxu2 %v3490_v6  ;;  %v3496_v15 = vld [vmem:[%s4569_s1 + $0xe0] sm:$0xff]  ;;  %v3495_v19 = vld [vmem:[%s4569_s1 + $0xd8] sm:$0xff]  ;;  %v3494_v24 = vld [vmem:[%s4569_s1 + $0xd0] sm:$0xff] }
   0x9   :  { %2078 = vmatpush.bf16.msra.mxu3 %v3498_v7  ;;  %v22_v20 = vld [vmem:[%s4568_s0] sm:$0xff] }
   0xa   :  { %2040 = vmatpush.bf16.msra.mxu0 %v3473_v8  ;;  %515 = vst [vmem:[#allocation1] ss:$9 sm:$0xff] %v22_v20 }
   0xb   :  { %2053 = vmatpush.bf16.msra.mxu1 %v3481_v9 }
   0xc   :  { %2066 = vmatpush.bf16.msra.mxu2 %v3489_v10 }
   0xd   :  { %2079 = vmatpush.bf16.msra.mxu3 %v3497_v11 }
   0xe   :  { %2041 = vmatpush.bf16.msra.mxu0 %v3472_v12 }
   0xf   :  { %2054 = vmatpush.bf16.msra.mxu1 %v3480_v13 }
  0x10   :  { %2067 = vmatpush.bf16.msra.mxu2 %v3488_v14 }
  0x11   :  { %2080 = vmatpush.bf16.msra.mxu3 %v3496_v15 }
  0x12   :  { %2042 = vmatpush.bf16.msra.mxu0 %v3471_v16 }
  0x13   :  { %2055 = vmatpush.bf16.msra.mxu1 %v3479_v17 }
  0x14   :  { %2068 = vmatpush.bf16.msra.mxu2 %v3487_v18 }
  0x15   :  { %2081 = vmatpush.bf16.msra.mxu3 %v3495_v19 }
  0x16   :  { %10 = vsyncpa [#allocation3], 0  ;;  %2043 = vmatpush.bf16.msra.mxu0 %v3470_v21  ;;  %v3469_v25 = vld [vmem:[%s4569_s1 + $0x8] sm:$0xff]  ;;  %v3468_v29 = vld [vmem:[%s4569_s1] sm:$0xff]  ;;  %vm2035_vm0 = vcmask 261120   ;;  %s3739_s6 = smov [#allocation2]  }
  0x17   :  { %2056 = vmatpush.bf16.msra.mxu1 %v3478_v22  ;;  %v3477_v26 = vld [vmem:[%s4569_s1 + $0x48] sm:$0xff]  ;;  %v3476_v30 = vld [vmem:[%s4569_s1 + $0x40] sm:$0xff]  ;;  %v3507_v32 = vld [vmem:[%s4569_s1 + $0x138] sm:$0xff]  ;;  %s2490_s9 = sshll.u32 %s4573_s5, 4  ;;  %s2491_s9 = int_to_ptr.hbm [resolvable:$true] %s2490_s9 }
  0x18   :  { %2069 = vmatpush.bf16.msra.mxu2 %v3486_v23  ;;  %v3485_v27 = vld [vmem:[%s4569_s1 + $0x88] sm:$0xff]  ;;  %v3484_v31 = vld [vmem:[%s4569_s1 + $0x80] sm:$0xff]  ;;  %v3515_v33 = vld [vmem:[%s4569_s1 + $0x178] sm:$0xff] }
  0x19   :  { %2082 = vmatpush.bf16.msra.mxu3 %v3494_v24  ;;  %v3493_v28 = vld [vmem:[%s4569_s1 + $0xc8] sm:$0xff]  ;;  %v3523_v34 = vld [vmem:[%s4569_s1 + $0x1b8] sm:$0xff]  ;;  %v3492_v35 = vld [vmem:[%s4569_s1 + $0xc0] sm:$0xff] }
  0x1a   :  { %2044 = vmatpush.bf16.msra.mxu0 %v3469_v25  ;;  %v3531_v36 = vld [vmem:[%s4569_s1 + $0x1f8] sm:$0xff]  ;;  %v516_v37 = vld [vmem:[#allocation1] sm:$0xff]  ;;  %v3506_v38 = vld [vmem:[%s4569_s1 + $0x130] sm:$0xff] }
  0x1b   :  { %2057 = vmatpush.bf16.msra.mxu1 %v3477_v26  ;;  %v518_v39 = vld [vmem:[#allocation1 + $0x12] sm:$0xff]  ;;  %v517_v42 = vld [vmem:[#allocation1 + $0x9] sm:$0xff]  ;;  %v519_v44 = vld [vmem:[#allocation1 + $0x1b] sm:$0xff] }
  0x1c   :  { %2070 = vmatpush.bf16.msra.mxu2 %v3485_v27  ;;  %v3514_v40 = vld [vmem:[%s4569_s1 + $0x170] sm:$0xff]  ;;  %v3505_v45 = vld [vmem:[%s4569_s1 + $0x128] sm:$0xff]  ;;  %v3905_v51 = vld [vmem:[#allocation1 + $0x3f] sm:$0xff] }
  0x1d   :  { %2083 = vmatpush.bf16.msra.mxu3 %v3493_v28  ;;  %v3522_v41 = vld [vmem:[%s4569_s1 + $0x1b0] sm:$0xff]  ;;  %v3513_v46 = vld [vmem:[%s4569_s1 + $0x168] sm:$0xff]  ;;  %v3504_v54 = vld [vmem:[%s4569_s1 + $0x120] sm:$0xff] }
  0x1e   :  { %2045 = vmatpush.bf16.msra.mxu0 %v3468_v29  ;;  %v3530_v43 = vld [vmem:[%s4569_s1 + $0x1f0] sm:$0xff]  ;;  %v3521_v47 = vld [vmem:[%s4569_s1 + $0x1a8] sm:$0xff]  ;;  %v3512_v55 = vld [vmem:[%s4569_s1 + $0x160] sm:$0xff] }
  0x1f   :  { %2058 = vmatpush.bf16.msra.mxu1 %v3476_v30  ;;  %v3529_v48 = vld [vmem:[%s4569_s1 + $0x1e8] sm:$0xff]  ;;  %v522_v49 = vld [vmem:[#allocation1 + $0x36] sm:$0xff]  ;;  %v3520_v56 = vld [vmem:[%s4569_s1 + $0x1a0] sm:$0xff] }
  0x20   :  { %2071 = vmatpush.bf16.msra.mxu2 %v3484_v31  ;;  %v520_v50 = vld [vmem:[#allocation1 + $0x24] sm:$0xff]  ;;  %v521_v53 = vld [vmem:[#allocation1 + $0x2d] sm:$0xff]  ;;  %v3503_v58 = vld [vmem:[%s4569_s1 + $0x118] sm:$0xff] }
  0x21   :  { %2084 = vmatpush.bf16.msra.mxu3 %v3492_v35  ;;  %2046 = vmatmul.bf16.vlgmr.msra.gmra.mxu0 %v516_v37  ;;  %v23_v52 = vld [vmem:[%s4568_s0 + $0x8] sm:$0xff]  ;;  %v3528_v57 = vld [vmem:[%s4569_s1 + $0x1e0] sm:$0xff]  ;;  %v3511_v59 = vld [vmem:[%s4569_s1 + $0x158] sm:$0xff] }
  0x22   :  { %2090 = vmatpush.bf16.msrb.mxu0 %v3507_v32  ;;  %2059 = vmatmul.bf16.vlgmr.msra.gmra.mxu1 %v517_v42  ;;  %525 = vst [vmem:[#allocation1] ss:$9 sm:$0xff] %v23_v52  ;;  %v3519_v60 = vld [vmem:[%s4569_s1 + $0x198] sm:$0xff]  ;;  %v3502_v62 = vld [vmem:[%s4569_s1 + $0x110] sm:$0xff]  ;;  %v3501_v2 = vld [vmem:[%s4569_s1 + $0x108] sm:$0xff] }
  0x23   :  { %2103 = vmatpush.bf16.msrb.mxu1 %v3515_v33  ;;  %2072 = vmatmul.bf16.vlgmr.msra.gmra.mxu2 %v518_v39  ;;  %v3527_v61 = vld [vmem:[%s4569_s1 + $0x1d8] sm:$0xff]  ;;  %v3510_v63 = vld [vmem:[%s4569_s1 + $0x150] sm:$0xff]  ;;  %v3509_v3 = vld [vmem:[%s4569_s1 + $0x148] sm:$0xff] }
  0x24   :  { %2116 = vmatpush.bf16.msrb.mxu2 %v3523_v34  ;;  %2085 = vmatmul.bf16.vlgmr.msra.gmra.mxu3 %v519_v44  ;;  %v3518_v0 = vld [vmem:[%s4569_s1 + $0x190] sm:$0xff]  ;;  %v3517_v4 = vld [vmem:[%s4569_s1 + $0x188] sm:$0xff]  ;;  %v3500_v6 = vld [vmem:[%s4569_s1 + $0x100] sm:$0xff] }
  0x25   :  { %2129 = vmatpush.bf16.msrb.mxu3 %v3531_v36  ;;  %v3526_v1 = vld [vmem:[%s4569_s1 + $0x1d0] sm:$0xff]  ;;  %v3525_v5 = vld [vmem:[%s4569_s1 + $0x1c8] sm:$0xff]  ;;  %v3508_v7 = vld [vmem:[%s4569_s1 + $0x140] sm:$0xff] }
  0x26   :  { %2091 = vmatpush.bf16.msrb.mxu0 %v3506_v38  ;;  %v3516_v8 = vld [vmem:[%s4569_s1 + $0x180] sm:$0xff]  ;;  %v3539_v9 = vld [vmem:[%s4569_s1 + $0x238] sm:$0xff]  ;;  %v3538_v14 = vld [vmem:[%s4569_s1 + $0x230] sm:$0xff] }
  0x27   :  { %2104 = vmatpush.bf16.msrb.mxu1 %v3514_v40  ;;  %v3547_v10 = vld [vmem:[%s4569_s1 + $0x278] sm:$0xff]  ;;  %v3524_v12 = vld [vmem:[%s4569_s1 + $0x1c0] sm:$0xff]  ;;  %v3546_v15 = vld [vmem:[%s4569_s1 + $0x270] sm:$0xff] }
  0x28   :  { %2117 = vmatpush.bf16.msrb.mxu2 %v3522_v41  ;;  %v3555_v11 = vld [vmem:[%s4569_s1 + $0x2b8] sm:$0xff]  ;;  %v3554_v16 = vld [vmem:[%s4569_s1 + $0x2b0] sm:$0xff]  ;;  %v3537_v18 = vld [vmem:[%s4569_s1 + $0x228] sm:$0xff] }
  0x29   :  { %2130 = vmatpush.bf16.msrb.mxu3 %v3530_v43  ;;  %v3563_v13 = vld [vmem:[%s4569_s1 + $0x2f8] sm:$0xff]  ;;  %v3562_v17 = vld [vmem:[%s4569_s1 + $0x2f0] sm:$0xff]  ;;  %v3545_v19 = vld [vmem:[%s4569_s1 + $0x268] sm:$0xff] }
  0x2a   :  { %2092 = vmatpush.bf16.msrb.mxu0 %v3505_v45  ;;  %v3553_v20 = vld [vmem:[%s4569_s1 + $0x2a8] sm:$0xff]  ;;  %v3536_v22 = vld [vmem:[%s4569_s1 + $0x220] sm:$0xff]  ;;  %v3535_v26 = vld [vmem:[%s4569_s1 + $0x218] sm:$0xff] }
  0x2b   :  { %2105 = vmatpush.bf16.msrb.mxu1 %v3513_v46  ;;  %v3561_v21 = vld [vmem:[%s4569_s1 + $0x2e8] sm:$0xff]  ;;  %v3544_v23 = vld [vmem:[%s4569_s1 + $0x260] sm:$0xff]  ;;  %v3543_v27 = vld [vmem:[%s4569_s1 + $0x258] sm:$0xff] }
  0x2c   :  { %2118 = vmatpush.bf16.msrb.mxu2 %v3521_v47  ;;  %v3552_v24 = vld [vmem:[%s4569_s1 + $0x2a0] sm:$0xff]  ;;  %v3551_v28 = vld [vmem:[%s4569_s1 + $0x298] sm:$0xff]  ;;  %v3534_v30 = vld [vmem:[%s4569_s1 + $0x210] sm:$0xff] }
  0x2d   :  { %2131 = vmatpush.bf16.msrb.mxu3 %v3529_v48  ;;  %v3560_v25 = vld [vmem:[%s4569_s1 + $0x2e0] sm:$0xff]  ;;  %v3559_v29 = vld [vmem:[%s4569_s1 + $0x2d8] sm:$0xff]  ;;  %v3542_v31 = vld [vmem:[%s4569_s1 + $0x250] sm:$0xff] }
  0x2e   :  { %2093 = vmatpush.bf16.msrb.mxu0 %v3504_v54  ;;  %v3550_v32 = vld [vmem:[%s4569_s1 + $0x290] sm:$0xff]  ;;  %v3533_v34 = vld [vmem:[%s4569_s1 + $0x208] sm:$0xff]  ;;  %v3532_v38 = vld [vmem:[%s4569_s1 + $0x200] sm:$0xff] }
  0x2f   :  { %2106 = vmatpush.bf16.msrb.mxu1 %v3512_v55  ;;  %v3558_v33 = vld [vmem:[%s4569_s1 + $0x2d0] sm:$0xff]  ;;  %v3541_v35 = vld [vmem:[%s4569_s1 + $0x248] sm:$0xff]  ;;  %v3540_v39 = vld [vmem:[%s4569_s1 + $0x240] sm:$0xff] }
  0x30   :  { %2119 = vmatpush.bf16.msrb.mxu2 %v3520_v56  ;;  %v3549_v36 = vld [vmem:[%s4569_s1 + $0x288] sm:$0xff]  ;;  %v3548_v40 = vld [vmem:[%s4569_s1 + $0x280] sm:$0xff]  ;;  %v3571_v41 = vld [vmem:[%s4569_s1 + $0x338] sm:$0xff] }
  0x31   :  { %2132 = vmatpush.bf16.msrb.mxu3 %v3528_v57  ;;  %v3557_v37 = vld [vmem:[%s4569_s1 + $0x2c8] sm:$0xff]  ;;  %v3579_v42 = vld [vmem:[%s4569_s1 + $0x378] sm:$0xff]  ;;  %v3556_v44 = vld [vmem:[%s4569_s1 + $0x2c0] sm:$0xff] }
  0x32   :  { %2094 = vmatpush.bf16.msrb.mxu0 %v3503_v58  ;;  %v3587_v43 = vld [vmem:[%s4569_s1 + $0x3b8] sm:$0xff]  ;;  %v526_v45 = vld [vmem:[#allocation1] sm:$0xff]  ;;  %v3570_v48 = vld [vmem:[%s4569_s1 + $0x330] sm:$0xff] }
  0x33   :  { %2107 = vmatpush.bf16.msrb.mxu1 %v3511_v59  ;;  %v3595_v46 = vld [vmem:[%s4569_s1 + $0x3f8] sm:$0xff]  ;;  %v3586_v52 = vld [vmem:[%s4569_s1 + $0x3b0] sm:$0xff]  ;;  %v3569_v54 = vld [vmem:[%s4569_s1 + $0x328] sm:$0xff] }
  0x34   :  { %2120 = vmatpush.bf16.msrb.mxu2 %v3519_v60  ;;  %v528_v47 = vld [vmem:[#allocation1 + $0x12] sm:$0xff]  ;;  %v3577_v55 = vld [vmem:[%s4569_s1 + $0x368] sm:$0xff]  ;;  %v3568_v58 = vld [vmem:[%s4569_s1 + $0x320] sm:$0xff] }
  0x35   :  { %2133 = vmatpush.bf16.msrb.mxu3 %v3527_v61  ;;  %v3585_v56 = vld [vmem:[%s4569_s1 + $0x3a8] sm:$0xff]  ;;  %v3576_v59 = vld [vmem:[%s4569_s1 + $0x360] sm:$0xff] }
  0x36   :  { %2095 = vmatpush.bf16.msrb.mxu0 %v3502_v62  ;;  %v3593_v57 = vld [vmem:[%s4569_s1 + $0x3e8] sm:$0xff]  ;;  %v3584_v60 = vld [vmem:[%s4569_s1 + $0x3a0] sm:$0xff]  ;;  %v3567_v62 = vld [vmem:[%s4569_s1 + $0x318] sm:$0xff] }
  0x37   :  { %2108 = vmatpush.bf16.msrb.mxu1 %v3510_v63  ;;  %v3592_v61 = vld [vmem:[%s4569_s1 + $0x3e0] sm:$0xff]  ;;  %v3575_v63 = vld [vmem:[%s4569_s1 + $0x358] sm:$0xff] }
  0x38   :  { %2121 = vmatpush.bf16.msrb.mxu2 %v3518_v0  ;;  %v3583_v0 = vld [vmem:[%s4569_s1 + $0x398] sm:$0xff] }
  0x39   :  { %2134 = vmatpush.bf16.msrb.mxu3 %v3526_v1  ;;  %v3591_v1 = vld [vmem:[%s4569_s1 + $0x3d8] sm:$0xff] }
  0x3a   :  { %2096 = vmatpush.bf16.msrb.mxu0 %v3501_v2  ;;  %v3566_v2 = vld [vmem:[%s4569_s1 + $0x310] sm:$0xff] }
  0x3b   :  { %2109 = vmatpush.bf16.msrb.mxu1 %v3509_v3  ;;  %v3574_v3 = vld [vmem:[%s4569_s1 + $0x350] sm:$0xff] }
  0x3c   :  { %2122 = vmatpush.bf16.msrb.mxu2 %v3517_v4  ;;  %v3582_v4 = vld [vmem:[%s4569_s1 + $0x390] sm:$0xff] }
  0x3d   :  { %2135 = vmatpush.bf16.msrb.mxu3 %v3525_v5  ;;  %v3590_v5 = vld [vmem:[%s4569_s1 + $0x3d0] sm:$0xff] }
  0x3e   :  { %2097 = vmatpush.bf16.msrb.mxu0 %v3500_v6  ;;  %v3565_v6 = vld [vmem:[%s4569_s1 + $0x308] sm:$0xff] }
  0x3f   :  { %2110 = vmatpush.bf16.msrb.mxu1 %v3508_v7  ;;  %v3573_v7 = vld [vmem:[%s4569_s1 + $0x348] sm:$0xff] }
  0x40   :  { %2123 = vmatpush.bf16.msrb.mxu2 %v3516_v8  ;;  %v3581_v8 = vld [vmem:[%s4569_s1 + $0x388] sm:$0xff] }
  0x41   :  { %2136 = vmatpush.bf16.msrb.mxu3 %v3524_v12  ;;  %2098 = vmatmul.bf16.vlgmr.msrb.gmra.mxu0 %v520_v50  ;;  %v3578_v50 = vld [vmem:[%s4569_s1 + $0x370] sm:$0xff]  ;;  %v533_v12 = vld [vmem:[#allocation1 + $0x3f] sm:$0xff] }
  0x42   :  { %2142 = vmatpush.bf16.msra.mxu0 %v3539_v9  ;;  %2111 = vmatmul.bf16.vlgmr.msrb.gmra.mxu1 %v521_v53  ;;  %v3594_v53 = vld [vmem:[%s4569_s1 + $0x3f0] sm:$0xff]  ;;  %v530_v9 = vld [vmem:[#allocation1 + $0x24] sm:$0xff] }
  0x43   :  { %2155 = vmatpush.bf16.msra.mxu1 %v3547_v10  ;;  %2124 = vmatmul.bf16.vlgmr.msrb.gmra.mxu2 %v522_v49  ;;  %v527_v49 = vld [vmem:[#allocation1 + $0x9] sm:$0xff]  ;;  %v532_v10 = vld [vmem:[#allocation1 + $0x36] sm:$0xff] }
  0x44   :  { %2168 = vmatpush.bf16.msra.mxu2 %v3555_v11  ;;  %2137 = vmatmul.bf16.vlgmr.msrb.gmra.mxu3 %v3905_v51  ;;  %v529_v51 = vld [vmem:[#allocation1 + $0x1b] sm:$0xff]  ;;  %v531_v11 = vld [vmem:[#allocation1 + $0x2d] sm:$0xff] }
  0x45   :  { %2181 = vmatpush.bf16.msra.mxu3 %v3563_v13  ;;  %v24_v13 = vld [vmem:[%s4568_s0 + $0x10] sm:$0xff] }
  0x46   :  { %2143 = vmatpush.bf16.msra.mxu0 %v3538_v14  ;;  %v3589_v14 = vld [vmem:[%s4569_s1 + $0x3c8] sm:$0xff]  ;;  %535 = vst [vmem:[#allocation1] ss:$9 sm:$0xff] %v24_v13  ;;  %v3639_v13 = vld [vmem:[%s4569_s1 + $0x558] sm:$0xff] }
  0x47   :  { %2156 = vmatpush.bf16.msra.mxu1 %v3546_v15  ;;  %v3564_v15 = vld [vmem:[%s4569_s1 + $0x300] sm:$0xff] }
  0x48   :  { %2169 = vmatpush.bf16.msra.mxu2 %v3554_v16  ;;  %v3572_v16 = vld [vmem:[%s4569_s1 + $0x340] sm:$0xff] }
  0x49   :  { %2182 = vmatpush.bf16.msra.mxu3 %v3562_v17  ;;  %v3603_v17 = vld [vmem:[%s4569_s1 + $0x438] sm:$0xff] }
  0x4a   :  { %2144 = vmatpush.bf16.msra.mxu0 %v3537_v18  ;;  %v3580_v18 = vld [vmem:[%s4569_s1 + $0x380] sm:$0xff] }
  0x4b   :  { %2157 = vmatpush.bf16.msra.mxu1 %v3545_v19  ;;  %v3611_v19 = vld [vmem:[%s4569_s1 + $0x478] sm:$0xff] }
  0x4c   :  { %2170 = vmatpush.bf16.msra.mxu2 %v3553_v20  ;;  %v3619_v20 = vld [vmem:[%s4569_s1 + $0x4b8] sm:$0xff] }
  0x4d   :  { %2183 = vmatpush.bf16.msra.mxu3 %v3561_v21  ;;  %v3588_v21 = vld [vmem:[%s4569_s1 + $0x3c0] sm:$0xff] }
  0x4e   :  { %2145 = vmatpush.bf16.msra.mxu0 %v3536_v22  ;;  %v3627_v22 = vld [vmem:[%s4569_s1 + $0x4f8] sm:$0xff] }
  0x4f   :  { %2158 = vmatpush.bf16.msra.mxu1 %v3544_v23  ;;  %v3602_v23 = vld [vmem:[%s4569_s1 + $0x430] sm:$0xff] }
  0x50   :  { %2171 = vmatpush.bf16.msra.mxu2 %v3552_v24  ;;  %v3610_v24 = vld [vmem:[%s4569_s1 + $0x470] sm:$0xff] }
  0x51   :  { %2184 = vmatpush.bf16.msra.mxu3 %v3560_v25  ;;  %v3618_v25 = vld [vmem:[%s4569_s1 + $0x4b0] sm:$0xff] }
  0x52   :  { %2146 = vmatpush.bf16.msra.mxu0 %v3535_v26  ;;  %v3626_v26 = vld [vmem:[%s4569_s1 + $0x4f0] sm:$0xff] }
  0x53   :  { %2159 = vmatpush.bf16.msra.mxu1 %v3543_v27  ;;  %v3601_v27 = vld [vmem:[%s4569_s1 + $0x428] sm:$0xff] }
  0x54   :  { %2172 = vmatpush.bf16.msra.mxu2 %v3551_v28  ;;  %v3609_v28 = vld [vmem:[%s4569_s1 + $0x468] sm:$0xff] }
  0x55   :  { %2185 = vmatpush.bf16.msra.mxu3 %v3559_v29  ;;  %v3617_v29 = vld [vmem:[%s4569_s1 + $0x4a8] sm:$0xff] }
  0x56   :  { %2147 = vmatpush.bf16.msra.mxu0 %v3534_v30  ;;  %v3625_v30 = vld [vmem:[%s4569_s1 + $0x4e8] sm:$0xff] }
  0x57   :  { %2160 = vmatpush.bf16.msra.mxu1 %v3542_v31  ;;  %v3600_v31 = vld [vmem:[%s4569_s1 + $0x420] sm:$0xff] }
  0x58   :  { %2173 = vmatpush.bf16.msra.mxu2 %v3550_v32  ;;  %v3608_v32 = vld [vmem:[%s4569_s1 + $0x460] sm:$0xff] }
  0x59   :  { %2186 = vmatpush.bf16.msra.mxu3 %v3558_v33  ;;  %v3616_v33 = vld [vmem:[%s4569_s1 + $0x4a0] sm:$0xff] }
  0x5a   :  { %2148 = vmatpush.bf16.msra.mxu0 %v3533_v34  ;;  %v3624_v34 = vld [vmem:[%s4569_s1 + $0x4e0] sm:$0xff] }
  0x5b   :  { %2161 = vmatpush.bf16.msra.mxu1 %v3541_v35  ;;  %v3599_v35 = vld [vmem:[%s4569_s1 + $0x418] sm:$0xff] }
  0x5c   :  { %2174 = vmatpush.bf16.msra.mxu2 %v3549_v36  ;;  %v3607_v36 = vld [vmem:[%s4569_s1 + $0x458] sm:$0xff] }
  0x5d   :  { %2187 = vmatpush.bf16.msra.mxu3 %v3557_v37  ;;  %v3615_v37 = vld [vmem:[%s4569_s1 + $0x498] sm:$0xff] }
  0x5e   :  { %2149 = vmatpush.bf16.msra.mxu0 %v3532_v38  ;;  %v3623_v38 = vld [vmem:[%s4569_s1 + $0x4d8] sm:$0xff] }
  0x5f   :  { %2162 = vmatpush.bf16.msra.mxu1 %v3540_v39  ;;  %v3598_v39 = vld [vmem:[%s4569_s1 + $0x410] sm:$0xff] }
  0x60   :  { %2175 = vmatpush.bf16.msra.mxu2 %v3548_v40  ;;  %v3606_v40 = vld [vmem:[%s4569_s1 + $0x450] sm:$0xff] }
  0x61   :  { %2188 = vmatpush.bf16.msra.mxu3 %v3556_v44  ;;  %2150 = vmatmul.bf16.vlgmr.msra.gmra.mxu0 %v526_v45  ;;  %v3605_v44 = vld [vmem:[%s4569_s1 + $0x448] sm:$0xff] }
  0x62   :  { %2194 = vmatpush.bf16.msrb.mxu0 %v3571_v41  ;;  %2163 = vmatmul.bf16.vlgmr.msra.gmra.mxu1 %v527_v49  ;;  %v3614_v41 = vld [vmem:[%s4569_s1 + $0x490] sm:$0xff]  ;;  %v3613_v45 = vld [vmem:[%s4569_s1 + $0x488] sm:$0xff]  ;;  %v3612_v49 = vld [vmem:[%s4569_s1 + $0x480] sm:$0xff] }
  0x63   :  { %2207 = vmatpush.bf16.msrb.mxu1 %v3579_v42  ;;  %2176 = vmatmul.bf16.vlgmr.msra.gmra.mxu2 %v528_v47  ;;  %v3622_v42 = vld [vmem:[%s4569_s1 + $0x4d0] sm:$0xff]  ;;  %v3596_v47 = vld [vmem:[%s4569_s1 + $0x400] sm:$0xff] }
  0x64   :  { %2220 = vmatpush.bf16.msrb.mxu2 %v3587_v43  ;;  %2189 = vmatmul.bf16.vlgmr.msra.gmra.mxu3 %v529_v51  ;;  %v3597_v43 = vld [vmem:[%s4569_s1 + $0x408] sm:$0xff]  ;;  %v3643_v51 = vld [vmem:[%s4569_s1 + $0x578] sm:$0xff] }
  0x65   :  { %2233 = vmatpush.bf16.msrb.mxu3 %v3595_v46  ;;  %v3621_v46 = vld [vmem:[%s4569_s1 + $0x4c8] sm:$0xff] }
  0x66   :  { %2195 = vmatpush.bf16.msrb.mxu0 %v3570_v48  ;;  %v3604_v48 = vld [vmem:[%s4569_s1 + $0x440] sm:$0xff] }
  0x67   :  { %2208 = vmatpush.bf16.msrb.mxu1 %v3578_v50  ;;  %v3635_v50 = vld [vmem:[%s4569_s1 + $0x538] sm:$0xff] }
  0x68   :  { %2221 = vmatpush.bf16.msrb.mxu2 %v3586_v52  ;;  %v3651_v52 = vld [vmem:[%s4569_s1 + $0x5b8] sm:$0xff] }
  0x69   :  { %2234 = vmatpush.bf16.msrb.mxu3 %v3594_v53  ;;  %v3620_v53 = vld [vmem:[%s4569_s1 + $0x4c0] sm:$0xff] }
  0x6a   :  { %2196 = vmatpush.bf16.msrb.mxu0 %v3569_v54  ;;  %v536_v54 = vld [vmem:[#allocation1] sm:$0xff] }
  0x6b   :  { %2209 = vmatpush.bf16.msrb.mxu1 %v3577_v55  ;;  %v538_v55 = vld [vmem:[#allocation1 + $0x12] sm:$0xff] }
  0x6c   :  { %2222 = vmatpush.bf16.msrb.mxu2 %v3585_v56  ;;  %v3659_v56 = vld [vmem:[%s4569_s1 + $0x5f8] sm:$0xff] }
  0x6d   :  { %2235 = vmatpush.bf16.msrb.mxu3 %v3593_v57  ;;  %v537_v57 = vld [vmem:[#allocation1 + $0x9] sm:$0xff] }
  0x6e   :  { %2197 = vmatpush.bf16.msrb.mxu0 %v3568_v58  ;;  %v3634_v58 = vld [vmem:[%s4569_s1 + $0x530] sm:$0xff] }
  0x6f   :  { %2210 = vmatpush.bf16.msrb.mxu1 %v3576_v59  ;;  %v539_v59 = vld [vmem:[#allocation1 + $0x1b] sm:$0xff] }
  0x70   :  { %2223 = vmatpush.bf16.msrb.mxu2 %v3584_v60  ;;  %v3642_v60 = vld [vmem:[%s4569_s1 + $0x570] sm:$0xff] }
  0x71   :  { %2236 = vmatpush.bf16.msrb.mxu3 %v3592_v61  ;;  %v3650_v61 = vld [vmem:[%s4569_s1 + $0x5b0] sm:$0xff] }
  0x72   :  { %2198 = vmatpush.bf16.msrb.mxu0 %v3567_v62  ;;  %v3658_v62 = vld [vmem:[%s4569_s1 + $0x5f0] sm:$0xff] }
  0x73   :  { %2211 = vmatpush.bf16.msrb.mxu1 %v3575_v63  ;;  %v3633_v63 = vld [vmem:[%s4569_s1 + $0x528] sm:$0xff] }
  0x74   :  { %2224 = vmatpush.bf16.msrb.mxu2 %v3583_v0  ;;  %v3641_v0 = vld [vmem:[%s4569_s1 + $0x568] sm:$0xff] }
  0x75   :  { %2237 = vmatpush.bf16.msrb.mxu3 %v3591_v1  ;;  %v3649_v1 = vld [vmem:[%s4569_s1 + $0x5a8] sm:$0xff] }
  0x76   :  { %2199 = vmatpush.bf16.msrb.mxu0 %v3566_v2  ;;  %v3711_v2 = vld [vmem:[%s4570_s2] ss:$0 sm:$0xff] }
  0x77   :  { %2212 = vmatpush.bf16.msrb.mxu1 %v3574_v3  ;;  %v3657_v3 = vld [vmem:[%s4569_s1 + $0x5e8] sm:$0xff] }
  0x78   :  { %2225 = vmatpush.bf16.msrb.mxu2 %v3582_v4  ;;  %v3632_v4 = vld [vmem:[%s4569_s1 + $0x520] sm:$0xff] }
  0x79   :  { %2238 = vmatpush.bf16.msrb.mxu3 %v3590_v5 }
  0x7a   :  { %2200 = vmatpush.bf16.msrb.mxu0 %v3565_v6  ;;  %v3640_v6 = vld [vmem:[%s4569_s1 + $0x560] sm:$0xff] }
  0x7b   :  { %2213 = vmatpush.bf16.msrb.mxu1 %v3573_v7  ;;  %v3648_v7 = vld [vmem:[%s4569_s1 + $0x5a0] sm:$0xff] }
  0x7c   :  { %2226 = vmatpush.bf16.msrb.mxu2 %v3581_v8 }
  0x7d   :  { %2239 = vmatpush.bf16.msrb.mxu3 %v3589_v14  ;;  %v3647_v14 = vld [vmem:[%s4569_s1 + $0x598] sm:$0xff] }
  0x7e   :  { %2201 = vmatpush.bf16.msrb.mxu0 %v3564_v15  ;;  %v3655_v15 = vld [vmem:[%s4569_s1 + $0x5d8] sm:$0xff] }
  0x7f   :  { %2214 = vmatpush.bf16.msrb.mxu1 %v3572_v16 }
  0x80   :  { %2227 = vmatpush.bf16.msrb.mxu2 %v3580_v18 }
  0x81   :  { %2240 = vmatpush.bf16.msrb.mxu3 %v3588_v21  ;;  %2202 = vmatmul.bf16.vlgmr.msrb.gmra.mxu0 %v530_v9  ;;  %v3646_v21 = vld [vmem:[%s4569_s1 + $0x590] sm:$0xff] }
  0x82   :  { %2246 = vmatpush.bf16.msra.mxu0 %v3603_v17  ;;  %2215 = vmatmul.bf16.vlgmr.msrb.gmra.mxu1 %v531_v11  ;;  %v3630_v17 = vld [vmem:[%s4569_s1 + $0x510] sm:$0xff] }
  0x83   :  { %2259 = vmatpush.bf16.msra.mxu1 %v3611_v19  ;;  %2228 = vmatmul.bf16.vlgmr.msrb.gmra.mxu2 %v532_v10  ;;  %v3656_v10 = vld [vmem:[%s4569_s1 + $0x5e0] sm:$0xff] }
  0x84   :  { %2272 = vmatpush.bf16.msra.mxu2 %v3619_v20  ;;  %2241 = vmatmul.bf16.vlgmr.msrb.gmra.mxu3 %v533_v12  ;;  %v3631_v12 = vld [vmem:[%s4569_s1 + $0x518] sm:$0xff]  ;;  %v3638_v20 = vld [vmem:[%s4569_s1 + $0x550] sm:$0xff] }
  0x85   :  { %2285 = vmatpush.bf16.msra.mxu3 %v3627_v22 }
  0x86   :  { %2247 = vmatpush.bf16.msra.mxu0 %v3602_v23 }
  0x87   :  { %2260 = vmatpush.bf16.msra.mxu1 %v3610_v24  ;;  %v3654_v24 = vld [vmem:[%s4569_s1 + $0x5d0] sm:$0xff] }
  0x88   :  { %2273 = vmatpush.bf16.msra.mxu2 %v3618_v25 }
  0x89   :  { %2286 = vmatpush.bf16.msra.mxu3 %v3626_v26  ;;  %v3629_v26 = vld [vmem:[%s4569_s1 + $0x508] sm:$0xff] }
  0x8a   :  { %2248 = vmatpush.bf16.msra.mxu0 %v3601_v27  ;;  %v3637_v27 = vld [vmem:[%s4569_s1 + $0x548] sm:$0xff] }
  0x8b   :  { %2261 = vmatpush.bf16.msra.mxu1 %v3609_v28  ;;  %v3645_v28 = vld [vmem:[%s4569_s1 + $0x588] sm:$0xff] }
  0x8c   :  { %2274 = vmatpush.bf16.msra.mxu2 %v3617_v29  ;;  %v540_v29 = vld [vmem:[#allocation1 + $0x24] sm:$0xff] }
  0x8d   :  { %2287 = vmatpush.bf16.msra.mxu3 %v3625_v30  ;;  %v542_v30 = vld [vmem:[#allocation1 + $0x36] sm:$0xff] }
  0x8e   :  { %2249 = vmatpush.bf16.msra.mxu0 %v3600_v31  ;;  %v541_v31 = vld [vmem:[#allocation1 + $0x2d] sm:$0xff] }
  0x8f   :  { %2262 = vmatpush.bf16.msra.mxu1 %v3608_v32  ;;  %v543_v32 = vld [vmem:[#allocation1 + $0x3f] sm:$0xff] }
  0x90   :  { %2275 = vmatpush.bf16.msra.mxu2 %v3616_v33  ;;  %v25_v33 = vld [vmem:[%s4568_s0 + $0x18] sm:$0x7f]  ;;  %s2488_s0 = sshll.u32 %s3739_s6, 4  ;;  %s2489_s0 = int_to_ptr.vmem [resolvable:$true] %s2488_s0 }
  0x91   :  { %2288 = vmatpush.bf16.msra.mxu3 %v3624_v34  ;;  %v3653_v34 = vld [vmem:[%s4569_s1 + $0x5c8] sm:$0xff]  ;;  %545 = vst [vmem:[#allocation1] ss:$9 sm:$0xff] %v25_v33 }
  0x92   :  { %2250 = vmatpush.bf16.msra.mxu0 %v3599_v35 }
  0x93   :  { %2263 = vmatpush.bf16.msra.mxu1 %v3607_v36  ;;  %v3628_v36 = vld [vmem:[%s4569_s1 + $0x500] sm:$0xff] }
  0x94   :  { %2276 = vmatpush.bf16.msra.mxu2 %v3615_v37  ;;  %v3636_v37 = vld [vmem:[%s4569_s1 + $0x540] sm:$0xff] }
  0x95   :  { %2289 = vmatpush.bf16.msra.mxu3 %v3623_v38  ;;  %v3644_v38 = vld [vmem:[%s4569_s1 + $0x580] sm:$0xff] }
  0x96   :  { %2251 = vmatpush.bf16.msra.mxu0 %v3598_v39  ;;  %v3667_v39 = vld [vmem:[%s4569_s1 + $0x638] sm:$0xff] }
  0x97   :  { %2264 = vmatpush.bf16.msra.mxu1 %v3606_v40  ;;  %v3675_v40 = vld [vmem:[%s4569_s1 + $0x678] sm:$0xff] }
  0x98   :  { %2277 = vmatpush.bf16.msra.mxu2 %v3614_v41 }
  0x99   :  { %2290 = vmatpush.bf16.msra.mxu3 %v3622_v42  ;;  %v3683_v42 = vld [vmem:[%s4569_s1 + $0x6b8] sm:$0xff] }
  0x9a   :  { %2252 = vmatpush.bf16.msra.mxu0 %v3597_v43  ;;  %v3652_v43 = vld [vmem:[%s4569_s1 + $0x5c0] sm:$0xff] }
  0x9b   :  { %2265 = vmatpush.bf16.msra.mxu1 %v3605_v44  ;;  %v3691_v44 = vld [vmem:[%s4569_s1 + $0x6f8] sm:$0xff] }
  0x9c   :  { %2278 = vmatpush.bf16.msra.mxu2 %v3613_v45  ;;  %v3666_v45 = vld [vmem:[%s4569_s1 + $0x630] sm:$0xff] }
  0x9d   :  { %2291 = vmatpush.bf16.msra.mxu3 %v3621_v46  ;;  %v3674_v46 = vld [vmem:[%s4569_s1 + $0x670] sm:$0xff] }
  0x9e   :  { %2253 = vmatpush.bf16.msra.mxu0 %v3596_v47  ;;  %v2047_v5 = vpop.f32.mrf.mxu0  ;;  %v3682_v47 = vld [vmem:[%s4569_s1 + $0x6b0] sm:$0xff] }
  0x9f   :  { %2266 = vmatpush.bf16.msra.mxu1 %v3604_v48  ;;  %v2048_v8 = vadd.f32 %v3711_v2, %v2047_v5  ;;  %v2060_v9 = vpop.f32.mrf.mxu1  ;;  %v3690_v48 = vld [vmem:[%s4569_s1 + $0x6f0] sm:$0xff] }
  0xa0   :  { %2279 = vmatpush.bf16.msra.mxu2 %v3612_v49  ;;  %v3665_v49 = vld [vmem:[%s4569_s1 + $0x628] sm:$0xff]  ;;  %v3678_v5 = vld [vmem:[%s4569_s1 + $0x690] sm:$0xff] }
  0xa1   :  { %2292 = vmatpush.bf16.msra.mxu3 %v3620_v53  ;;  %2254 = vmatmul.bf16.vlgmr.msra.gmra.mxu0 %v536_v54  ;;  %v2061_v11 = vadd.f32 %v2060_v9, %v2048_v8  ;;  %v3664_v53 = vld [vmem:[%s4569_s1 + $0x620] sm:$0xff] }
  0xa2   :  { %2298 = vmatpush.bf16.msrb.mxu0 %v3635_v50  ;;  %2267 = vmatmul.bf16.vlgmr.msra.gmra.mxu1 %v537_v57  ;;  %v3673_v50 = vld [vmem:[%s4569_s1 + $0x668] sm:$0xff]  ;;  %v3672_v54 = vld [vmem:[%s4569_s1 + $0x660] sm:$0xff] }
  0xa3   :  { %2311 = vmatpush.bf16.msrb.mxu1 %v3643_v51  ;;  %2280 = vmatmul.bf16.vlgmr.msra.gmra.mxu2 %v538_v55  ;;  %v3681_v51 = vld [vmem:[%s4569_s1 + $0x6a8] sm:$0xff]  ;;  %v3680_v55 = vld [vmem:[%s4569_s1 + $0x6a0] sm:$0xff] }
  0xa4   :  { %2324 = vmatpush.bf16.msrb.mxu2 %v3651_v52  ;;  %2293 = vmatmul.bf16.vlgmr.msra.gmra.mxu3 %v539_v59  ;;  %v3689_v52 = vld [vmem:[%s4569_s1 + $0x6e8] sm:$0xff]  ;;  %v3688_v59 = vld [vmem:[%s4569_s1 + $0x6e0] sm:$0xff] }
  0xa5   :  { %2337 = vmatpush.bf16.msrb.mxu3 %v3659_v56 }
  0xa6   :  { %2299 = vmatpush.bf16.msrb.mxu0 %v3634_v58  ;;  %v2073_v16 = vpop.f32.mrf.mxu2  ;;  %v2049_v19 = vpop.f32.mrf.mxu0 }
  0xa7   :  { %2312 = vmatpush.bf16.msrb.mxu1 %v3642_v60  ;;  %v2074_v18 = vadd.f32 %v2073_v16, %v2061_v11  ;;  %v2086_v22 = vpop.f32.mrf.mxu3  ;;  %v2062_v23 = vpop.f32.mrf.mxu1  ;;  %v3663_v60 = vld [vmem:[%s4569_s1 + $0x618] sm:$0xff]  ;;  %v3661_v11 = vld [vmem:[%s4569_s1 + $0x608] sm:$0xff]  ;;  %v3660_v16 = vld [vmem:[%s4569_s1 + $0x600] sm:$0xff] }
  0xa8   :  { %2325 = vmatpush.bf16.msrb.mxu2 %v3650_v61  ;;  %v546_v23 = vld [vmem:[#allocation1] sm:$0xff] }
  0xa9   :  { %2338 = vmatpush.bf16.msrb.mxu3 %v3658_v62  ;;  %v2087_v25 = vadd.f32 %v2086_v22, %v2074_v18  ;;  %v3671_v62 = vld [vmem:[%s4569_s1 + $0x658] sm:$0xff]  ;;  %v3676_v18 = vld [vmem:[%s4569_s1 + $0x680] sm:$0xff] }
  0xaa   :  { %2300 = vmatpush.bf16.msrb.mxu0 %v3633_v63  ;;  %v3679_v63 = vld [vmem:[%s4569_s1 + $0x698] sm:$0xff]  ;;  %v3684_v22 = vld [vmem:[%s4569_s1 + $0x6c0] sm:$0xff] }
  0xab   :  { %2313 = vmatpush.bf16.msrb.mxu1 %v3641_v0 }
  0xac   :  { %2326 = vmatpush.bf16.msrb.mxu2 %v3649_v1  ;;  %v3687_v1 = vld [vmem:[%s4569_s1 + $0x6d8] sm:$0xff] }
  0xad   :  { %2339 = vmatpush.bf16.msrb.mxu3 %v3657_v3  ;;  %v3662_v3 = vld [vmem:[%s4569_s1 + $0x610] sm:$0xff] }
  0xae   :  { %2301 = vmatpush.bf16.msrb.mxu0 %v3632_v4  ;;  %v2075_v35 = vpop.f32.mrf.mxu2  ;;  %v3670_v4 = vld [vmem:[%s4569_s1 + $0x650] sm:$0xff] }
  0xaf   :  { %2314 = vmatpush.bf16.msrb.mxu1 %v3640_v6  ;;  %v2088_v41 = vpop.f32.mrf.mxu3  ;;  %v3696_v35 = vld [vmem:[%s4569_s1 + $0x720] sm:$0xff] }
  0xb0   :  { %2327 = vmatpush.bf16.msrb.mxu2 %v3648_v7 }
  0xb1   :  { %2340 = vmatpush.bf16.msrb.mxu3 %v3656_v10  ;;  %v3686_v10 = vld [vmem:[%s4569_s1 + $0x6d0] sm:$0xff] }
  0xb2   :  { %2302 = vmatpush.bf16.msrb.mxu0 %v3631_v12  ;;  %v3669_v12 = vld [vmem:[%s4569_s1 + $0x648] sm:$0xff] }
  0xb3   :  { %2315 = vmatpush.bf16.msrb.mxu1 %v3639_v13  ;;  %v3677_v13 = vld [vmem:[%s4569_s1 + $0x688] sm:$0xff] }
  0xb4   :  { %2328 = vmatpush.bf16.msrb.mxu2 %v3647_v14 }
  0xb5   :  { %2341 = vmatpush.bf16.msrb.mxu3 %v3655_v15  ;;  %v3685_v15 = vld [vmem:[%s4569_s1 + $0x6c8] sm:$0xff] }
  0xb6   :  { %2303 = vmatpush.bf16.msrb.mxu0 %v3630_v17  ;;  %v3668_v17 = vld [vmem:[%s4569_s1 + $0x640] sm:$0xff] }
  0xb7   :  { %2316 = vmatpush.bf16.msrb.mxu1 %v3638_v20  ;;  %v3699_v20 = vld [vmem:[%s4569_s1 + $0x738] sm:$0xff] }
  0xb8   :  { %2329 = vmatpush.bf16.msrb.mxu2 %v3646_v21  ;;  %v3707_v21 = vld [vmem:[%s4569_s1 + $0x778] sm:$0xff] }
  0xb9   :  { %2342 = vmatpush.bf16.msrb.mxu3 %v3654_v24  ;;  %v548_v24 = vld [vmem:[#allocation1 + $0x12] sm:$0xff] }
  0xba   :  { %2304 = vmatpush.bf16.msrb.mxu0 %v3629_v26  ;;  %v3709_v26 = vld [vmem:[%s4569_s1 + $0x788] sm:$0xff] }
  0xbb   :  { %2317 = vmatpush.bf16.msrb.mxu1 %v3637_v27  ;;  %v3698_v27 = vld [vmem:[%s4569_s1 + $0x730] sm:$0xff] }
  0xbc   :  { %2330 = vmatpush.bf16.msrb.mxu2 %v3645_v28  ;;  %v549_v28 = vld [vmem:[#allocation1 + $0x1b] sm:$0xff] }
  0xbd   :  { %2343 = vmatpush.bf16.msrb.mxu3 %v3653_v34 }
  0xbe   :  { %2305 = vmatpush.bf16.msrb.mxu0 %v3628_v36  ;;  %v2099_v56 = vpop.f32.mrf.mxu0  ;;  %v3704_v36 = vld [vmem:[%s4569_s1 + $0x760] sm:$0xff] }
  0xbf   :  { %2318 = vmatpush.bf16.msrb.mxu1 %v3636_v37  ;;  %v2112_v57 = vpop.f32.mrf.mxu1  ;;  %v2100_v58 = vadd.f32 %v2099_v56, %v2087_v25  ;;  %v547_v25 = vld [vmem:[#allocation1 + $0x9] sm:$0xff] }
  0xc0   :  { %2331 = vmatpush.bf16.msrb.mxu2 %v3644_v38  ;;  %v550_v56 = vld [vmem:[#allocation1 + $0x24] sm:$0xff] }
  0xc1   :  { %2344 = vmatpush.bf16.msrb.mxu3 %v3652_v43  ;;  %2306 = vmatmul.bf16.vlgmr.msrb.gmra.mxu0 %v540_v29  ;;  %v2113_v61 = vadd.f32 %v2112_v57, %v2100_v58  ;;  %v3706_v29 = vld [vmem:[%s4569_s1 + $0x770] sm:$0xff] }
  0xc2   :  { %2350 = vmatpush.bf16.msra.mxu0 %v3667_v39  ;;  %2319 = vmatmul.bf16.vlgmr.msrb.gmra.mxu1 %v541_v31  ;;  %v3697_v31 = vld [vmem:[%s4569_s1 + $0x728] sm:$0xff]  ;;  %v3695_v39 = vld [vmem:[%s4569_s1 + $0x718] sm:$0xff] }
  0xc3   :  { %2363 = vmatpush.bf16.msra.mxu1 %v3675_v40  ;;  %2332 = vmatmul.bf16.vlgmr.msrb.gmra.mxu2 %v542_v30  ;;  %v3708_v30 = vld [vmem:[%s4569_s1 + $0x780] sm:$0xff]  ;;  %v3703_v40 = vld [vmem:[%s4569_s1 + $0x758] sm:$0xff]  ;;  %v551_v57 = vld [vmem:[#allocation1 + $0x2d] sm:$0xff] }
  0xc4   :  { %2376 = vmatpush.bf16.msra.mxu2 %v3683_v42  ;;  %2345 = vmatmul.bf16.vlgmr.msrb.gmra.mxu3 %v543_v32  ;;  %v3705_v32 = vld [vmem:[%s4569_s1 + $0x768] sm:$0xff]  ;;  %v552_v43 = vld [vmem:[#allocation1 + $0x36] sm:$0xff] }
  0xc5   :  { %2389 = vmatpush.bf16.msra.mxu3 %v3691_v44 }
  0xc6   :  { %2351 = vmatpush.bf16.msra.mxu0 %v3666_v45  ;;  %v2125_v0 = vpop.f32.mrf.mxu2  ;;  %v2101_v7 = vpop.f32.mrf.mxu0 }
  0xc7   :  { %2364 = vmatpush.bf16.msra.mxu1 %v3674_v46  ;;  %v2126_v2 = vadd.f32 %v2125_v0, %v2113_v61  ;;  %v2138_v6 = vpop.f32.mrf.mxu3  ;;  %v2114_v9 = vpop.f32.mrf.mxu1  ;;  %v3694_v46 = vld [vmem:[%s4569_s1 + $0x710] sm:$0xff] }
  0xc8   :  { %2377 = vmatpush.bf16.msra.mxu2 %v3682_v47 }
  0xc9   :  { %2390 = vmatpush.bf16.msra.mxu3 %v3690_v48  ;;  %v2139_v8 = vadd.f32 %v2138_v6, %v2126_v2  ;;  %v3702_v48 = vld [vmem:[%s4569_s1 + $0x750] sm:$0xff] }
  0xca   :  { %2352 = vmatpush.bf16.msra.mxu0 %v3665_v49 }
  0xcb   :  { %2365 = vmatpush.bf16.msra.mxu1 %v3673_v50  ;;  %v3693_v50 = vld [vmem:[%s4569_s1 + $0x708] sm:$0xff] }
  0xcc   :  { %2378 = vmatpush.bf16.msra.mxu2 %v3681_v51  ;;  %v3701_v51 = vld [vmem:[%s4569_s1 + $0x748] sm:$0xff] }
  0xcd   :  { %2391 = vmatpush.bf16.msra.mxu3 %v3689_v52 }
  0xce   :  { %2353 = vmatpush.bf16.msra.mxu0 %v3664_v53  ;;  %v2127_v14 = vpop.f32.mrf.mxu2  ;;  %v3692_v53 = vld [vmem:[%s4569_s1 + $0x700] sm:$0xff] }
  0xcf   :  { %2366 = vmatpush.bf16.msra.mxu1 %v3672_v54  ;;  %v2140_v19 = vpop.f32.mrf.mxu3 }
  0xd0   :  { %2379 = vmatpush.bf16.msra.mxu2 %v3680_v55  ;;  %v3700_v55 = vld [vmem:[%s4569_s1 + $0x740] sm:$0xff] }
  0xd1   :  { %2392 = vmatpush.bf16.msra.mxu3 %v3688_v59 }
  0xd2   :  { %2354 = vmatpush.bf16.msra.mxu0 %v3663_v60 }
  0xd3   :  { %2367 = vmatpush.bf16.msra.mxu1 %v3671_v62 }
  0xd4   :  { %2380 = vmatpush.bf16.msra.mxu2 %v3679_v63 }
  0xd5   :  { %2393 = vmatpush.bf16.msra.mxu3 %v3687_v1 }
  0xd6   :  { %2355 = vmatpush.bf16.msra.mxu0 %v3662_v3 }
  0xd7   :  { %2368 = vmatpush.bf16.msra.mxu1 %v3670_v4 }
  0xd8   :  { %2381 = vmatpush.bf16.msra.mxu2 %v3678_v5 }
  0xd9   :  { %2394 = vmatpush.bf16.msra.mxu3 %v3686_v10 }
  0xda   :  { %2356 = vmatpush.bf16.msra.mxu0 %v3661_v11 }
  0xdb   :  { %2369 = vmatpush.bf16.msra.mxu1 %v3669_v12 }
  0xdc   :  { %2382 = vmatpush.bf16.msra.mxu2 %v3677_v13 }
  0xdd   :  { %2395 = vmatpush.bf16.msra.mxu3 %v3685_v15 }
  0xde   :  { %2357 = vmatpush.bf16.msra.mxu0 %v3660_v16  ;;  %v2151_v33 = vpop.f32.mrf.mxu0 }
  0xdf   :  { %2370 = vmatpush.bf16.msra.mxu1 %v3668_v17  ;;  %v2152_v34 = vadd.f32 %v2151_v33, %v2139_v8  ;;  %v2164_v37 = vpop.f32.mrf.mxu1  ;;  %v2448_v33 = vld [vmem:[%s4571_s3 + $0x30] sm:$0xff] }
  0xe0   :  { %2383 = vmatpush.bf16.msra.mxu2 %v3676_v18  ;;  %v2457_v18 = vld [vmem:[%s4571_s3 + $0x78] sm:$0xff] }
  0xe1   :  { %2396 = vmatpush.bf16.msra.mxu3 %v3684_v22  ;;  %2358 = vmatmul.bf16.vlgmr.msra.gmra.mxu0 %v546_v23  ;;  %v2165_v38 = vadd.f32 %v2164_v37, %v2152_v34  ;;  %v2447_v34 = vld [vmem:[%s4571_s3 + $0x28] sm:$0xff]  ;;  %v2445_v37 = vld [vmem:[%s4571_s3 + $0x18] sm:$0xff] }
  0xe2   :  { %2402 = vmatpush.bf16.msrb.mxu0 %v3699_v20  ;;  %2371 = vmatmul.bf16.vlgmr.msra.gmra.mxu1 %v547_v25  ;;  %v2456_v20 = vld [vmem:[%s4571_s3 + $0x70] sm:$0xff]  ;;  %v2454_v25 = vld [vmem:[%s4571_s3 + $0x60] sm:$0xff] }
  0xe3   :  { %2415 = vmatpush.bf16.msrb.mxu1 %v3707_v21  ;;  %2384 = vmatmul.bf16.vlgmr.msra.gmra.mxu2 %v548_v24  ;;  %v2455_v21 = vld [vmem:[%s4571_s3 + $0x68] sm:$0xff] }
  0xe4   :  { %2434 = vmatpush.bf16.msrb.mxu2 %v3709_v26  ;;  %2397 = vmatmul.bf16.vlgmr.msra.gmra.mxu3 %v549_v28  ;;  %v2453_v26 = vld [vmem:[%s4571_s3 + $0x58] sm:$0xff] }
  0xe5   :  { %2462 = vmatpush.msrb.mxu3 %v2457_v18 }
  0xe6   :  { %2403 = vmatpush.bf16.msrb.mxu0 %v3698_v27  ;;  %v2177_v41 = vpop.f32.mrf.mxu2  ;;  %v2153_v44 = vpop.f32.mrf.mxu0  ;;  %v2452_v27 = vld [vmem:[%s4571_s3 + $0x50] sm:$0xff] }
  0xe7   :  { %2416 = vmatpush.bf16.msrb.mxu1 %v3706_v29  ;;  %v2178_v42 = vadd.f32 %v2177_v41, %v2165_v38  ;;  %v2190_v45 = vpop.f32.mrf.mxu3  ;;  %v2166_v49 = vpop.f32.mrf.mxu1  ;;  %2463 = vmatpush.msrb.mxu3 %v2456_v20  ;;  %v2451_v29 = vld [vmem:[%s4571_s3 + $0x48] sm:$0xff] }
  0xe8   :  { %2435 = vmatpush.bf16.msrb.mxu2 %v3708_v30  ;;  %v2443_v41 = vld [vmem:[%s4571_s3 + $0x8] sm:$0xff] }
  0xe9   :  { %v2191_v47 = vadd.f32 %v2190_v45, %v2178_v42  ;;  %2464 = vmatpush.msrb.mxu3 %v2455_v21 }
  0xea   :  { %2404 = vmatpush.bf16.msrb.mxu0 %v3697_v31  ;;  %v2450_v31 = vld [vmem:[%s4571_s3 + $0x40] sm:$0xff] }
  0xeb   :  { %2417 = vmatpush.bf16.msrb.mxu1 %v3705_v32  ;;  %2465 = vmatpush.msrb.mxu3 %v2454_v25  ;;  %v2449_v32 = vld [vmem:[%s4571_s3 + $0x38] sm:$0xff] }
  0xed   :  { %2466 = vmatpush.msrb.mxu3 %v2453_v26 }
  0xee   :  { %2405 = vmatpush.bf16.msrb.mxu0 %v3696_v35  ;;  %v2179_v52 = vpop.f32.mrf.mxu2  ;;  %v2446_v35 = vld [vmem:[%s4571_s3 + $0x20] sm:$0xff] }
  0xef   :  { %2418 = vmatpush.bf16.msrb.mxu1 %v3704_v36  ;;  %v2192_v54 = vpop.f32.mrf.mxu3  ;;  %2467 = vmatpush.msrb.mxu3 %v2452_v27 }
  0xf1   :  { %2468 = vmatpush.msrb.mxu3 %v2451_v29 }
  0xf2   :  { %2406 = vmatpush.bf16.msrb.mxu0 %v3695_v39 }
  0xf3   :  { %2419 = vmatpush.bf16.msrb.mxu1 %v3703_v40  ;;  %3467 = vmatmul.msk.bf16.vlgmr.msrb.gmra.mxu2 %vm2035_vm0, %v552_v43  ;;  %v2444_v40 = vld [vmem:[%s4571_s3 + $0x10] sm:$0xff]  ;;  %v2442_v43 = vld [vmem:[%s4571_s3] sm:$0xff] }
  0xf4   :  { %2469 = vmatpush.msrb.mxu3 %v2450_v31 }
  0xf6   :  { %2407 = vmatpush.bf16.msrb.mxu0 %v3694_v46  ;;  %2470 = vmatpush.msrb.mxu3 %v2449_v32 }
  0xf7   :  { %2420 = vmatpush.bf16.msrb.mxu1 %v3702_v48 }
  0xf8   :  { %2471 = vmatpush.msrb.mxu3 %v2448_v33 }
  0xfa   :  { %2408 = vmatpush.bf16.msrb.mxu0 %v3693_v50  ;;  %2472 = vmatpush.msrb.mxu3 %v2447_v34 }
  0xfb   :  { %2421 = vmatpush.bf16.msrb.mxu1 %v3701_v51 }
  0xfc   :  { %2473 = vmatpush.msrb.mxu3 %v2446_v35 }
  0xfe   :  { %2409 = vmatpush.bf16.msrb.mxu0 %v3692_v53  ;;  %v2203_v58 = vpop.f32.mrf.mxu0  ;;  %2474 = vmatpush.msrb.mxu3 %v2445_v37 }
  0xff   :  { %2422 = vmatpush.bf16.msrb.mxu1 %v3700_v55  ;;  %v2204_v59 = vadd.f32 %v2203_v58, %v2191_v47  ;;  %v2216_v60 = vpop.f32.mrf.mxu1 }
 0x100   :  { %2475 = vmatpush.msrb.mxu3 %v2444_v40 }
 0x101   :  { %2410 = vmatmul.bf16.vlgmr.msrb.gmra.mxu0 %v550_v56  ;;  %v2217_v61 = vadd.f32 %v2216_v60, %v2204_v59 }
 0x102   :  { %2423 = vmatmul.bf16.vlgmr.msrb.gmra.mxu1 %v551_v57  ;;  %2476 = vmatpush.msrb.mxu3 %v2443_v41 }
 0x104   :  { %2477 = vmatpush.msrb.mxu3 %v2442_v43 }
 0x106   :  { %v2229_v62 = vpop.f32.mrf.mxu2  ;;  %v2205_v1 = vpop.f32.mrf.mxu0 }
 0x107   :  { %v2230_v63 = vadd.f32 %v2229_v62, %v2217_v61  ;;  %v2242_v0 = vpop.f32.mrf.mxu3  ;;  %v2218_v2 = vpop.f32.mrf.mxu1 }
 0x109   :  { %v2243_v3 = vadd.f32 %v2242_v0, %v2230_v63 }
 0x10e   :  { %v2231_v4 = vpop.f32.mrf.mxu2 }
 0x10f   :  { %v2244_v5 = vpop.f32.mrf.mxu3  ;;  %v3712_v4 = vld [vmem:[%s4572_s4] ss:$0 sm:$0xff] }
 0x11e   :  { %v2255_v6 = vpop.f32.mrf.mxu0 }
 0x11f   :  { %v2256_v7 = vadd.f32 %v2255_v6, %v2243_v3  ;;  %v2268_v8 = vpop.f32.mrf.mxu1 }
 0x121   :  { %v2269_v9 = vadd.f32 %v2268_v8, %v2256_v7 }
 0x126   :  { %v2281_v10 = vpop.f32.mrf.mxu2  ;;  %v2257_v12 = vpop.f32.mrf.mxu0 }
 0x127   :  { %v2294_v11 = vpop.f32.mrf.mxu3  ;;  %v2270_v13 = vpop.f32.mrf.mxu1  ;;  %v2282_v38 = vadd.f32 %v2281_v10, %v2269_v9 }
 0x129   :  { %v2295_v42 = vadd.f32 %v2294_v11, %v2282_v38 }
 0x12e   :  { %v2283_v14 = vpop.f32.mrf.mxu2 }
 0x12f   :  { %v2296_v15 = vpop.f32.mrf.mxu3 }
 0x13e   :  { %v2307_v16 = vpop.f32.mrf.mxu0 }
 0x13f   :  { %v2320_v17 = vpop.f32.mrf.mxu1  ;;  %v2308_v44 = vadd.f32 %v2307_v16, %v2295_v42 }
 0x141   :  { %v2321_v49 = vadd.f32 %v2320_v17, %v2308_v44 }
 0x146   :  { %v2333_v19 = vpop.f32.mrf.mxu2  ;;  %v2309_v23 = vpop.f32.mrf.mxu0 }
 0x147   :  { %v2346_v22 = vpop.f32.mrf.mxu3  ;;  %v2322_v24 = vpop.f32.mrf.mxu1  ;;  %v2334_v50 = vadd.f32 %v2333_v19, %v2321_v49 }
 0x149   :  { %v2347_v52 = vadd.f32 %v2346_v22, %v2334_v50 }
 0x14e   :  { %v2335_v28 = vpop.f32.mrf.mxu2 }
 0x14f   :  { %v2348_v30 = vpop.f32.mrf.mxu3 }
 0x15e   :  { %v2359_v36 = vpop.f32.mrf.mxu0 }
 0x15f   :  { %v2372_v39 = vpop.f32.mrf.mxu1  ;;  %v2360_v54 = vadd.f32 %v2359_v36, %v2347_v52 }
 0x161   :  { %v2373_v55 = vadd.f32 %v2372_v39, %v2360_v54 }
 0x166   :  { %v2385_v45 = vpop.f32.mrf.mxu2  ;;  %v2361_v46 = vpop.f32.mrf.mxu0 }
 0x167   :  { %v2398_v47 = vpop.f32.mrf.mxu3  ;;  %v2374_v48 = vpop.f32.mrf.mxu1  ;;  %v2386_v57 = vadd.f32 %v2385_v45, %v2373_v55 }
 0x169   :  { %v2399_v58 = vadd.f32 %v2398_v47, %v2386_v57 }
 0x16e   :  { %v2387_v51 = vpop.f32.mrf.mxu2 }
 0x16f   :  { %v2400_v53 = vpop.f32.mrf.mxu3 }
 0x176   :  { %v2437_v56 = vpop.f32.mrf.mxu2 }
 0x17e   :  { %v2411_v59 = vpop.f32.mrf.mxu0  ;;  %v2439_v62 = vpop.f32.mrf.mxu2 }
 0x17f   :  { %v2412_v60 = vadd.f32 %v2411_v59, %v2399_v58  ;;  %v2424_v61 = vpop.f32.mrf.mxu1 }
 0x181   :  { %v2425_v63 = vadd.f32 %v2424_v61, %v2412_v60 }
 0x183   :  { %v2438_v0 = vadd.f32 %v2437_v56, %v2425_v63 }
 0x185   :  { %v2441_v1 = vmax.f32 %v2438_v0, 0.0 }
 0x186   :  { %v2413_v2 = vpop.f32.mrf.mxu0 }
 0x187   :  { %v2426_v3 = vpop.f32.mrf.mxu1  ;;  %2478 = vmatmul.f32.vlgmr.msrb.gmra.mxu3 %v2441_v1 }
 0x20a   :  { %v2479_v5 = vpop.f32.mrf.mxu3 }
 0x20b   :  { %v2480_v6 = vadd.f32 %v3712_v4, %v2479_v5 }
 0x20d   :  { %2482 = vst [vmem:[#allocation2] sm:$0x3] %v2480_v6 }
 0x20e   :  { %2493 = dma.vmem_to_hbm [thread:$0]  %s2489_s0, 32, %s2491_s9, [#allocation3]  }
 0x20f   :  { %3737 = dma.done.wait [#allocation3], 32  }
 0x210   :  { %3738 = vsyncadd [#allocation3], 4294967264 }
 0x211   :  { %2498 = vsyncpa [#allocation3], 1 }

</bundles_post_ra>
